<compile_context>
chip_gen: v5e
topology: v5e:2x2
jax: 0.10.0
libtpu: 0.0.40
codegen_flags: <defaults>
</compile_context>

<pallas_src>
import jax
import jax.numpy as jnp
from jax.experimental import pallas as pl
from jax.experimental.pallas import tpu as pltpu

INPUT_SIZE = 440
LATENT_DIM = 8
PAD_SIZE = 512  # 440 rounded up to a lane multiple (4 * 128)

# Layer widths of the autoencoder: encoder then decoder.
LAYER_DIMS = [
    (INPUT_SIZE, 128), (128, 64), (64, 36), (36, 18), (18, LATENT_DIM),   # encoder
    (LATENT_DIM, 18), (18, 36), (36, 64), (64, 128), (128, INPUT_SIZE),   # decoder
]
NUM_LAYERS = len(LAYER_DIMS)


def _autoencoder_kernel(x_ref, *refs):
    """refs = (w1, b1, ..., w10, b10, out_ref). All tiles live in VMEM."""
    param_refs = refs[:-1]
    out_ref = refs[-1]

    h = x_ref[...]  # (bm, PAD_SIZE) float32
    for layer in range(NUM_LAYERS):
        w = param_refs[2 * layer][...]        # (in, out), compute dtype (f32/bf16)
        b = param_refs[2 * layer + 1][...]    # (1, out), f32
        # MXU matmul with f32 accumulation; bias add / ReLU stay f32 on the VPU.
        z = jnp.dot(h.astype(w.dtype), w, preferred_element_type=jnp.float32) + b
        # ReLU after layers 0..3 and 5..8; none after layer 4 (encoder output),
        # Sigmoid after layer 9 — exactly as in the PyTorch Sequential.
        if layer != NUM_LAYERS - 1 and layer != 4:
            z = jnp.maximum(z, 0.0)
        h = z

    # Sigmoid via tanh: numerically stable and lands on the EUP (no VPU divide).
    out_ref[...] = (0.5 * jnp.tanh(0.5 * h) + 0.5).astype(out_ref.dtype)


def make_autoencoder(params, *, batch_tile=256, compute_dtype=jnp.float32):
    """Returns a jitted fn x:(B, INPUT_SIZE) -> (B, INPUT_SIZE) float32."""
    assert len(params) == NUM_LAYERS

    flat_params = []
    for layer, (w, b) in enumerate(params):
        w = jnp.asarray(w, jnp.float32)
        b = jnp.asarray(b, jnp.float32)
        if layer == 0:
            # Zero-pad input features 440 -> 512 (extra rows never contribute).
            w = jnp.pad(w, ((0, PAD_SIZE - INPUT_SIZE), (0, 0)))
        if layer == NUM_LAYERS - 1:
            # Zero-pad output features 440 -> 512 (extra cols sliced off later).
            w = jnp.pad(w, ((0, 0), (0, PAD_SIZE - INPUT_SIZE)))
            b = jnp.pad(b, (0, PAD_SIZE - INPUT_SIZE))
        flat_params.append(w.astype(compute_dtype))       # matmul inputs
        flat_params.append(b.reshape(1, -1))               # biases stay f32, 2-D

    param_bytes = sum(int(p.size) * p.dtype.itemsize for p in flat_params)
    flops_per_row = 2 * sum(int(w.shape[0]) * int(w.shape[1])
                            for w in flat_params[0::2])

    def _fwd(x):
        B, F = x.shape
        assert F == INPUT_SIZE
        bm = batch_tile
        n_tiles = pl.cdiv(B, bm)
        B_pad = n_tiles * bm
        xp = jnp.pad(x.astype(jnp.float32),
                     ((0, B_pad - B), (0, PAD_SIZE - INPUT_SIZE)))

        x_spec = pl.BlockSpec((bm, PAD_SIZE), lambda i: (i, 0))
        # Weights / biases: full-array blocks, identical for every grid step
        # (constant index_map -> fetched once by the pipeline).
        param_specs = [pl.BlockSpec(p.shape, lambda i: (0, 0)) for p in flat_params]
        out_spec = pl.BlockSpec((bm, PAD_SIZE), lambda i: (i, 0))

        cost = pl.CostEstimate(
            flops=int(B_pad) * flops_per_row,
            transcendentals=int(B_pad) * PAD_SIZE,
            bytes_accessed=int(B_pad) * PAD_SIZE * 4 * 2 + param_bytes,
        )

        # Double-buffered x/out tiles + double-buffered params + slack.
        vmem_needed = 2 * (2 * bm * PAD_SIZE * 4) + 2 * param_bytes + (1 << 20)
        compiler_params = pltpu.CompilerParams(
            dimension_semantics=("parallel",),   # batch axis -> both TCs on v7x
            vmem_limit_bytes=vmem_needed if vmem_needed > (32 << 20) else None,
        )

        out = pl.pallas_call(
            _autoencoder_kernel,
            out_shape=jax.ShapeDtypeStruct((B_pad, PAD_SIZE), jnp.float32),
            grid_spec=pltpu.PrefetchScalarGridSpec(
                num_scalar_prefetch=0,
                grid=(n_tiles,),
                in_specs=[x_spec] + param_specs,
                out_specs=out_spec,
            ),
            compiler_params=compiler_params,
            cost_estimate=cost,
        )(xp, *flat_params)
        return out[:B, :INPUT_SIZE]

    return jax.jit(_fwd)


def init_params(key):
    """Deterministic init mimicking PyTorch's default Linear init
    (uniform in +/- 1/sqrt(fan_in)).  Weights stored as (in, out)."""
    params = []
    for (fan_in, fan_out) in LAYER_DIMS:
        key, kw, kb = jax.random.split(key, 3)
        bound = 1.0 / jnp.sqrt(fan_in)
        w = jax.random.uniform(
            kw, (fan_in, fan_out), minval=-bound, maxval=bound, dtype=jnp.float32
        )
        b = jax.random.uniform(
            kb, (fan_out,), minval=-bound, maxval=bound, dtype=jnp.float32
        )
        params.append((w, b))
    return params


def reference_forward(params, x):
    """Plain-JAX reference (same math as the PyTorch module)."""
    h = x
    for layer, (w, b) in enumerate(params):
        h = h @ w + b
        if layer < NUM_LAYERS - 1 and layer != 4:
            h = jnp.maximum(h, 0.0)
    return jax.nn.sigmoid(h)


if __name__ == "__main__":
    key = jax.random.PRNGKey(0)
    key, kx = jax.random.split(key)

    params = init_params(key)

    B = 300  # deliberately not a multiple of the batch tile (exercises padding)
    x = jax.random.uniform(kx, (B, INPUT_SIZE), dtype=jnp.float32)
    ref = reference_forward(params, x)

    # f32 path: matches the reference tightly.
    fwd_f32 = make_autoencoder(params, batch_tile=256, compute_dtype=jnp.float32)
    out_f32 = jax.block_until_ready(fwd_f32(x))
    assert out_f32.shape == (B, INPUT_SIZE)
    assert jnp.allclose(out_f32, ref, atol=1e-4, rtol=1e-4), "f32 mismatch vs reference"

    # bf16 matmul-input path (recommended on v6e / v7x); f32 accumulation keeps
    # the sigmoid outputs within a few 1e-3 of the f32 reference.
    fwd_bf16 = make_autoencoder(params, batch_tile=256, compute_dtype=jnp.bfloat16)
    out_bf16 = jax.block_until_ready(fwd_bf16(x))
    assert out_bf16.shape == (B, INPUT_SIZE)
    assert jnp.allclose(out_bf16, ref, atol=5e-2), "bf16 mismatch vs reference"

    print("KERNEL_OK")
</pallas_src>

<mosaic_0001>
module attributes {stable_mosaic.version = 11 : i64} {
  func.func @_autoencoder_kernel(%arg0: i32, %arg1: memref<256x512xf32, #tpu.memory_space<vmem>>, %arg2: memref<512x128xf32, #tpu.memory_space<vmem>>, %arg3: memref<1x128xf32, #tpu.memory_space<vmem>>, %arg4: memref<128x64xf32, #tpu.memory_space<vmem>>, %arg5: memref<1x64xf32, #tpu.memory_space<vmem>>, %arg6: memref<64x36xf32, #tpu.memory_space<vmem>>, %arg7: memref<1x36xf32, #tpu.memory_space<vmem>>, %arg8: memref<36x18xf32, #tpu.memory_space<vmem>>, %arg9: memref<1x18xf32, #tpu.memory_space<vmem>>, %arg10: memref<18x8xf32, #tpu.memory_space<vmem>>, %arg11: memref<1x8xf32, #tpu.memory_space<vmem>>, %arg12: memref<8x18xf32, #tpu.memory_space<vmem>>, %arg13: memref<1x18xf32, #tpu.memory_space<vmem>>, %arg14: memref<18x36xf32, #tpu.memory_space<vmem>>, %arg15: memref<1x36xf32, #tpu.memory_space<vmem>>, %arg16: memref<36x64xf32, #tpu.memory_space<vmem>>, %arg17: memref<1x64xf32, #tpu.memory_space<vmem>>, %arg18: memref<64x128xf32, #tpu.memory_space<vmem>>, %arg19: memref<1x128xf32, #tpu.memory_space<vmem>>, %arg20: memref<128x512xf32, #tpu.memory_space<vmem>>, %arg21: memref<1x512xf32, #tpu.memory_space<vmem>>, %arg22: memref<256x512xf32, #tpu.memory_space<vmem>>) attributes {dimension_semantics = [#tpu.dimension_semantics<parallel>], iteration_bounds = array<i64: 2>, scalar_prefetch = 0 : i64, scratch_operands = 0 : i64, tpu.core_type = #tpu.core_type<tc>, window_params = [{transform_indices = @transform_0, window_bounds = array<i64: 256, 512>}, {pipeline_mode = #tpu.pipeline_mode<synchronous>, transform_indices = @transform_1, window_bounds = array<i64: 512, 128>}, {pipeline_mode = #tpu.pipeline_mode<synchronous>, transform_indices = @transform_2, window_bounds = array<i64: 1, 128>}, {pipeline_mode = #tpu.pipeline_mode<synchronous>, transform_indices = @transform_3, window_bounds = array<i64: 128, 64>}, {pipeline_mode = #tpu.pipeline_mode<synchronous>, transform_indices = @transform_4, window_bounds = array<i64: 1, 64>}, {pipeline_mode = #tpu.pipeline_mode<synchronous>, transform_indices = @transform_5, window_bounds = array<i64: 64, 36>}, {pipeline_mode = #tpu.pipeline_mode<synchronous>, transform_indices = @transform_6, window_bounds = array<i64: 1, 36>}, {pipeline_mode = #tpu.pipeline_mode<synchronous>, transform_indices = @transform_7, window_bounds = array<i64: 36, 18>}, {pipeline_mode = #tpu.pipeline_mode<synchronous>, transform_indices = @transform_8, window_bounds = array<i64: 1, 18>}, {pipeline_mode = #tpu.pipeline_mode<synchronous>, transform_indices = @transform_9, window_bounds = array<i64: 18, 8>}, {pipeline_mode = #tpu.pipeline_mode<synchronous>, transform_indices = @transform_10, window_bounds = array<i64: 1, 8>}, {pipeline_mode = #tpu.pipeline_mode<synchronous>, transform_indices = @transform_11, window_bounds = array<i64: 8, 18>}, {pipeline_mode = #tpu.pipeline_mode<synchronous>, transform_indices = @transform_12, window_bounds = array<i64: 1, 18>}, {pipeline_mode = #tpu.pipeline_mode<synchronous>, transform_indices = @transform_13, window_bounds = array<i64: 18, 36>}, {pipeline_mode = #tpu.pipeline_mode<synchronous>, transform_indices = @transform_14, window_bounds = array<i64: 1, 36>}, {pipeline_mode = #tpu.pipeline_mode<synchronous>, transform_indices = @transform_15, window_bounds = array<i64: 36, 64>}, {pipeline_mode = #tpu.pipeline_mode<synchronous>, transform_indices = @transform_16, window_bounds = array<i64: 1, 64>}, {pipeline_mode = #tpu.pipeline_mode<synchronous>, transform_indices = @transform_17, window_bounds = array<i64: 64, 128>}, {pipeline_mode = #tpu.pipeline_mode<synchronous>, transform_indices = @transform_18, window_bounds = array<i64: 1, 128>}, {pipeline_mode = #tpu.pipeline_mode<synchronous>, transform_indices = @transform_19, window_bounds = array<i64: 128, 512>}, {pipeline_mode = #tpu.pipeline_mode<synchronous>, transform_indices = @transform_20, window_bounds = array<i64: 1, 512>}, {transform_indices = @transform_21, window_bounds = array<i64: 256, 512>}]} {
    %c0 = arith.constant 0 : index
    %c0_0 = arith.constant 0 : index
    %0 = vector.load %arg1[%c0, %c0_0] : memref<256x512xf32, #tpu.memory_space<vmem>>, vector<256x512xf32>
    %c0_1 = arith.constant 0 : index
    %c0_2 = arith.constant 0 : index
    %1 = vector.load %arg2[%c0_1, %c0_2] : memref<512x128xf32, #tpu.memory_space<vmem>>, vector<512x128xf32>
    %c0_3 = arith.constant 0 : index
    %c0_4 = arith.constant 0 : index
    %2 = vector.load %arg3[%c0_3, %c0_4] : memref<1x128xf32, #tpu.memory_space<vmem>>, vector<1x128xf32>
    %cst = arith.constant dense<0.000000e+00> : vector<256x128xf32>
    %3 = tpu.matmul %0, %1, %cst {dimension_numbers = #tpu.dot_dimension_numbers<[1], [0], [0], [1], [0, 0, 1, 1], [], []>} : vector<256x512xf32>, vector<512x128xf32>, vector<256x128xf32> -> vector<256x128xf32>
    %4 = vector.broadcast %2 : vector<1x128xf32> to vector<256x128xf32>
    %5 = arith.addf %3, %4 : vector<256x128xf32>
    %cst_5 = arith.constant 0.000000e+00 : f32
    %6 = vector.broadcast %cst_5 : f32 to vector<256x128xf32>
    %7 = arith.maximumf %5, %6 : vector<256x128xf32>
    %c0_6 = arith.constant 0 : index
    %c0_7 = arith.constant 0 : index
    %8 = vector.load %arg4[%c0_6, %c0_7] : memref<128x64xf32, #tpu.memory_space<vmem>>, vector<128x64xf32>
    %c0_8 = arith.constant 0 : index
    %c0_9 = arith.constant 0 : index
    %9 = vector.load %arg5[%c0_8, %c0_9] : memref<1x64xf32, #tpu.memory_space<vmem>>, vector<1x64xf32>
    %cst_10 = arith.constant dense<0.000000e+00> : vector<256x64xf32>
    %10 = tpu.matmul %7, %8, %cst_10 {dimension_numbers = #tpu.dot_dimension_numbers<[1], [0], [0], [1], [0, 0, 1, 1], [], []>} : vector<256x128xf32>, vector<128x64xf32>, vector<256x64xf32> -> vector<256x64xf32>
    %11 = vector.broadcast %9 : vector<1x64xf32> to vector<256x64xf32>
    %12 = arith.addf %10, %11 : vector<256x64xf32>
    %cst_11 = arith.constant 0.000000e+00 : f32
    %13 = vector.broadcast %cst_11 : f32 to vector<256x64xf32>
    %14 = arith.maximumf %12, %13 : vector<256x64xf32>
    %c0_12 = arith.constant 0 : index
    %c0_13 = arith.constant 0 : index
    %15 = vector.load %arg6[%c0_12, %c0_13] : memref<64x36xf32, #tpu.memory_space<vmem>>, vector<64x36xf32>
    %c0_14 = arith.constant 0 : index
    %c0_15 = arith.constant 0 : index
    %16 = vector.load %arg7[%c0_14, %c0_15] : memref<1x36xf32, #tpu.memory_space<vmem>>, vector<1x36xf32>
    %cst_16 = arith.constant dense<0.000000e+00> : vector<256x36xf32>
    %17 = tpu.matmul %14, %15, %cst_16 {dimension_numbers = #tpu.dot_dimension_numbers<[1], [0], [0], [1], [0, 0, 1, 1], [], []>} : vector<256x64xf32>, vector<64x36xf32>, vector<256x36xf32> -> vector<256x36xf32>
    %18 = vector.broadcast %16 : vector<1x36xf32> to vector<256x36xf32>
    %19 = arith.addf %17, %18 : vector<256x36xf32>
    %cst_17 = arith.constant 0.000000e+00 : f32
    %20 = vector.broadcast %cst_17 : f32 to vector<256x36xf32>
    %21 = arith.maximumf %19, %20 : vector<256x36xf32>
    %c0_18 = arith.constant 0 : index
    %c0_19 = arith.constant 0 : index
    %22 = vector.load %arg8[%c0_18, %c0_19] : memref<36x18xf32, #tpu.memory_space<vmem>>, vector<36x18xf32>
    %c0_20 = arith.constant 0 : index
    %c0_21 = arith.constant 0 : index
    %23 = vector.load %arg9[%c0_20, %c0_21] : memref<1x18xf32, #tpu.memory_space<vmem>>, vector<1x18xf32>
    %cst_22 = arith.constant dense<0.000000e+00> : vector<256x18xf32>
    %24 = tpu.matmul %21, %22, %cst_22 {dimension_numbers = #tpu.dot_dimension_numbers<[1], [0], [0], [1], [0, 0, 1, 1], [], []>} : vector<256x36xf32>, vector<36x18xf32>, vector<256x18xf32> -> vector<256x18xf32>
    %25 = vector.broadcast %23 : vector<1x18xf32> to vector<256x18xf32>
    %26 = arith.addf %24, %25 : vector<256x18xf32>
    %cst_23 = arith.constant 0.000000e+00 : f32
    %27 = vector.broadcast %cst_23 : f32 to vector<256x18xf32>
    %28 = arith.maximumf %26, %27 : vector<256x18xf32>
    %c0_24 = arith.constant 0 : index
    %c0_25 = arith.constant 0 : index
    %29 = vector.load %arg10[%c0_24, %c0_25] : memref<18x8xf32, #tpu.memory_space<vmem>>, vector<18x8xf32>
    %c0_26 = arith.constant 0 : index
    %c0_27 = arith.constant 0 : index
    %30 = vector.load %arg11[%c0_26, %c0_27] : memref<1x8xf32, #tpu.memory_space<vmem>>, vector<1x8xf32>
    %cst_28 = arith.constant dense<0.000000e+00> : vector<256x8xf32>
    %31 = tpu.matmul %28, %29, %cst_28 {dimension_numbers = #tpu.dot_dimension_numbers<[1], [0], [0], [1], [0, 0, 1, 1], [], []>} : vector<256x18xf32>, vector<18x8xf32>, vector<256x8xf32> -> vector<256x8xf32>
    %32 = vector.broadcast %30 : vector<1x8xf32> to vector<256x8xf32>
    %33 = arith.addf %31, %32 : vector<256x8xf32>
    %c0_29 = arith.constant 0 : index
    %c0_30 = arith.constant 0 : index
    %34 = vector.load %arg12[%c0_29, %c0_30] : memref<8x18xf32, #tpu.memory_space<vmem>>, vector<8x18xf32>
    %c0_31 = arith.constant 0 : index
    %c0_32 = arith.constant 0 : index
    %35 = vector.load %arg13[%c0_31, %c0_32] : memref<1x18xf32, #tpu.memory_space<vmem>>, vector<1x18xf32>
    %cst_33 = arith.constant dense<0.000000e+00> : vector<256x18xf32>
    %36 = tpu.matmul %33, %34, %cst_33 {dimension_numbers = #tpu.dot_dimension_numbers<[1], [0], [0], [1], [0, 0, 1, 1], [], []>} : vector<256x8xf32>, vector<8x18xf32>, vector<256x18xf32> -> vector<256x18xf32>
    %37 = vector.broadcast %35 : vector<1x18xf32> to vector<256x18xf32>
    %38 = arith.addf %36, %37 : vector<256x18xf32>
    %cst_34 = arith.constant 0.000000e+00 : f32
    %39 = vector.broadcast %cst_34 : f32 to vector<256x18xf32>
    %40 = arith.maximumf %38, %39 : vector<256x18xf32>
    %c0_35 = arith.constant 0 : index
    %c0_36 = arith.constant 0 : index
    %41 = vector.load %arg14[%c0_35, %c0_36] : memref<18x36xf32, #tpu.memory_space<vmem>>, vector<18x36xf32>
    %c0_37 = arith.constant 0 : index
    %c0_38 = arith.constant 0 : index
    %42 = vector.load %arg15[%c0_37, %c0_38] : memref<1x36xf32, #tpu.memory_space<vmem>>, vector<1x36xf32>
    %cst_39 = arith.constant dense<0.000000e+00> : vector<256x36xf32>
    %43 = tpu.matmul %40, %41, %cst_39 {dimension_numbers = #tpu.dot_dimension_numbers<[1], [0], [0], [1], [0, 0, 1, 1], [], []>} : vector<256x18xf32>, vector<18x36xf32>, vector<256x36xf32> -> vector<256x36xf32>
    %44 = vector.broadcast %42 : vector<1x36xf32> to vector<256x36xf32>
    %45 = arith.addf %43, %44 : vector<256x36xf32>
    %cst_40 = arith.constant 0.000000e+00 : f32
    %46 = vector.broadcast %cst_40 : f32 to vector<256x36xf32>
    %47 = arith.maximumf %45, %46 : vector<256x36xf32>
    %c0_41 = arith.constant 0 : index
    %c0_42 = arith.constant 0 : index
    %48 = vector.load %arg16[%c0_41, %c0_42] : memref<36x64xf32, #tpu.memory_space<vmem>>, vector<36x64xf32>
    %c0_43 = arith.constant 0 : index
    %c0_44 = arith.constant 0 : index
    %49 = vector.load %arg17[%c0_43, %c0_44] : memref<1x64xf32, #tpu.memory_space<vmem>>, vector<1x64xf32>
    %cst_45 = arith.constant dense<0.000000e+00> : vector<256x64xf32>
    %50 = tpu.matmul %47, %48, %cst_45 {dimension_numbers = #tpu.dot_dimension_numbers<[1], [0], [0], [1], [0, 0, 1, 1], [], []>} : vector<256x36xf32>, vector<36x64xf32>, vector<256x64xf32> -> vector<256x64xf32>
    %51 = vector.broadcast %49 : vector<1x64xf32> to vector<256x64xf32>
    %52 = arith.addf %50, %51 : vector<256x64xf32>
    %cst_46 = arith.constant 0.000000e+00 : f32
    %53 = vector.broadcast %cst_46 : f32 to vector<256x64xf32>
    %54 = arith.maximumf %52, %53 : vector<256x64xf32>
    %c0_47 = arith.constant 0 : index
    %c0_48 = arith.constant 0 : index
    %55 = vector.load %arg18[%c0_47, %c0_48] : memref<64x128xf32, #tpu.memory_space<vmem>>, vector<64x128xf32>
    %c0_49 = arith.constant 0 : index
    %c0_50 = arith.constant 0 : index
    %56 = vector.load %arg19[%c0_49, %c0_50] : memref<1x128xf32, #tpu.memory_space<vmem>>, vector<1x128xf32>
    %cst_51 = arith.constant dense<0.000000e+00> : vector<256x128xf32>
    %57 = tpu.matmul %54, %55, %cst_51 {dimension_numbers = #tpu.dot_dimension_numbers<[1], [0], [0], [1], [0, 0, 1, 1], [], []>} : vector<256x64xf32>, vector<64x128xf32>, vector<256x128xf32> -> vector<256x128xf32>
    %58 = vector.broadcast %56 : vector<1x128xf32> to vector<256x128xf32>
    %59 = arith.addf %57, %58 : vector<256x128xf32>
    %cst_52 = arith.constant 0.000000e+00 : f32
    %60 = vector.broadcast %cst_52 : f32 to vector<256x128xf32>
    %61 = arith.maximumf %59, %60 : vector<256x128xf32>
    %c0_53 = arith.constant 0 : index
    %c0_54 = arith.constant 0 : index
    %62 = vector.load %arg20[%c0_53, %c0_54] : memref<128x512xf32, #tpu.memory_space<vmem>>, vector<128x512xf32>
    %c0_55 = arith.constant 0 : index
    %c0_56 = arith.constant 0 : index
    %63 = vector.load %arg21[%c0_55, %c0_56] : memref<1x512xf32, #tpu.memory_space<vmem>>, vector<1x512xf32>
    %cst_57 = arith.constant dense<0.000000e+00> : vector<256x512xf32>
    %64 = tpu.matmul %61, %62, %cst_57 {dimension_numbers = #tpu.dot_dimension_numbers<[1], [0], [0], [1], [0, 0, 1, 1], [], []>} : vector<256x128xf32>, vector<128x512xf32>, vector<256x512xf32> -> vector<256x512xf32>
    %65 = vector.broadcast %63 : vector<1x512xf32> to vector<256x512xf32>
    %66 = arith.addf %64, %65 : vector<256x512xf32>
    %cst_58 = arith.constant 5.000000e-01 : f32
    %67 = vector.broadcast %cst_58 : f32 to vector<256x512xf32>
    %68 = arith.mulf %67, %66 : vector<256x512xf32>
    %69 = math.tanh %68 : vector<256x512xf32>
    %cst_59 = arith.constant 5.000000e-01 : f32
    %70 = vector.broadcast %cst_59 : f32 to vector<256x512xf32>
    %71 = arith.mulf %70, %69 : vector<256x512xf32>
    %cst_60 = arith.constant 5.000000e-01 : f32
    %72 = vector.broadcast %cst_60 : f32 to vector<256x512xf32>
    %73 = arith.addf %71, %72 : vector<256x512xf32>
    %c0_61 = arith.constant 0 : index
    %c0_62 = arith.constant 0 : index
    %74 = vector.load %arg22[%c0_61, %c0_62] : memref<256x512xf32, #tpu.memory_space<vmem>>, vector<256x512xf32>
    tpu.vector_store %arg22[%c0_61, %c0_62], %73 {strides = array<i32>} : memref<256x512xf32, #tpu.memory_space<vmem>>, vector<256x512xf32>,
    return
  }
  func.func @transform_0(%arg0: i32) -> (i32, i32) {
    %c0_i32 = arith.constant 0 : i32
    %c0_i32_0 = arith.constant 0 : i32
    return %arg0, %c0_i32 : i32, i32
  }
  func.func @transform_1(%arg0: i32) -> (i32, i32) {
    %c0_i32 = arith.constant 0 : i32
    %c0_i32_0 = arith.constant 0 : i32
    %c0_i32_1 = arith.constant 0 : i32
    return %c0_i32, %c0_i32_0 : i32, i32
  }
  func.func @transform_2(%arg0: i32) -> (i32, i32) {
    %c0_i32 = arith.constant 0 : i32
    %c0_i32_0 = arith.constant 0 : i32
    %c0_i32_1 = arith.constant 0 : i32
    return %c0_i32, %c0_i32_0 : i32, i32
  }
  func.func @transform_3(%arg0: i32) -> (i32, i32) {
    %c0_i32 = arith.constant 0 : i32
    %c0_i32_0 = arith.constant 0 : i32
    %c0_i32_1 = arith.constant 0 : i32
    return %c0_i32, %c0_i32_0 : i32, i32
  }
  func.func @transform_4(%arg0: i32) -> (i32, i32) {
    %c0_i32 = arith.constant 0 : i32
    %c0_i32_0 = arith.constant 0 : i32
    %c0_i32_1 = arith.constant 0 : i32
    return %c0_i32, %c0_i32_0 : i32, i32
  }
  func.func @transform_5(%arg0: i32) -> (i32, i32) {
    %c0_i32 = arith.constant 0 : i32
    %c0_i32_0 = arith.constant 0 : i32
    %c0_i32_1 = arith.constant 0 : i32
    return %c0_i32, %c0_i32_0 : i32, i32
  }
  func.func @transform_6(%arg0: i32) -> (i32, i32) {
    %c0_i32 = arith.constant 0 : i32
    %c0_i32_0 = arith.constant 0 : i32
    %c0_i32_1 = arith.constant 0 : i32
    return %c0_i32, %c0_i32_0 : i32, i32
  }
  func.func @transform_7(%arg0: i32) -> (i32, i32) {
    %c0_i32 = arith.constant 0 : i32
    %c0_i32_0 = arith.constant 0 : i32
    %c0_i32_1 = arith.constant 0 : i32
    return %c0_i32, %c0_i32_0 : i32, i32
  }
  func.func @transform_8(%arg0: i32) -> (i32, i32) {
    %c0_i32 = arith.constant 0 : i32
    %c0_i32_0 = arith.constant 0 : i32
    %c0_i32_1 = arith.constant 0 : i32
    return %c0_i32, %c0_i32_0 : i32, i32
  }
  func.func @transform_9(%arg0: i32) -> (i32, i32) {
    %c0_i32 = arith.constant 0 : i32
    %c0_i32_0 = arith.constant 0 : i32
    %c0_i32_1 = arith.constant 0 : i32
    return %c0_i32, %c0_i32_0 : i32, i32
  }
  func.func @transform_10(%arg0: i32) -> (i32, i32) {
    %c0_i32 = arith.constant 0 : i32
    %c0_i32_0 = arith.constant 0 : i32
    %c0_i32_1 = arith.constant 0 : i32
    return %c0_i32, %c0_i32_0 : i32, i32
  }
  func.func @transform_11(%arg0: i32) -> (i32, i32) {
    %c0_i32 = arith.constant 0 : i32
    %c0_i32_0 = arith.constant 0 : i32
    %c0_i32_1 = arith.constant 0 : i32
    return %c0_i32, %c0_i32_0 : i32, i32
  }
  func.func @transform_12(%arg0: i32) -> (i32, i32) {
    %c0_i32 = arith.constant 0 : i32
    %c0_i32_0 = arith.constant 0 : i32
    %c0_i32_1 = arith.constant 0 : i32
    return %c0_i32, %c0_i32_0 : i32, i32
  }
  func.func @transform_13(%arg0: i32) -> (i32, i32) {
    %c0_i32 = arith.constant 0 : i32
    %c0_i32_0 = arith.constant 0 : i32
    %c0_i32_1 = arith.constant 0 : i32
    return %c0_i32, %c0_i32_0 : i32, i32
  }
  func.func @transform_14(%arg0: i32) -> (i32, i32) {
    %c0_i32 = arith.constant 0 : i32
    %c0_i32_0 = arith.constant 0 : i32
    %c0_i32_1 = arith.constant 0 : i32
    return %c0_i32, %c0_i32_0 : i32, i32
  }
  func.func @transform_15(%arg0: i32) -> (i32, i32) {
    %c0_i32 = arith.constant 0 : i32
    %c0_i32_0 = arith.constant 0 : i32
    %c0_i32_1 = arith.constant 0 : i32
    return %c0_i32, %c0_i32_0 : i32, i32
  }
  func.func @transform_16(%arg0: i32) -> (i32, i32) {
    %c0_i32 = arith.constant 0 : i32
    %c0_i32_0 = arith.constant 0 : i32
    %c0_i32_1 = arith.constant 0 : i32
    return %c0_i32, %c0_i32_0 : i32, i32
  }
  func.func @transform_17(%arg0: i32) -> (i32, i32) {
    %c0_i32 = arith.constant 0 : i32
    %c0_i32_0 = arith.constant 0 : i32
    %c0_i32_1 = arith.constant 0 : i32
    return %c0_i32, %c0_i32_0 : i32, i32
  }
  func.func @transform_18(%arg0: i32) -> (i32, i32) {
    %c0_i32 = arith.constant 0 : i32
    %c0_i32_0 = arith.constant 0 : i32
    %c0_i32_1 = arith.constant 0 : i32
    return %c0_i32, %c0_i32_0 : i32, i32
  }
  func.func @transform_19(%arg0: i32) -> (i32, i32) {
    %c0_i32 = arith.constant 0 : i32
    %c0_i32_0 = arith.constant 0 : i32
    %c0_i32_1 = arith.constant 0 : i32
    return %c0_i32, %c0_i32_0 : i32, i32
  }
  func.func @transform_20(%arg0: i32) -> (i32, i32) {
    %c0_i32 = arith.constant 0 : i32
    %c0_i32_0 = arith.constant 0 : i32
    %c0_i32_1 = arith.constant 0 : i32
    return %c0_i32, %c0_i32_0 : i32, i32
  }
  func.func @transform_21(%arg0: i32) -> (i32, i32) {
    %c0_i32 = arith.constant 0 : i32
    %c0_i32_0 = arith.constant 0 : i32
    return %arg0, %c0_i32 : i32, i32
  }
}

</mosaic_0001>

<bundles_post_ra>
// kernel: _fwd.1
= control target key start
LH: loop header
LB: loop body
LE: loop exit
PB: predicated region body
PF: predicated region fallthrough
CT: control target
= control target key end

     0   :  { %s7000_s0 = inlined_call_operand.vmem [shape: f32[512,512], index: 0, kind: input, shape index: {}]   ;;  %s7001_s1 = inlined_call_operand.vmem [shape: f32[512,128], index: 1, kind: input, shape index: {}]   ;;  %s7002_s2 = inlined_call_operand.vmem [shape: f32[1,128], index: 2, kind: input, shape index: {}]   ;;  %s7003_s3 = inlined_call_operand.vmem [shape: f32[128,64], index: 3, kind: input, shape index: {}]   ;;  %s7004_s4 = inlined_call_operand.vmem [shape: f32[1,64], index: 4, kind: input, shape index: {}]   ;;  %s7005_s5 = inlined_call_operand.vmem [shape: f32[64,36], index: 5, kind: input, shape index: {}]   ;;  %s7006_s6 = inlined_call_operand.vmem [shape: f32[1,36], index: 6, kind: input, shape index: {}]   ;;  %s7007_s7 = inlined_call_operand.vmem [shape: f32[36,18], index: 7, kind: input, shape index: {}]   ;;  %s7008_s8 = inlined_call_operand.vmem [shape: f32[1,18], index: 8, kind: input, shape index: {}]   ;;  %s7009_s9 = inlined_call_operand.vmem [shape: f32[18,8], index: 9, kind: input, shape index: {}]   ;;  %s7010_s10 = inlined_call_operand.vmem [shape: f32[1,8], index: 10, kind: input, shape index: {}]   ;;  %s7011_s11 = inlined_call_operand.vmem [shape: f32[8,18], index: 11, kind: input, shape index: {}]   ;;  %s7012_s12 = inlined_call_operand.vmem [shape: f32[1,18], index: 12, kind: input, shape index: {}]   ;;  %s7013_s13 = inlined_call_operand.vmem [shape: f32[18,36], index: 13, kind: input, shape index: {}]   ;;  %s7014_s14 = inlined_call_operand.vmem [shape: f32[1,36], index: 14, kind: input, shape index: {}]   ;;  %s7015_s15 = inlined_call_operand.vmem [shape: f32[36,64], index: 15, kind: input, shape index: {}]   ;;  %s7016_s16 = inlined_call_operand.vmem [shape: f32[1,64], index: 16, kind: input, shape index: {}]   ;;  %s7017_s17 = inlined_call_operand.vmem [shape: f32[64,128], index: 17, kind: input, shape index: {}]   ;;  %s7018_s18 = inlined_call_operand.vmem [shape: f32[1,128], index: 18, kind: input, shape index: {}]   ;;  %s7019_s19 = inlined_call_operand.vmem [shape: f32[128,512], index: 19, kind: input, shape index: {}]   ;;  %s7020_s20 = inlined_call_operand.vmem [shape: f32[1,512], index: 20, kind: input, shape index: {}]   ;;  %s7021_s21 = inlined_call_operand.vmem [shape: f32[512,512], index: 21, kind: output, shape index: {}]  }
   0x1   :  { %7026 = sst [smem:[#allocation2_spill]] %s7000_s0 }
   0x2   :  { %7027 = sst [smem:[#allocation3_spill]] %s7001_s1 }
   0x3   :  { %7028 = sst [smem:[#allocation4_spill]] %s7002_s2  ;;  %s5103_s2 = smov 0  }
   0x4   :  { %7029 = sst [smem:[#allocation5_spill]] %s7003_s3 }
   0x5   :  { %7030 = sst [smem:[#allocation6_spill]] %s7004_s4 }
   0x6   :  { %7031 = sst [smem:[#allocation7_spill]] %s7005_s5 }
   0x7 LB: > { %s4468_s25 = sadd.s32 4294967295, %s4991_s2   ;;  %p4472_p0 = scmp.ge.s32.totalorder %s4991_s2, 1  ;;  %s4991_s2 = sphi %s5103_s2, %s31_s2  }
   0x8   : > { %p589_p1 = scmp.lt.s32.totalorder %s4991_s2, 3 }
   0xa   : > { %p590_p2 = pnand %p4472_p0, %p589_p1 }
   0xb   : > { %s7032_s3 = sld [smem:[#allocation3_spill]] (!%p590_p2)  ;;  %s5191_s0 = sshll.u32 (!%p590_p2), %s4468_s25, 5 }
   0xc   : > { %593 = sbr.rel (%p590_p2) target bundleno = 1884 (0x75c), region = 104  ;;  %p652_p3 = scmp.lt.s32.totalorder (!%p590_p2), %s5191_s0, 63 }
   0xd   : > { %s7033_s5 = sld [smem:[#allocation2_spill]] (!%p590_p2) }
   0xe   : > { %s7034_s29 = sld [smem:[#allocation5_spill]] (!%p590_p2) }
   0xf   : > { %s7035_s1 = sld [smem:[#allocation7_spill]] (!%p590_p2) }
  0x10   : > { %s7036_s27 = sld [smem:[#allocation4_spill]] (!%p590_p2) }
  0x11   : > { %v808_v0 = vld [vmem:[%s7032_s3 + $0x78] sm:$0xff]  ;;  %v807_v2 = vld [vmem:[%s7032_s3 + $0x70] sm:$0xff]  ;;  %v806_v6 = vld [vmem:[%s7032_s3 + $0x68] sm:$0xff]  ;;  %s7040_s0 = smov (!%p652_p3, %s5191_s0), 63  ;;  %vm1870_vm0 = vcmask 1043456   ;;  %vm2123_vm1 = vcmask 1041408  }
  0x12   : > { %v840_v1 = vld [vmem:[%s7032_s3 + $0x178] sm:$0xff]  ;;  %861 = vmatpush.msra.mxu0 %v808_v0  ;;  %v839_v4 = vld [vmem:[%s7032_s3 + $0x170] sm:$0xff]  ;;  %v838_v8 = vld [vmem:[%s7032_s3 + $0x168] sm:$0xff]  ;;  %s7025_s26 = sshll.u32 %s7040_s0, 5  ;;  %s7037_s23 = sld [smem:[#allocation6_spill]]  ;;  %vm1522_vm2 = vcmask 523264  }
  0x13   : > { %1087 = vmatpush.msra.mxu2 %v840_v1  ;;  %v824_v3 = vld [vmem:[%s7032_s3 + $0xf8] sm:$0xff]  ;;  %v823_v7 = vld [vmem:[%s7032_s3 + $0xf0] sm:$0xff]  ;;  %v822_v10 = vld [vmem:[%s7032_s3 + $0xe8] sm:$0xff]  ;;  %s5292_s22 = scalar_lea.vmem %s7033_s5, %s7025_s26  ;;  %vm1773_vm3 = vcmask 293888   ;;  %vm2026_vm4 = vcmask 146432   ;;  %vm2245_vm5 = vcmask 64512  }
  0x14   : > { %v856_v5 = vld [vmem:[%s7032_s3 + $0x1f8] sm:$0xff]  ;;  %974 = vmatpush.msra.mxu1 %v824_v3  ;;  %862 = vmatpush.msra.mxu0 %v807_v2  ;;  %v855_v9 = vld [vmem:[%s7032_s3 + $0x1f0] sm:$0xff]  ;;  %v805_v11 = vld [vmem:[%s7032_s3 + $0x60] sm:$0xff]  ;;  %s7038_s25 = sshll.u32 %s7040_s0, 5 }
  0x15   : > { %1200 = vmatpush.msra.mxu3 %v856_v5  ;;  %1088 = vmatpush.msra.mxu2 %v839_v4  ;;  %v837_v12 = vld [vmem:[%s7032_s3 + $0x160] sm:$0xff]  ;;  %v854_v13 = vld [vmem:[%s7032_s3 + $0x1e8] sm:$0xff]  ;;  %v804_v16 = vld [vmem:[%s7032_s3 + $0x58] sm:$0xff] }
  0x16   : > { %975 = vmatpush.msra.mxu1 %v823_v7  ;;  %863 = vmatpush.msra.mxu0 %v806_v6  ;;  %v821_v14 = vld [vmem:[%s7032_s3 + $0xe0] sm:$0xff]  ;;  %v836_v17 = vld [vmem:[%s7032_s3 + $0x158] sm:$0xff]  ;;  %v803_v20 = vld [vmem:[%s7032_s3 + $0x50] sm:$0xff] }
  0x17   : > { %1201 = vmatpush.msra.mxu3 %v855_v9  ;;  %1089 = vmatpush.msra.mxu2 %v838_v8  ;;  %v853_v15 = vld [vmem:[%s7032_s3 + $0x1e0] sm:$0xff]  ;;  %v820_v18 = vld [vmem:[%s7032_s3 + $0xd8] sm:$0xff]  ;;  %v835_v21 = vld [vmem:[%s7032_s3 + $0x150] sm:$0xff] }
  0x18   : > { %976 = vmatpush.msra.mxu1 %v822_v10  ;;  %864 = vmatpush.msra.mxu0 %v805_v11  ;;  %v852_v19 = vld [vmem:[%s7032_s3 + $0x1d8] sm:$0xff]  ;;  %v819_v22 = vld [vmem:[%s7032_s3 + $0xd0] sm:$0xff]  ;;  %v802_v24 = vld [vmem:[%s7032_s3 + $0x48] sm:$0xff] }
  0x19   : > { %1202 = vmatpush.msra.mxu3 %v854_v13  ;;  %1090 = vmatpush.msra.mxu2 %v837_v12  ;;  %v851_v23 = vld [vmem:[%s7032_s3 + $0x1d0] sm:$0xff]  ;;  %v834_v25 = vld [vmem:[%s7032_s3 + $0x148] sm:$0xff]  ;;  %v801_v28 = vld [vmem:[%s7032_s3 + $0x40] sm:$0xff] }
  0x1a   : > { %977 = vmatpush.msra.mxu1 %v821_v14  ;;  %865 = vmatpush.msra.mxu0 %v804_v16  ;;  %v818_v26 = vld [vmem:[%s7032_s3 + $0xc8] sm:$0xff]  ;;  %v833_v29 = vld [vmem:[%s7032_s3 + $0x140] sm:$0xff]  ;;  %v800_v32 = vld [vmem:[%s7032_s3 + $0x38] sm:$0xff] }
  0x1b   : > { %1203 = vmatpush.msra.mxu3 %v853_v15  ;;  %1091 = vmatpush.msra.mxu2 %v836_v17  ;;  %v850_v27 = vld [vmem:[%s7032_s3 + $0x1c8] sm:$0xff]  ;;  %v817_v30 = vld [vmem:[%s7032_s3 + $0xc0] sm:$0xff]  ;;  %v832_v33 = vld [vmem:[%s7032_s3 + $0x138] sm:$0xff] }
  0x1c   : > { %978 = vmatpush.msra.mxu1 %v820_v18  ;;  %866 = vmatpush.msra.mxu0 %v803_v20  ;;  %v849_v31 = vld [vmem:[%s7032_s3 + $0x1c0] sm:$0xff]  ;;  %v816_v34 = vld [vmem:[%s7032_s3 + $0xb8] sm:$0xff]  ;;  %v799_v36 = vld [vmem:[%s7032_s3 + $0x30] sm:$0xff] }
  0x1d   : > { %1204 = vmatpush.msra.mxu3 %v852_v19  ;;  %1092 = vmatpush.msra.mxu2 %v835_v21  ;;  %v848_v35 = vld [vmem:[%s7032_s3 + $0x1b8] sm:$0xff]  ;;  %v831_v37 = vld [vmem:[%s7032_s3 + $0x130] sm:$0xff]  ;;  %v798_v40 = vld [vmem:[%s7032_s3 + $0x28] sm:$0xff] }
  0x1e   : > { %979 = vmatpush.msra.mxu1 %v819_v22  ;;  %867 = vmatpush.msra.mxu0 %v802_v24  ;;  %v815_v38 = vld [vmem:[%s7032_s3 + $0xb0] sm:$0xff]  ;;  %v830_v41 = vld [vmem:[%s7032_s3 + $0x128] sm:$0xff]  ;;  %v797_v44 = vld [vmem:[%s7032_s3 + $0x20] sm:$0xff] }
  0x1f   : > { %1205 = vmatpush.msra.mxu3 %v851_v23  ;;  %1093 = vmatpush.msra.mxu2 %v834_v25  ;;  %v847_v39 = vld [vmem:[%s7032_s3 + $0x1b0] sm:$0xff]  ;;  %v814_v42 = vld [vmem:[%s7032_s3 + $0xa8] sm:$0xff]  ;;  %v829_v45 = vld [vmem:[%s7032_s3 + $0x120] sm:$0xff] }
  0x20   : > { %980 = vmatpush.msra.mxu1 %v818_v26  ;;  %868 = vmatpush.msra.mxu0 %v801_v28  ;;  %v846_v43 = vld [vmem:[%s7032_s3 + $0x1a8] sm:$0xff]  ;;  %v813_v46 = vld [vmem:[%s7032_s3 + $0xa0] sm:$0xff]  ;;  %v796_v48 = vld [vmem:[%s7032_s3 + $0x18] sm:$0xff] }
  0x21   : > { %1206 = vmatpush.msra.mxu3 %v850_v27  ;;  %1094 = vmatpush.msra.mxu2 %v833_v29  ;;  %v845_v47 = vld [vmem:[%s7032_s3 + $0x1a0] sm:$0xff]  ;;  %v828_v49 = vld [vmem:[%s7032_s3 + $0x118] sm:$0xff]  ;;  %v795_v52 = vld [vmem:[%s7032_s3 + $0x10] sm:$0xff] }
  0x22   : > { %981 = vmatpush.msra.mxu1 %v817_v30  ;;  %869 = vmatpush.msra.mxu0 %v800_v32  ;;  %v812_v50 = vld [vmem:[%s7032_s3 + $0x98] sm:$0xff]  ;;  %v827_v53 = vld [vmem:[%s7032_s3 + $0x110] sm:$0xff]  ;;  %v794_v54 = vld [vmem:[%s7032_s3 + $0x8] sm:$0xff] }
  0x23   : > { %1207 = vmatpush.msra.mxu3 %v849_v31  ;;  %1095 = vmatpush.msra.mxu2 %v832_v33  ;;  %v844_v51 = vld [vmem:[%s7032_s3 + $0x198] sm:$0xff]  ;;  %v811_v55 = vld [vmem:[%s7032_s3 + $0x90] sm:$0xff]  ;;  %v826_v56 = vld [vmem:[%s7032_s3 + $0x108] sm:$0xff] }
  0x24   : > { %982 = vmatpush.msra.mxu1 %v816_v34  ;;  %870 = vmatpush.msra.mxu0 %v799_v36  ;;  %v843_v57 = vld [vmem:[%s7032_s3 + $0x190] sm:$0xff]  ;;  %v793_v58 = vld [vmem:[%s7032_s3] sm:$0xff]  ;;  %v810_v59 = vld [vmem:[%s7032_s3 + $0x88] sm:$0xff] }
  0x25   : > { %1208 = vmatpush.msra.mxu3 %v848_v35  ;;  %1096 = vmatpush.msra.mxu2 %v831_v37  ;;  %v825_v60 = vld [vmem:[%s7032_s3 + $0x100] sm:$0xff]  ;;  %v842_v61 = vld [vmem:[%s7032_s3 + $0x188] sm:$0xff]  ;;  %v667_v63 = vld [vmem:[%s5292_s22 + $0x10] sm:$0xff] }
  0x26   : > { %983 = vmatpush.msra.mxu1 %v815_v38  ;;  %871 = vmatpush.msra.mxu0 %v798_v40  ;;  %v665_v62 = vld [vmem:[%s5292_s22] sm:$0xff]  ;;  %v1360_v0 = vld [vmem:[%s7034_s29 + $0x78] sm:$0xff]  ;;  %v666_v3 = vld [vmem:[%s5292_s22 + $0x8] sm:$0xff] }
  0x27   : > { %1209 = vmatpush.msra.mxu3 %v847_v39  ;;  %1097 = vmatpush.msra.mxu2 %v830_v41  ;;  %v809_v1 = vld [vmem:[%s7032_s3 + $0x80] sm:$0xff]  ;;  %v668_v4 = vld [vmem:[%s5292_s22 + $0x18] sm:$0xff]  ;;  %v1359_v5 = vld [vmem:[%s7034_s29 + $0x70] sm:$0xff] }
  0x28   : > { %984 = vmatpush.msra.mxu1 %v814_v42  ;;  %872 = vmatpush.msra.mxu0 %v797_v44  ;;  %v841_v2 = vld [vmem:[%s7032_s3 + $0x180] sm:$0xff]  ;;  %v1358_v6 = vld [vmem:[%s7034_s29 + $0x68] sm:$0xff]  ;;  %v671_v8 = vld [vmem:[%s5292_s22 + $0x30] sm:$0xff] }
  0x29   : > { %1210 = vmatpush.msra.mxu3 %v846_v43  ;;  %1098 = vmatpush.msra.mxu2 %v829_v45  ;;  %v669_v7 = vld [vmem:[%s5292_s22 + $0x20] sm:$0xff]  ;;  %v670_v9 = vld [vmem:[%s5292_s22 + $0x28] sm:$0xff]  ;;  %v672_v10 = vld [vmem:[%s5292_s22 + $0x38] sm:$0xff] }
  0x2a   : > { %985 = vmatpush.msra.mxu1 %v813_v46  ;;  %873 = vmatpush.msra.mxu0 %v796_v48  ;;  %v673_v11 = vld [vmem:[%s5292_s22 + $0x40] sm:$0xff]  ;;  %v675_v12 = vld [vmem:[%s5292_s22 + $0x50] sm:$0xff]  ;;  %v674_v13 = vld [vmem:[%s5292_s22 + $0x48] sm:$0xff] }
  0x2b   : > { %1211 = vmatpush.msra.mxu3 %v845_v47  ;;  %1099 = vmatpush.msra.mxu2 %v828_v49  ;;  %v676_v14 = vld [vmem:[%s5292_s22 + $0x58] sm:$0xff]  ;;  %v1357_v15 = vld [vmem:[%s7034_s29 + $0x60] sm:$0xff]  ;;  %v679_v17 = vld [vmem:[%s5292_s22 + $0x70] sm:$0xff] }
  0x2c   : > { %986 = vmatpush.msra.mxu1 %v812_v50  ;;  %874 = vmatpush.msra.mxu0 %v795_v52  ;;  %v677_v16 = vld [vmem:[%s5292_s22 + $0x60] sm:$0xff]  ;;  %v678_v18 = vld [vmem:[%s5292_s22 + $0x68] sm:$0xff]  ;;  %v680_v19 = vld [vmem:[%s5292_s22 + $0x78] sm:$0xff] }
  0x2d   : > { %1212 = vmatpush.msra.mxu3 %v844_v51  ;;  %1100 = vmatpush.msra.mxu2 %v827_v53  ;;  %v681_v20 = vld [vmem:[%s5292_s22 + $0x80] sm:$0xff]  ;;  %v683_v21 = vld [vmem:[%s5292_s22 + $0x90] sm:$0xff]  ;;  %v682_v22 = vld [vmem:[%s5292_s22 + $0x88] sm:$0xff] }
  0x2e   : > { %987 = vmatpush.msra.mxu1 %v811_v55  ;;  %875 = vmatpush.msra.mxu0 %v794_v54  ;;  %v684_v23 = vld [vmem:[%s5292_s22 + $0x98] sm:$0xff]  ;;  %v685_v25 = vld [vmem:[%s5292_s22 + $0xa0] sm:$0xff]  ;;  %v687_v26 = vld [vmem:[%s5292_s22 + $0xb0] sm:$0xff] }
  0x2f   : > { %1213 = vmatpush.msra.mxu3 %v843_v57  ;;  %1101 = vmatpush.msra.mxu2 %v826_v56  ;;  %v1356_v24 = vld [vmem:[%s7034_s29 + $0x58] sm:$0xff]  ;;  %v686_v27 = vld [vmem:[%s5292_s22 + $0xa8] sm:$0xff]  ;;  %v689_v29 = vld [vmem:[%s5292_s22 + $0xc0] sm:$0xff] }
  0x30   : > { %988 = vmatpush.msra.mxu1 %v810_v59  ;;  %876 = vmatpush.msra.mxu0 %v793_v58  ;;  %v688_v28 = vld [vmem:[%s5292_s22 + $0xb8] sm:$0xff]  ;;  %v691_v30 = vld [vmem:[%s5292_s22 + $0xd0] sm:$0xff]  ;;  %v690_v31 = vld [vmem:[%s5292_s22 + $0xc8] sm:$0xff] }
  0x31   : > { %1214 = vmatpush.msra.mxu3 %v842_v61  ;;  %1102 = vmatpush.msra.mxu2 %v825_v60  ;;  %v692_v32 = vld [vmem:[%s5292_s22 + $0xd8] sm:$0xff]  ;;  %v1355_v33 = vld [vmem:[%s7034_s29 + $0x50] sm:$0xff]  ;;  %v693_v34 = vld [vmem:[%s5292_s22 + $0xe0] sm:$0xff] }
  0x32   : > { %877 = vmatmul.f32.vlgmr.msra.gmra.mxu0 %v665_v62  ;;  %1103 = vmatmul.f32.vlgmr.msra.gmra.mxu2 %v667_v63  ;;  %v695_v35 = vld [vmem:[%s5292_s22 + $0xf0] sm:$0xff]  ;;  %v694_v36 = vld [vmem:[%s5292_s22 + $0xe8] sm:$0xff]  ;;  %v696_v37 = vld [vmem:[%s5292_s22 + $0xf8] sm:$0xff] }
  0x33   : > { %1365 = vmatpush.msrb.mxu0 %v1360_v0  ;;  %989 = vmatpush.msra.mxu1 %v809_v1  ;;  %v697_v38 = vld [vmem:[%s5292_s22 + $0x100] sm:$0xff]  ;;  %v699_v39 = vld [vmem:[%s5292_s22 + $0x110] sm:$0xff]  ;;  %v698_v40 = vld [vmem:[%s5292_s22 + $0x108] sm:$0xff] }
  0x34   : > { %1215 = vmatpush.msra.mxu3 %v841_v2  ;;  %990 = vmatmul.f32.vlgmr.msra.gmra.mxu1 %v666_v3  ;;  %v700_v41 = vld [vmem:[%s5292_s22 + $0x118] sm:$0xff]  ;;  %v1354_v42 = vld [vmem:[%s7034_s29 + $0x48] sm:$0xff]  ;;  %v701_v43 = vld [vmem:[%s5292_s22 + $0x120] sm:$0xff] }
  0x35   : > { %1216 = vmatmul.f32.vlgmr.msra.gmra.mxu3 %v668_v4  ;;  %1366 = vmatpush.msrb.mxu0 %v1359_v5  ;;  %v703_v44 = vld [vmem:[%s5292_s22 + $0x130] sm:$0xff]  ;;  %v702_v45 = vld [vmem:[%s5292_s22 + $0x128] sm:$0xff]  ;;  %v704_v46 = vld [vmem:[%s5292_s22 + $0x138] sm:$0xff] }
  0x36   : > { %v705_v47 = vld [vmem:[%s5292_s22 + $0x140] sm:$0xff]  ;;  %v707_v48 = vld [vmem:[%s5292_s22 + $0x150] sm:$0xff]  ;;  %v706_v49 = vld [vmem:[%s5292_s22 + $0x148] sm:$0xff] }
  0x37   : > { %1367 = vmatpush.msrb.mxu0 %v1358_v6  ;;  %v708_v50 = vld [vmem:[%s5292_s22 + $0x158] sm:$0xff]  ;;  %v1353_v51 = vld [vmem:[%s7034_s29 + $0x40] sm:$0xff]  ;;  %v711_v53 = vld [vmem:[%s5292_s22 + $0x170] sm:$0xff] }
  0x38   : > { %v709_v52 = vld [vmem:[%s5292_s22 + $0x160] sm:$0xff]  ;;  %v710_v54 = vld [vmem:[%s5292_s22 + $0x168] sm:$0xff]  ;;  %v712_v55 = vld [vmem:[%s5292_s22 + $0x178] sm:$0xff] }
  0x39   : > { %1368 = vmatpush.msrb.mxu0 %v1357_v15  ;;  %v713_v56 = vld [vmem:[%s5292_s22 + $0x180] sm:$0xff]  ;;  %v715_v57 = vld [vmem:[%s5292_s22 + $0x190] sm:$0xff]  ;;  %v714_v58 = vld [vmem:[%s5292_s22 + $0x188] sm:$0xff] }
  0x3a   : > { %880 = vmatmul.f32.gmra.mxu0 %v669_v7  ;;  %1106 = vmatmul.f32.gmra.mxu2 %v671_v8  ;;  %v716_v59 = vld [vmem:[%s5292_s22 + $0x198] sm:$0xff]  ;;  %v717_v62 = vld [vmem:[%s5292_s22 + $0x1a0] sm:$0xff]  ;;  %v719_v63 = vld [vmem:[%s5292_s22 + $0x1b0] sm:$0xff] }
  0x3b   : > { %1369 = vmatpush.msrb.mxu0 %v1356_v24  ;;  %v1352_v60 = vld [vmem:[%s7034_s29 + $0x38] sm:$0xff]  ;;  %v718_v0 = vld [vmem:[%s5292_s22 + $0x1a8] sm:$0xff]  ;;  %v721_v2 = vld [vmem:[%s5292_s22 + $0x1c0] sm:$0xff] }
  0x3c   : > { %993 = vmatmul.f32.gmra.mxu1 %v670_v9  ;;  %v1517_v61 = vld [vmem:[%s7035_s1 + $0x38] sm:$0xff]  ;;  %v723_v3 = vld [vmem:[%s5292_s22 + $0x1d0] sm:$0xff]  ;;  %v722_v4 = vld [vmem:[%s5292_s22 + $0x1c8] sm:$0xff] }
  0x3d   : > { %1219 = vmatmul.f32.gmra.mxu3 %v672_v10  ;;  %1370 = vmatpush.msrb.mxu0 %v1355_v33  ;;  %v720_v1 = vld [vmem:[%s5292_s22 + $0x1b8] sm:$0xff]  ;;  %v1351_v6 = vld [vmem:[%s7034_s29 + $0x30] sm:$0xff]  ;;  %v725_v7 = vld [vmem:[%s5292_s22 + $0x1e0] sm:$0xff] }
  0x3e   : > { %1627 = vmatpush.msrb.mxu1 %v1517_v61  ;;  %v724_v5 = vld [vmem:[%s5292_s22 + $0x1d8] sm:$0xff]  ;;  %v727_v8 = vld [vmem:[%s5292_s22 + $0x1f0] sm:$0xff]  ;;  %v726_v9 = vld [vmem:[%s5292_s22 + $0x1e8] sm:$0xff] }
  0x3f   : > { %1371 = vmatpush.msrb.mxu0 %v1354_v42  ;;  %v728_v10 = vld [vmem:[%s5292_s22 + $0x1f8] sm:$0xff]  ;;  %v737_v24 = vld [vmem:[%s5292_s22 + $0x240] sm:$0xff] }
  0x40   : > { %v732_v15 = vld [vmem:[%s5292_s22 + $0x218] sm:$0xff]  ;;  %v749_v42 = vld [vmem:[%s5292_s22 + $0x2a0] sm:$0xff] }
  0x41   : > { %1372 = vmatpush.msrb.mxu0 %v1353_v51  ;;  %v744_v33 = vld [vmem:[%s5292_s22 + $0x278] sm:$0xff]  ;;  %v1347_v51 = vld [vmem:[%s7034_s29 + $0x10] sm:$0xff] }
  0x42   : > { %883 = vmatmul.f32.gmra.mxu0 %v673_v11  ;;  %1109 = vmatmul.f32.gmra.mxu2 %v675_v12  ;;  %v729_v12 = vld [vmem:[%s5292_s22 + $0x200] sm:$0xff] }
  0x43   : > { %1373 = vmatpush.msrb.mxu0 %v1352_v60 }
  0x44   : > { %996 = vmatmul.f32.gmra.mxu1 %v674_v13  ;;  %v731_v13 = vld [vmem:[%s5292_s22 + $0x210] sm:$0xff] }
  0x45   : > { %1222 = vmatmul.f32.gmra.mxu3 %v676_v14  ;;  %1374 = vmatpush.msrb.mxu0 %v1351_v6  ;;  %v730_v14 = vld [vmem:[%s5292_s22 + $0x208] sm:$0xff] }
  0x4a   : > { %886 = vmatmul.f32.gmra.mxu0 %v677_v16  ;;  %1112 = vmatmul.f32.gmra.mxu2 %v679_v17  ;;  %v1350_v16 = vld [vmem:[%s7034_s29 + $0x28] sm:$0xff]  ;;  %v1516_v17 = vld [vmem:[%s7035_s1 + $0x30] sm:$0xff] }
  0x4b   : > { %1375 = vmatpush.msrb.mxu0 %v1350_v16  ;;  %1628 = vmatpush.msrb.mxu1 %v1516_v17  ;;  %v769_v16 = vld [vmem:[%s5292_s22 + $0x340] sm:$0xff]  ;;  %v771_v17 = vld [vmem:[%s5292_s22 + $0x350] sm:$0xff] }
  0x4c   : > { %999 = vmatmul.f32.gmra.mxu1 %v678_v18 }
  0x4d   : > { %1225 = vmatmul.f32.gmra.mxu3 %v680_v19  ;;  %v733_v19 = vld [vmem:[%s5292_s22 + $0x220] sm:$0xff] }
  0x52   : > { %889 = vmatmul.f32.gmra.mxu0 %v681_v20  ;;  %1115 = vmatmul.f32.gmra.mxu2 %v683_v21  ;;  %v735_v20 = vld [vmem:[%s5292_s22 + $0x230] sm:$0xff]  ;;  %v734_v21 = vld [vmem:[%s5292_s22 + $0x228] sm:$0xff] }
  0x54   : > { %1002 = vmatmul.f32.gmra.mxu1 %v682_v22  ;;  %v736_v22 = vld [vmem:[%s5292_s22 + $0x238] sm:$0xff] }
  0x55   : > { %1228 = vmatmul.f32.gmra.mxu3 %v684_v23 }
  0x5a   : > { %892 = vmatmul.f32.gmra.mxu0 %v685_v25  ;;  %1118 = vmatmul.f32.gmra.mxu2 %v687_v26  ;;  %v739_v25 = vld [vmem:[%s5292_s22 + $0x250] sm:$0xff]  ;;  %v738_v26 = vld [vmem:[%s5292_s22 + $0x248] sm:$0xff] }
  0x5c   : > { %1005 = vmatmul.f32.gmra.mxu1 %v686_v27  ;;  %v740_v27 = vld [vmem:[%s5292_s22 + $0x258] sm:$0xff] }
  0x5d   : > { %1231 = vmatmul.f32.gmra.mxu3 %v688_v28  ;;  %v1349_v28 = vld [vmem:[%s7034_s29 + $0x20] sm:$0xff] }
  0x5e   : > { %1376 = vmatpush.msrb.mxu0 %v1349_v28  ;;  %v775_v28 = vld [vmem:[%s5292_s22 + $0x370] sm:$0xff] }
  0x62   : > { %895 = vmatmul.f32.gmra.mxu0 %v689_v29  ;;  %1121 = vmatmul.f32.gmra.mxu2 %v691_v30  ;;  %v741_v30 = vld [vmem:[%s5292_s22 + $0x260] sm:$0xff] }
  0x64   : > { %1008 = vmatmul.f32.gmra.mxu1 %v690_v31  ;;  %v743_v31 = vld [vmem:[%s5292_s22 + $0x270] sm:$0xff] }
  0x65   : > { %1234 = vmatmul.f32.gmra.mxu3 %v692_v32  ;;  %v742_v32 = vld [vmem:[%s5292_s22 + $0x268] sm:$0xff] }
  0x6a   : > { %898 = vmatmul.f32.gmra.mxu0 %v693_v34  ;;  %1124 = vmatmul.f32.gmra.mxu2 %v695_v35  ;;  %v745_v35 = vld [vmem:[%s5292_s22 + $0x280] sm:$0xff] }
  0x6c   : > { %1011 = vmatmul.f32.gmra.mxu1 %v694_v36  ;;  %v747_v36 = vld [vmem:[%s5292_s22 + $0x290] sm:$0xff] }
  0x6d   : > { %1237 = vmatmul.f32.gmra.mxu3 %v696_v37  ;;  %v746_v37 = vld [vmem:[%s5292_s22 + $0x288] sm:$0xff] }
  0x72   : > { %901 = vmatmul.f32.gmra.mxu0 %v697_v38  ;;  %1127 = vmatmul.f32.gmra.mxu2 %v699_v39  ;;  %v748_v38 = vld [vmem:[%s5292_s22 + $0x298] sm:$0xff] }
  0x73   : > { %v1348_v39 = vld [vmem:[%s7034_s29 + $0x18] sm:$0xff] }
  0x74   : > { %1014 = vmatmul.f32.gmra.mxu1 %v698_v40  ;;  %1377 = vmatpush.msrb.mxu0 %v1348_v39  ;;  %v1515_v40 = vld [vmem:[%s7035_s1 + $0x28] sm:$0xff] }
  0x75   : > { %1240 = vmatmul.f32.gmra.mxu3 %v700_v41  ;;  %1629 = vmatpush.msrb.mxu1 %v1515_v40  ;;  %v778_v39 = vld [vmem:[%s5292_s22 + $0x388] sm:$0xff]  ;;  %v780_v40 = vld [vmem:[%s5292_s22 + $0x398] sm:$0xff] }
  0x76   : > { %1378 = vmatpush.msrb.mxu0 %v1347_v51  ;;  %v782_v51 = vld [vmem:[%s5292_s22 + $0x3a8] sm:$0xff] }
  0x7a   : > { %904 = vmatmul.f32.gmra.mxu0 %v701_v43  ;;  %1130 = vmatmul.f32.gmra.mxu2 %v703_v44  ;;  %v751_v43 = vld [vmem:[%s5292_s22 + $0x2b0] sm:$0xff]  ;;  %v750_v44 = vld [vmem:[%s5292_s22 + $0x2a8] sm:$0xff] }
  0x7c   : > { %1017 = vmatmul.f32.gmra.mxu1 %v702_v45  ;;  %v752_v45 = vld [vmem:[%s5292_s22 + $0x2b8] sm:$0xff] }
  0x7d   : > { %1243 = vmatmul.f32.gmra.mxu3 %v704_v46 }
  0x82   : > { %907 = vmatmul.f32.gmra.mxu0 %v705_v47  ;;  %1133 = vmatmul.f32.gmra.mxu2 %v707_v48  ;;  %v753_v47 = vld [vmem:[%s5292_s22 + $0x2c0] sm:$0xff]  ;;  %v755_v48 = vld [vmem:[%s5292_s22 + $0x2d0] sm:$0xff] }
  0x84   : > { %1020 = vmatmul.f32.gmra.mxu1 %v706_v49  ;;  %v754_v49 = vld [vmem:[%s5292_s22 + $0x2c8] sm:$0xff] }
  0x85   : > { %1246 = vmatmul.f32.gmra.mxu3 %v708_v50  ;;  %v756_v50 = vld [vmem:[%s5292_s22 + $0x2d8] sm:$0xff] }
  0x8a   : > { %910 = vmatmul.f32.gmra.mxu0 %v709_v52  ;;  %1136 = vmatmul.f32.gmra.mxu2 %v711_v53 }
  0x8c   : > { %1023 = vmatmul.f32.gmra.mxu1 %v710_v54 }
  0x8d   : > { %1249 = vmatmul.f32.gmra.mxu3 %v712_v55 }
  0x92   : > { %913 = vmatmul.f32.gmra.mxu0 %v713_v56  ;;  %1139 = vmatmul.f32.gmra.mxu2 %v715_v57  ;;  %v757_v56 = vld [vmem:[%s5292_s22 + $0x2e0] sm:$0xff]  ;;  %v759_v57 = vld [vmem:[%s5292_s22 + $0x2f0] sm:$0xff] }
  0x94   : > { %1026 = vmatmul.f32.gmra.mxu1 %v714_v58  ;;  %v758_v58 = vld [vmem:[%s5292_s22 + $0x2e8] sm:$0xff] }
  0x95   : > { %1252 = vmatmul.f32.gmra.mxu3 %v716_v59  ;;  %v760_v59 = vld [vmem:[%s5292_s22 + $0x2f8] sm:$0xff] }
  0x9a   : > { %916 = vmatmul.f32.gmra.mxu0 %v717_v62  ;;  %1142 = vmatmul.f32.gmra.mxu2 %v719_v63  ;;  %v761_v63 = vld [vmem:[%s5292_s22 + $0x300] sm:$0xff] }
  0x9c   : > { %1029 = vmatmul.f32.gmra.mxu1 %v718_v0  ;;  %v763_v0 = vld [vmem:[%s5292_s22 + $0x310] sm:$0xff] }
  0x9d   : > { %1255 = vmatmul.f32.gmra.mxu3 %v720_v1 }
  0xa2   : > { %919 = vmatmul.f32.gmra.mxu0 %v721_v2  ;;  %1145 = vmatmul.f32.gmra.mxu2 %v723_v3  ;;  %v762_v2 = vld [vmem:[%s5292_s22 + $0x308] sm:$0xff]  ;;  %v764_v3 = vld [vmem:[%s5292_s22 + $0x318] sm:$0xff] }
  0xa4   : > { %1032 = vmatmul.f32.gmra.mxu1 %v722_v4  ;;  %v1346_v4 = vld [vmem:[%s7034_s29 + $0x8] sm:$0xff] }
  0xa5   : > { %1258 = vmatmul.f32.gmra.mxu3 %v724_v5  ;;  %1379 = vmatpush.msrb.mxu0 %v1346_v4  ;;  %v1514_v5 = vld [vmem:[%s7035_s1 + $0x20] sm:$0xff] }
  0xa6   : > { %1630 = vmatpush.msrb.mxu1 %v1514_v5  ;;  %v788_v5 = vld [vmem:[%s5292_s22 + $0x3d8] sm:$0xff] }
  0xaa   : > { %922 = vmatmul.f32.gmra.mxu0 %v725_v7  ;;  %1148 = vmatmul.f32.gmra.mxu2 %v727_v8  ;;  %v765_v7 = vld [vmem:[%s5292_s22 + $0x320] sm:$0xff]  ;;  %v767_v8 = vld [vmem:[%s5292_s22 + $0x330] sm:$0xff] }
  0xac   : > { %1035 = vmatmul.f32.gmra.mxu1 %v726_v9 }
  0xad   : > { %1261 = vmatmul.f32.gmra.mxu3 %v728_v10 }
  0xaf   : > { %v5418_v11 = vpop.f32.mrf.mxu0 }
  0xb1   : > { %v5480_v53 = vpop.f32.mrf.mxu1 }
  0xb2   : > { %925 = vmatmul.f32.gmra.mxu0 %v729_v12  ;;  %1151 = vmatmul.f32.gmra.mxu2 %v731_v13  ;;  %v766_v12 = vld [vmem:[%s5292_s22 + $0x328] sm:$0xff]  ;;  %v768_v13 = vld [vmem:[%s5292_s22 + $0x338] sm:$0xff] }
  0xb4   : > { %1038 = vmatmul.f32.gmra.mxu1 %v730_v14 }
  0xb5   : > { %1264 = vmatmul.f32.gmra.mxu3 %v732_v15  ;;  %v5478_v52 = vpop.f32.mrf.mxu2 }
  0xb7   : > { %v5430_v18 = vpop.f32.mrf.mxu0 }
  0xb8   : > { %v5482_v54 = vpop.f32.mrf.mxu3 }
  0xb9   : > { %v5492_v61 = vpop.f32.mrf.mxu1 }
  0xba   : > { %928 = vmatmul.f32.gmra.mxu0 %v733_v19  ;;  %1154 = vmatmul.f32.gmra.mxu2 %v735_v20  ;;  %v770_v19 = vld [vmem:[%s5292_s22 + $0x348] sm:$0xff] }
  0xbc   : > { %1041 = vmatmul.f32.gmra.mxu1 %v734_v21  ;;  %v772_v21 = vld [vmem:[%s5292_s22 + $0x358] sm:$0xff] }
  0xbd   : > { %1267 = vmatmul.f32.gmra.mxu3 %v736_v22  ;;  %v5490_v60 = vpop.f32.mrf.mxu2 }
  0xbf   : > { %v5436_v23 = vpop.f32.mrf.mxu0 }
  0xc0   : > { %v5498_v1 = vpop.f32.mrf.mxu3 }
  0xc1   : > { %v5514_v10 = vpop.f32.mrf.mxu1 }
  0xc2   : > { %931 = vmatmul.f32.gmra.mxu0 %v737_v24  ;;  %1157 = vmatmul.f32.gmra.mxu2 %v739_v25  ;;  %v1345_v24 = vld [vmem:[%s7034_s29] sm:$0xff] }
  0xc3   : > { %1380 = vmatpush.msrb.mxu0 %v1345_v24  ;;  %v792_v24 = vld [vmem:[%s5292_s22 + $0x3f8] sm:$0xff] }
  0xc4   : > { %1044 = vmatmul.f32.gmra.mxu1 %v738_v26 }
  0xc5   : > { %1270 = vmatmul.f32.gmra.mxu3 %v740_v27  ;;  %v5512_v9 = vpop.f32.mrf.mxu2  ;;  %v773_v27 = vld [vmem:[%s5292_s22 + $0x360] sm:$0xff] }
  0xc7   : > { %v5445_v29 = vpop.f32.mrf.mxu0 }
  0xc8   : > { %v5518_v14 = vpop.f32.mrf.mxu3 }
  0xc9   : > { %v5528_v22 = vpop.f32.mrf.mxu1 }
  0xca   : > { %934 = vmatmul.f32.gmra.mxu0 %v741_v30  ;;  %1160 = vmatmul.f32.gmra.mxu2 %v743_v31  ;;  %v774_v30 = vld [vmem:[%s5292_s22 + $0x368] sm:$0xff]  ;;  %v776_v31 = vld [vmem:[%s5292_s22 + $0x378] sm:$0xff] }
  0xcc   : > { %1047 = vmatmul.f32.gmra.mxu1 %v742_v32 }
  0xcd   : > { %1273 = vmatmul.f32.gmra.mxu3 %v744_v33  ;;  %v5525_v20 = vpop.f32.mrf.mxu2 }
  0xcf   : > { %v5451_v34 = vpop.f32.mrf.mxu0 }
  0xd0   : > { %v5533_v25 = vpop.f32.mrf.mxu3 }
  0xd1   : > { %v5543_v33 = vpop.f32.mrf.mxu1 }
  0xd2   : > { %937 = vmatmul.f32.gmra.mxu0 %v745_v35  ;;  %1163 = vmatmul.f32.gmra.mxu2 %v747_v36 }
  0xd4   : > { %1050 = vmatmul.f32.gmra.mxu1 %v746_v37  ;;  %v777_v37 = vld [vmem:[%s5292_s22 + $0x380] sm:$0xff] }
  0xd5   : > { %1276 = vmatmul.f32.gmra.mxu3 %v748_v38  ;;  %v5541_v32 = vpop.f32.mrf.mxu2  ;;  %v779_v38 = vld [vmem:[%s5292_s22 + $0x390] sm:$0xff] }
  0xd7   : > { %v5463_v41 = vpop.f32.mrf.mxu0 }
  0xd8   : > { %v5545_v35 = vpop.f32.mrf.mxu3 }
  0xda   : > { %940 = vmatmul.f32.gmra.mxu0 %v749_v42  ;;  %1166 = vmatmul.f32.gmra.mxu2 %v751_v43  ;;  %v1513_v42 = vld [vmem:[%s7035_s1 + $0x18] sm:$0xff] }
  0xdb   : > { %1631 = vmatpush.msrb.mxu1 %v1513_v42 }
  0xdc   : > { %1053 = vmatmul.f32.gmra.mxu1 %v750_v44  ;;  %v1768_v44 = vld [vmem:[%s7007_s7 + $0x20] sm:$0xf] }
  0xdd   : > { %1279 = vmatmul.f32.gmra.mxu3 %v752_v45  ;;  %v5556_v43 = vpop.f32.mrf.mxu2  ;;  %v5561_v45 = vpop.f32.mrf.mxu1  ;;  %4511 = vmatpush.msk.msrb.mxu2 %vm1870_vm0, %v1768_v44 }
  0xdf   : > { %v5469_v46 = vpop.f32.mrf.mxu0 }
  0xe2   : > { %943 = vmatmul.f32.gmra.mxu0 %v753_v47  ;;  %1169 = vmatmul.f32.gmra.mxu2 %v755_v48  ;;  %v781_v48 = vld [vmem:[%s5292_s22 + $0x3a0] sm:$0xff] }
  0xe4   : > { %1056 = vmatmul.f32.gmra.mxu1 %v754_v49  ;;  %v783_v49 = vld [vmem:[%s5292_s22 + $0x3b0] sm:$0xff] }
  0xe5   : > { %1282 = vmatmul.f32.gmra.mxu3 %v756_v50  ;;  %v5568_v50 = vpop.f32.mrf.mxu3 }
  0xe7   : > { %v5484_v55 = vpop.f32.mrf.mxu0 }
  0xea   : > { %946 = vmatmul.f32.gmra.mxu0 %v757_v56  ;;  %1172 = vmatmul.f32.gmra.mxu2 %v759_v57  ;;  %v784_v56 = vld [vmem:[%s5292_s22 + $0x3b8] sm:$0xff]  ;;  %v5575_v57 = vld [vmem:[%s7036_s27] ss:$0 sm:$0xff] }
  0xeb   : > { %v879_v4 = vadd.f32 %v5575_v57, %v5418_v11  ;;  %v882_v11 = vadd.f32 %v5575_v57, %v5430_v18 }
  0xec   : > { %1059 = vmatmul.f32.gmra.mxu1 %v758_v58 }
  0xed   : > { %1285 = vmatmul.f32.gmra.mxu3 %v760_v59  ;;  %v785_v59 = vld [vmem:[%s5292_s22 + $0x3c0] sm:$0xff] }
  0xef   : > { %v5494_v62 = vpop.f32.mrf.mxu0 }
  0xf2   : > { %949 = vmatmul.f32.gmra.mxu0 %v761_v63  ;;  %1175 = vmatmul.f32.gmra.mxu2 %v763_v0  ;;  %v787_v63 = vld [vmem:[%s5292_s22 + $0x3d0] sm:$0xff]  ;;  %v5581_v0 = vpop.f32.mrf.mxu2 }
  0xf4   : > { %1062 = vmatmul.f32.gmra.mxu1 %v762_v2  ;;  %v5583_v2 = vpop.f32.mrf.mxu1 }
  0xf5   : > { %1288 = vmatmul.f32.gmra.mxu3 %v764_v3  ;;  %v786_v3 = vld [vmem:[%s5292_s22 + $0x3c8] sm:$0xff] }
  0xf7   : > { %v5508_v6 = vpop.f32.mrf.mxu0 }
  0xfa   : > { %952 = vmatmul.f32.gmra.mxu0 %v765_v7  ;;  %1178 = vmatmul.f32.gmra.mxu2 %v767_v8  ;;  %v5589_v7 = vpop.f32.mrf.mxu3  ;;  %v992_v8 = vadd.f32 %v5480_v53, %v879_v4 }
  0xfc   : > { %1065 = vmatmul.f32.gmra.mxu1 %v766_v12 }
  0xfd   : > { %1291 = vmatmul.f32.gmra.mxu3 %v768_v13  ;;  %v789_v13 = vld [vmem:[%s5292_s22 + $0x3e0] sm:$0xff] }
  0xff   : > { %v5520_v15 = vpop.f32.mrf.mxu0 }
 0x102   : > { %955 = vmatmul.f32.gmra.mxu0 %v769_v16  ;;  %1181 = vmatmul.f32.gmra.mxu2 %v771_v17  ;;  %v791_v16 = vld [vmem:[%s5292_s22 + $0x3f0] sm:$0xff]  ;;  %v1105_v17 = vadd.f32 %v5478_v52, %v992_v8  ;;  %v5606_v53 = vpop.f32.mrf.mxu3 }
 0x104   : > { %1068 = vmatmul.f32.gmra.mxu1 %v770_v19  ;;  %v790_v19 = vld [vmem:[%s5292_s22 + $0x3e8] sm:$0xff]  ;;  %s6623_s22 = scalar_lea.vmem %s7021_s21, %s7038_s25 }
 0x105   : > { %1294 = vmatmul.f32.gmra.mxu3 %v772_v21  ;;  %v5600_v21 = vpop.f32.mrf.mxu2 }
 0x107   : > { %v5535_v26 = vpop.f32.mrf.mxu0 }
 0x10a   : > { %958 = vmatmul.f32.gmra.mxu0 %v773_v27  ;;  %1184 = vmatmul.f32.gmra.mxu2 %v775_v28  ;;  %v5603_v27 = vpop.f32.mrf.mxu1  ;;  %v1218_v28 = vadd.f32 %v5482_v54, %v1105_v17 }
 0x10c   : > { %1071 = vmatmul.f32.gmra.mxu1 %v774_v30  ;;  %v995_v30 = vadd.f32 %v5492_v61, %v882_v11 }
 0x10d   : > { %1297 = vmatmul.f32.gmra.mxu3 %v776_v31  ;;  %v1313_v31 = vmax.f32 %v1218_v28, 0.0  ;;  %v5619_v61 = vpop.f32.mrf.mxu2 }
 0x10e   : > { %v1108_v18 = vadd.f32 %v5490_v60, %v995_v30 }
 0x10f   : > { %v5547_v36 = vpop.f32.mrf.mxu0 }
 0x110   : > { %v1221_v54 = vadd.f32 %v5498_v1, %v1108_v18 }
 0x112   : > { %961 = vmatmul.f32.gmra.mxu0 %v777_v37  ;;  %1187 = vmatmul.f32.gmra.mxu2 %v779_v38  ;;  %v885_v37 = vadd.f32 %v5575_v57, %v5436_v23  ;;  %v1512_v38 = vld [vmem:[%s7035_s1 + $0x10] sm:$0xff]  ;;  %v1314_v44 = vmax.f32 %v1221_v54, 0.0  ;;  %v888_v23 = vadd.f32 %v5575_v57, %v5445_v29 }
 0x113   : > { %1632 = vmatpush.msrb.mxu1 %v1512_v38 }
 0x114   : > { %1074 = vmatmul.f32.gmra.mxu1 %v778_v39  ;;  %v1015_v39 = vpop.f32.mrf.mxu1  ;;  %v1001_v1 = vadd.f32 %v5528_v22, %v888_v23 }
 0x115   : > { %1300 = vmatmul.f32.gmra.mxu3 %v780_v40  ;;  %v998_v40 = vadd.f32 %v5514_v10, %v885_v37 }
 0x117   : > { %v5563_v47 = vpop.f32.mrf.mxu0  ;;  %v1111_v60 = vadd.f32 %v5512_v9, %v998_v40 }
 0x11a   : > { %964 = vmatmul.f32.gmra.mxu0 %v781_v48  ;;  %1190 = vmatmul.f32.gmra.mxu2 %v783_v49  ;;  %v1241_v48 = vpop.f32.mrf.mxu3  ;;  %v1224_v49 = vadd.f32 %v5518_v14, %v1111_v60  ;;  %v903_v60 = vadd.f32 %v5575_v57, %v5494_v62 }
 0x11c   : > { %1077 = vmatmul.f32.gmra.mxu1 %v782_v51  ;;  %v1018_v51 = vpop.f32.mrf.mxu1  ;;  %v1315_v10 = vmax.f32 %v1224_v49, 0.0 }
 0x11d   : > { %1303 = vmatmul.f32.gmra.mxu3 %v784_v56 }
 0x11f   : > { %v5577_v58 = vpop.f32.mrf.mxu0 }
 0x122   : > { %967 = vmatmul.f32.gmra.mxu0 %v785_v59  ;;  %1193 = vmatmul.f32.gmra.mxu2 %v787_v63  ;;  %v1114_v59 = vadd.f32 %v5525_v20, %v1001_v1  ;;  %v1131_v63 = vpop.f32.mrf.mxu2  ;;  %v1244_v29 = vpop.f32.mrf.mxu3 }
 0x124   : > { %1080 = vmatmul.f32.gmra.mxu1 %v786_v3  ;;  %v891_v3 = vadd.f32 %v5575_v57, %v5451_v34  ;;  %v1227_v9 = vadd.f32 %v5533_v25, %v1114_v59  ;;  %v1021_v8 = vpop.f32.mrf.mxu1  ;;  %v1767_v34 = vld [vmem:[%s7007_s7 + $0x18] sm:$0xff]  ;;  %v906_v59 = vadd.f32 %v5575_v57, %v5508_v6 }
 0x125   : > { %1306 = vmatmul.f32.gmra.mxu3 %v788_v5  ;;  %1886 = vmatpush.msrb.mxu2 %v1767_v34 }
 0x126   : > { %v1004_v4 = vadd.f32 %v5543_v33, %v891_v3  ;;  %v1316_v14 = vmax.f32 %v1227_v9, 0.0  ;;  %v1019_v9 = vadd.f32 %v1018_v51, %v906_v59 }
 0x127   : > { %v5592_v12 = vpop.f32.mrf.mxu0 }
 0x128   : > { %v1117_v22 = vadd.f32 %v5541_v32, %v1004_v4 }
 0x12a   : > { %970 = vmatmul.f32.gmra.mxu0 %v789_v13  ;;  %1196 = vmatmul.f32.gmra.mxu2 %v791_v16  ;;  %v894_v13 = vadd.f32 %v5575_v57, %v5463_v41  ;;  %v1134_v20 = vpop.f32.mrf.mxu2  ;;  %v1230_v25 = vadd.f32 %v5545_v35, %v1117_v22  ;;  %v1247_v16 = vpop.f32.mrf.mxu3  ;;  %v897_v41 = vadd.f32 %v5575_v57, %v5469_v46 }
 0x12b   : > { %v900_v46 = vadd.f32 %v5575_v57, %v5484_v55  ;;  %v1016_v55 = vadd.f32 %v1015_v39, %v903_v60  ;;  %v909_v39 = vadd.f32 %v5575_v57, %v5520_v15 }
 0x12c   : > { %1083 = vmatmul.f32.gmra.mxu1 %v790_v19  ;;  %v1007_v33 = vadd.f32 %v5561_v45, %v894_v13  ;;  %v1317_v19 = vmax.f32 %v1230_v25, 0.0  ;;  %v1024_v11 = vpop.f32.mrf.mxu1  ;;  %v1010_v45 = vadd.f32 %v5583_v2, %v897_v41  ;;  %v1766_v41 = vld [vmem:[%s7007_s7 + $0x10] sm:$0xff] }
 0x12d   : > { %1309 = vmatmul.f32.gmra.mxu3 %v792_v24  ;;  %v1511_v24 = vld [vmem:[%s7035_s1 + $0x8] sm:$0xff]  ;;  %v1013_v54 = vadd.f32 %v5603_v27, %v900_v46  ;;  %v1129_v27 = vadd.f32 %v5619_v61, %v1016_v55  ;;  %v1510_v61 = vld [vmem:[%s7035_s1] sm:$0xff]  ;;  %v1022_v6 = vadd.f32 %v1021_v8, %v909_v39  ;;  %1887 = vmatpush.msrb.mxu2 %v1766_v41 }
 0x12e   : > { %v1120_v32 = vadd.f32 %v5556_v43, %v1007_v33  ;;  %1633 = vmatpush.msrb.mxu1 %v1511_v24  ;;  %v1123_v43 = vadd.f32 %v5581_v0, %v1010_v45 }
 0x12f   : > { %v5609_v52 = vpop.f32.mrf.mxu0  ;;  %v1126_v2 = vadd.f32 %v5600_v21, %v1013_v54  ;;  %v1242_v21 = vadd.f32 %v1241_v48, %v1129_v27  ;;  %v1135_v25 = vadd.f32 %v1134_v20, %v1022_v6  ;;  %v915_v20 = vadd.f32 %v5575_v57, %v5547_v36 }
 0x130   : > { %v1233_v35 = vadd.f32 %v5568_v50, %v1120_v32  ;;  %v1236_v37 = vadd.f32 %v5589_v7, %v1123_v43  ;;  %1634 = vmatpush.msrb.mxu1 %v1510_v61  ;;  %v927_v39 = vadd.f32 %v5575_v57, %v5609_v52 }
 0x131   : > { %v1239_v23 = vadd.f32 %v5606_v53, %v1126_v2  ;;  %v1321_v4 = vmax.f32 %v1242_v21, 0.0  ;;  %v1248_v15 = vadd.f32 %v1247_v16, %v1135_v25 }
 0x132   : > { %1381 = vmatmul.f32.vlgmr.msrb.gmra.mxu0 %v1313_v31  ;;  %v1137_v28 = vpop.f32.mrf.mxu2  ;;  %v1318_v31 = vmax.f32 %v1233_v35, 0.0  ;;  %v1250_v18 = vpop.f32.mrf.mxu3 }
 0x133   : > { %v1320_v7 = vmax.f32 %v1239_v23, 0.0  ;;  %v1323_v8 = vmax.f32 %v1248_v15, 0.0  ;;  %v5718_v15 = vld [vmem:[%s7037_s23] ss:$0 sm:$0xff] }
 0x134   : > { %v1027_v38 = vpop.f32.mrf.mxu1 }
 0x137   : > { %v5621_v42 = vpop.f32.mrf.mxu0 }
 0x13a   : > { %1384 = vmatmul.f32.gmra.mxu0 %v1314_v44  ;;  %v1140_v50 = vpop.f32.mrf.mxu2  ;;  %v1319_v44 = vmax.f32 %v1236_v37, 0.0  ;;  %v1253_v0 = vpop.f32.mrf.mxu3  ;;  %v918_v37 = vadd.f32 %v5575_v57, %v5563_v47 }
 0x13c   : > { %v1030_v49 = vpop.f32.mrf.mxu1 }
 0x13f   : > { %v5628_v56 = vpop.f32.mrf.mxu0 }
 0x142   : > { %1387 = vmatmul.f32.gmra.mxu0 %v1315_v10  ;;  %v1143_v10 = vpop.f32.mrf.mxu2  ;;  %v1256_v3 = vpop.f32.mrf.mxu3 }
 0x144   : > { %v1033_v53 = vpop.f32.mrf.mxu1 }
 0x147   : > { %v5635_v5 = vpop.f32.mrf.mxu0 }
 0x14a   : > { %1390 = vmatmul.f32.gmra.mxu0 %v1316_v14  ;;  %v1132_v14 = vadd.f32 %v1131_v63, %v1019_v9  ;;  %v1146_v22 = vpop.f32.mrf.mxu2  ;;  %v1259_v48 = vpop.f32.mrf.mxu3  ;;  %v912_v63 = vadd.f32 %v5575_v57, %v5535_v26 }
 0x14c   : > { %v1245_v13 = vadd.f32 %v1244_v29, %v1132_v14  ;;  %v1036_v33 = vpop.f32.mrf.mxu1  ;;  %v1025_v32 = vadd.f32 %v1024_v11, %v912_v63  ;;  %v930_v63 = vadd.f32 %v5575_v57, %v5621_v42 }
 0x14e   : > { %v1322_v51 = vmax.f32 %v1245_v13, 0.0  ;;  %v1138_v24 = vadd.f32 %v1137_v28, %v1025_v32  ;;  %v1031_v28 = vadd.f32 %v1030_v49, %v918_v37 }
 0x14f   : > { %v5645_v17 = vpop.f32.mrf.mxu0 }
 0x150   : > { %v1251_v26 = vadd.f32 %v1250_v18, %v1138_v24  ;;  %v1144_v23 = vadd.f32 %v1143_v10, %v1031_v28  ;;  %v2021_v10 = vld [vmem:[%s7009_s9 + $0x10] sm:$0x3] }
 0x151   : > { %4544 = vmatpush.msk.msrb.mxu3 %vm2123_vm1, %v2021_v10 }
 0x152   : > { %1393 = vmatmul.f32.gmra.mxu0 %v1317_v19  ;;  %v1149_v19 = vpop.f32.mrf.mxu2  ;;  %v1262_v35 = vpop.f32.mrf.mxu3  ;;  %v1324_v11 = vmax.f32 %v1251_v26, 0.0  ;;  %v1257_v55 = vadd.f32 %v1256_v3, %v1144_v23  ;;  %v1765_v26 = vld [vmem:[%s7007_s7 + $0x8] sm:$0xff] }
 0x153   : > { %1888 = vmatpush.msrb.mxu2 %v1765_v26 }
 0x154   : > { %v1039_v45 = vpop.f32.mrf.mxu1  ;;  %v1326_v47 = vmax.f32 %v1257_v55, 0.0 }
 0x155   : > { %v1040_v13 = vadd.f32 %v1039_v45, %v927_v39 }
 0x157   : > { %v5655_v30 = vpop.f32.mrf.mxu0 }
 0x15a   : > { %1396 = vmatmul.f32.gmra.mxu0 %v1318_v31  ;;  %v1028_v31 = vadd.f32 %v1027_v38, %v915_v20  ;;  %v1152_v16 = vpop.f32.mrf.mxu2  ;;  %v1265_v54 = vpop.f32.mrf.mxu3  ;;  %v921_v38 = vadd.f32 %v5575_v57, %v5577_v58  ;;  %v933_v20 = vadd.f32 %v5575_v57, %v5628_v56  ;;  %v936_v56 = vadd.f32 %v5575_v57, %v5635_v5 }
 0x15c   : > { %v1141_v46 = vadd.f32 %v1140_v50, %v1028_v31  ;;  %v1042_v2 = vpop.f32.mrf.mxu1  ;;  %v1034_v50 = vadd.f32 %v1033_v53, %v921_v38 }
 0x15e   : > { %v1147_v59 = vadd.f32 %v1146_v22, %v1034_v50 }
 0x15f   : > { %v5662_v40 = vpop.f32.mrf.mxu0 }
 0x160   : > { %v1260_v9 = vadd.f32 %v1259_v48, %v1147_v59  ;;  %v939_v59 = vadd.f32 %v5575_v57, %v5645_v17 }
 0x162   : > { %1399 = vmatmul.f32.gmra.mxu0 %v1319_v44  ;;  %v1254_v44 = vadd.f32 %v1253_v0, %v1141_v46  ;;  %v1155_v18 = vpop.f32.mrf.mxu2  ;;  %v924_v0 = vadd.f32 %v5575_v57, %v5592_v12  ;;  %v1327_v14 = vmax.f32 %v1260_v9, 0.0 }
 0x164   : > { %v1325_v36 = vmax.f32 %v1254_v44, 0.0  ;;  %v1045_v21 = vpop.f32.mrf.mxu1  ;;  %v1037_v58 = vadd.f32 %v1036_v33, %v924_v0 }
 0x166   : > { %v1150_v53 = vadd.f32 %v1149_v19, %v1037_v58  ;;  %v1043_v19 = vadd.f32 %v1042_v2, %v930_v63 }
 0x167   : > { %v5668_v1 = vpop.f32.mrf.mxu0 }
 0x168   : > { %v1263_v22 = vadd.f32 %v1262_v35, %v1150_v53  ;;  %v1156_v24 = vadd.f32 %v1155_v18, %v1043_v19  ;;  %v942_v53 = vadd.f32 %v5575_v57, %v5655_v30 }
 0x16a   : > { %1402 = vmatmul.f32.gmra.mxu0 %v1320_v7  ;;  %v1268_v7 = vpop.f32.mrf.mxu3  ;;  %v1158_v49 = vpop.f32.mrf.mxu2  ;;  %v1328_v48 = vmax.f32 %v1263_v22, 0.0 }
 0x16b   : > { %v1269_v31 = vadd.f32 %v1268_v7, %v1156_v24 }
 0x16c   : > { %v1048_v12 = vpop.f32.mrf.mxu1 }
 0x16d   : > { %v1330_v37 = vmax.f32 %v1269_v31, 0.0  ;;  %v1049_v18 = vadd.f32 %v1048_v12, %v936_v56 }
 0x16f   : > { %v5673_v62 = vpop.f32.mrf.mxu0 }
 0x172   : > { %1405 = vmatmul.f32.gmra.mxu0 %v1321_v4  ;;  %v1271_v3 = vpop.f32.mrf.mxu3  ;;  %v1161_v61 = vpop.f32.mrf.mxu2 }
 0x173   : > { %v1162_v7 = vadd.f32 %v1161_v61, %v1049_v18 }
 0x174   : > { %v1051_v52 = vpop.f32.mrf.mxu1 }
 0x177   : > { %v5680_v34 = vpop.f32.mrf.mxu0 }
 0x17a   : > { %1408 = vmatmul.f32.gmra.mxu0 %v1322_v51  ;;  %v1153_v51 = vadd.f32 %v1152_v16, %v1040_v13  ;;  %v1274_v25 = vpop.f32.mrf.mxu3  ;;  %v1164_v32 = vpop.f32.mrf.mxu2  ;;  %v1046_v16 = vadd.f32 %v1045_v21, %v933_v20 }
 0x17b   : > { %v1275_v5 = vadd.f32 %v1274_v25, %v1162_v7 }
 0x17c   : > { %v1266_v33 = vadd.f32 %v1265_v54, %v1153_v51  ;;  %v1159_v54 = vadd.f32 %v1158_v49, %v1046_v16  ;;  %v1052_v49 = vadd.f32 %v1051_v52, %v939_v59 }
 0x17d   : > { %v1332_v58 = vmax.f32 %v1275_v5, 0.0 }
 0x17f   : > { %v5687_v29 = vpop.f32.mrf.mxu0 }
 0x182   : > { %1411 = vmatmul.f32.gmra.mxu0 %v1323_v8  ;;  %v1329_v8 = vmax.f32 %v1266_v33, 0.0  ;;  %v1277_v45 = vpop.f32.mrf.mxu3  ;;  %v1167_v28 = vpop.f32.mrf.mxu2  ;;  %v945_v33 = vadd.f32 %v5575_v57, %v5662_v40 }
 0x187   : > { %v5691_v43 = vpop.f32.mrf.mxu0 }
 0x18a   : > { %1414 = vmatmul.f32.gmra.mxu0 %v1324_v11  ;;  %v1054_v11 = vpop.f32.mrf.mxu1  ;;  %v1280_v23 = vpop.f32.mrf.mxu3 }
 0x18b   : > { %v1170_v0 = vpop.f32.mrf.mxu2  ;;  %v1055_v61 = vadd.f32 %v1054_v11, %v942_v53 }
 0x18d   : > { %v1168_v51 = vadd.f32 %v1167_v28, %v1055_v61  ;;  %v951_v28 = vadd.f32 %v5575_v57, %v5673_v62  ;;  %v954_v62 = vadd.f32 %v5575_v57, %v5680_v34 }
 0x18f   : > { %v5695_v60 = vpop.f32.mrf.mxu0  ;;  %v1281_v30 = vadd.f32 %v1280_v23, %v1168_v51 }
 0x191   : > { %v1334_v24 = vmax.f32 %v1281_v30, 0.0 }
 0x192   : > { %1417 = vmatmul.f32.gmra.mxu0 %v1325_v36  ;;  %v1272_v36 = vadd.f32 %v1271_v3, %v1159_v54  ;;  %v1283_v9 = vpop.f32.mrf.mxu3  ;;  %v1165_v3 = vadd.f32 %v1164_v32, %v1052_v49 }
 0x193   : > { %v1173_v22 = vpop.f32.mrf.mxu2 }
 0x194   : > { %v1331_v55 = vmax.f32 %v1272_v36, 0.0  ;;  %v1278_v17 = vadd.f32 %v1277_v45, %v1165_v3  ;;  %v957_v3 = vadd.f32 %v5575_v57, %v5687_v29  ;;  %v960_v29 = vadd.f32 %v5575_v57, %v5691_v43 }
 0x197   : > { %v5699_v27 = vpop.f32.mrf.mxu0 }
 0x19a   : > { %1420 = vmatmul.f32.gmra.mxu0 %v1326_v47  ;;  %v1057_v47 = vpop.f32.mrf.mxu1  ;;  %v1286_v63 = vpop.f32.mrf.mxu3 }
 0x19b   : > { %v1058_v32 = vadd.f32 %v1057_v47, %v945_v33 }
 0x19f   : > { %v5707_v4 = vpop.f32.mrf.mxu0 }
 0x1a2   : > { %1423 = vmatmul.f32.gmra.mxu0 %v1327_v14  ;;  %v1060_v12 = vpop.f32.mrf.mxu1  ;;  %v1289_v45 = vpop.f32.mrf.mxu3 }
 0x1a7   : > { %v5711_v6 = vpop.f32.mrf.mxu0 }
 0x1aa   : > { %1426 = vmatmul.f32.gmra.mxu0 %v1328_v48  ;;  %v1333_v48 = vmax.f32 %v1278_v17, 0.0  ;;  %v1063_v19 = vpop.f32.mrf.mxu1  ;;  %v1292_v36 = vpop.f32.mrf.mxu3 }
 0x1ab   : > { %v1064_v23 = vadd.f32 %v1063_v19, %v951_v28 }
 0x1af   : > { %v1382_v41 = vpop.f32.mrf.mxu0 }
 0x1b0   : > { %v1383_v35 = vadd.f32 %v5718_v15, %v1382_v41  ;;  %v1176_v41 = vpop.f32.mrf.mxu2 }
 0x1b2   : > { %v1478_v42 = vmax.f32 %v1383_v35, 0.0  ;;  %1429 = vmatmul.f32.gmra.mxu0 %v1329_v8  ;;  %v1171_v35 = vadd.f32 %v1170_v0, %v1058_v32  ;;  %v1066_v16 = vpop.f32.mrf.mxu1  ;;  %v1295_v5 = vpop.f32.mrf.mxu3 }
 0x1b3   : > { %v1067_v0 = vadd.f32 %v1066_v16, %v954_v62 }
 0x1b4   : > { %4479 = vmatmul.msk.f32.vlgmr.msrb.gmra.mxu1 %vm1522_vm2, %v1478_v42  ;;  %v948_v42 = vadd.f32 %v5575_v57, %v5668_v1  ;;  %v1284_v40 = vadd.f32 %v1283_v9, %v1171_v35  ;;  %v1764_v1 = vld [vmem:[%s7007_s7] sm:$0xff] }
 0x1b5   : > { %1889 = vmatpush.msrb.mxu2 %v1764_v1 }
 0x1b6   : > { %v1061_v31 = vadd.f32 %v1060_v12, %v948_v42 }
 0x1b7   : > { %v1385_v46 = vpop.f32.mrf.mxu0 }
 0x1b8   : > { %v1386_v44 = vadd.f32 %v5718_v15, %v1385_v46  ;;  %v1335_v46 = vmax.f32 %v1284_v40, 0.0 }
 0x1ba   : > { %v1479_v2 = vmax.f32 %v1386_v44, 0.0  ;;  %1432 = vmatmul.f32.gmra.mxu0 %v1330_v37  ;;  %v1174_v37 = vadd.f32 %v1173_v22, %v1061_v31  ;;  %v1179_v44 = vpop.f32.mrf.mxu2  ;;  %v1298_v51 = vpop.f32.mrf.mxu3 }
 0x1bc   : > { %4480 = vmatmul.msk.f32.gmra.mxu1 %vm1522_vm2, %v1479_v2  ;;  %v1287_v2 = vadd.f32 %v1286_v63, %v1174_v37 }
 0x1bf   : > { %v1388_v38 = vpop.f32.mrf.mxu0 }
 0x1c0   : > { %v1389_v50 = vadd.f32 %v5718_v15, %v1388_v38  ;;  %v1336_v38 = vmax.f32 %v1287_v2, 0.0 }
 0x1c2   : > { %v1480_v21 = vmax.f32 %v1389_v50, 0.0  ;;  %1435 = vmatmul.f32.gmra.mxu0 %v1331_v55  ;;  %v1177_v55 = vadd.f32 %v1176_v41, %v1064_v23  ;;  %v1069_v50 = vpop.f32.mrf.mxu1  ;;  %v1182_v59 = vpop.f32.mrf.mxu2  ;;  %v969_v23 = vadd.f32 %v5575_v57, %v5707_v4 }
 0x1c3   : > { %v1070_v17 = vadd.f32 %v1069_v50, %v957_v3 }
 0x1c4   : > { %4481 = vmatmul.msk.f32.gmra.mxu1 %vm1522_vm2, %v1480_v21  ;;  %v1290_v21 = vadd.f32 %v1289_v45, %v1177_v55 }
 0x1c6   : > { %v1337_v9 = vmax.f32 %v1290_v21, 0.0  ;;  %v972_v21 = vadd.f32 %v5575_v57, %v5711_v6 }
 0x1c7   : > { %v1391_v10 = vpop.f32.mrf.mxu0 }
 0x1c8   : > { %v1392_v14 = vadd.f32 %v5718_v15, %v1391_v10  ;;  %v1180_v10 = vadd.f32 %v1179_v44, %v1067_v0 }
 0x1ca   : > { %v1481_v39 = vmax.f32 %v1392_v14, 0.0  ;;  %1438 = vmatmul.f32.gmra.mxu0 %v1332_v58  ;;  %v1072_v53 = vpop.f32.mrf.mxu1  ;;  %v1293_v34 = vadd.f32 %v1292_v36, %v1180_v10  ;;  %v1185_v12 = vpop.f32.mrf.mxu2 }
 0x1cc   : > { %4482 = vmatmul.msk.f32.gmra.mxu1 %vm1522_vm2, %v1481_v39  ;;  %v2020_v39 = vld [vmem:[%s7009_s9 + $0x8] sm:$0xff]  ;;  %v1338_v61 = vmax.f32 %v1293_v34, 0.0 }
 0x1cd   : > { %2141 = vmatpush.msrb.mxu3 %v2020_v39 }
 0x1cf   : > { %v1394_v13 = vpop.f32.mrf.mxu0 }
 0x1d0   : > { %v1395_v25 = vadd.f32 %v5718_v15, %v1394_v13  ;;  %v1183_v13 = vadd.f32 %v1182_v59, %v1070_v17 }
 0x1d2   : > { %v1482_v52 = vmax.f32 %v1395_v25, 0.0  ;;  %1441 = vmatmul.f32.gmra.mxu0 %v1333_v48  ;;  %v1296_v63 = vadd.f32 %v1295_v5, %v1183_v13  ;;  %v1075_v33 = vpop.f32.mrf.mxu1  ;;  %v1188_v30 = vpop.f32.mrf.mxu2 }
 0x1d4   : > { %4483 = vmatmul.msk.f32.gmra.mxu1 %vm1522_vm2, %v1482_v52  ;;  %v1073_v52 = vadd.f32 %v1072_v53, %v960_v29  ;;  %v1339_v32 = vmax.f32 %v1296_v63, 0.0 }
 0x1d6   : > { %v1186_v41 = vadd.f32 %v1185_v12, %v1073_v52 }
 0x1d7   : > { %v1397_v8 = vpop.f32.mrf.mxu0 }
 0x1d8   : > { %v1398_v20 = vadd.f32 %v5718_v15, %v1397_v8  ;;  %v1299_v43 = vadd.f32 %v1298_v51, %v1186_v41 }
 0x1da   : > { %v1483_v26 = vmax.f32 %v1398_v20, 0.0  ;;  %1444 = vmatmul.f32.gmra.mxu0 %v1334_v24  ;;  %v963_v24 = vadd.f32 %v5575_v57, %v5695_v60  ;;  %v1301_v20 = vpop.f32.mrf.mxu3  ;;  %v1340_v40 = vmax.f32 %v1299_v43, 0.0 }
 0x1dc   : > { %4484 = vmatmul.msk.f32.gmra.mxu1 %vm1522_vm2, %v1483_v26  ;;  %v1076_v42 = vadd.f32 %v1075_v33, %v963_v24  ;;  %v1078_v26 = vpop.f32.mrf.mxu1 }
 0x1de   : > { %v1189_v31 = vadd.f32 %v1188_v30, %v1076_v42 }
 0x1df   : > { %v1400_v11 = vpop.f32.mrf.mxu0 }
 0x1e0   : > { %v1401_v54 = vadd.f32 %v5718_v15, %v1400_v11  ;;  %v1191_v11 = vpop.f32.mrf.mxu2  ;;  %v1302_v60 = vadd.f32 %v1301_v20, %v1189_v31 }
 0x1e2   : > { %v1484_v56 = vmax.f32 %v1401_v54, 0.0  ;;  %1447 = vmatmul.f32.gmra.mxu0 %v1335_v46  ;;  %v966_v46 = vadd.f32 %v5575_v57, %v5699_v27  ;;  %v1304_v54 = vpop.f32.mrf.mxu3  ;;  %v2240_v57 = vld [vmem:[%s7011_s11] sm:$0xff] }
 0x1e3   : > { %2357 = vmatpush.msra.mxu0 %v2240_v57 }
 0x1e4   : > { %4485 = vmatmul.msk.f32.gmra.mxu1 %vm1522_vm2, %v1484_v56  ;;  %v1079_v44 = vadd.f32 %v1078_v26, %v966_v46  ;;  %v1341_v56 = vmax.f32 %v1302_v60, 0.0  ;;  %v1081_v36 = vpop.f32.mrf.mxu1  ;;  %v2019_v46 = vld [vmem:[%s7009_s9] sm:$0xff] }
 0x1e5   : > { %v1082_v55 = vadd.f32 %v1081_v36, %v969_v23  ;;  %2142 = vmatpush.msrb.mxu3 %v2019_v46 }
 0x1e6   : > { %v1192_v1 = vadd.f32 %v1191_v11, %v1079_v44 }
 0x1e7   : > { %v1403_v18 = vpop.f32.mrf.mxu0 }
 0x1e8   : > { %v1404_v7 = vadd.f32 %v5718_v15, %v1403_v18  ;;  %v1305_v27 = vadd.f32 %v1304_v54, %v1192_v1 }
 0x1ea   : > { %v1485_v47 = vmax.f32 %v1404_v7, 0.0  ;;  %1450 = vmatmul.f32.gmra.mxu0 %v1336_v38  ;;  %v1194_v38 = vpop.f32.mrf.mxu2  ;;  %v1307_v7 = vpop.f32.mrf.mxu3  ;;  %v1342_v62 = vmax.f32 %v1305_v27, 0.0 }
 0x1ec   : > { %4486 = vmatmul.msk.f32.gmra.mxu1 %vm1522_vm2, %v1485_v47  ;;  %v1195_v47 = vadd.f32 %v1194_v38, %v1082_v55  ;;  %v1084_v5 = vpop.f32.mrf.mxu1 }
 0x1ee   : > { %v1308_v4 = vadd.f32 %v1307_v7, %v1195_v47 }
 0x1ef   : > { %v1406_v49 = vpop.f32.mrf.mxu0 }
 0x1f0   : > { %v1407_v58 = vadd.f32 %v5718_v15, %v1406_v49 }
 0x1f2   : > { %v1486_v14 = vmax.f32 %v1407_v58, 0.0  ;;  %1453 = vmatmul.f32.gmra.mxu0 %v1337_v9  ;;  %v1197_v49 = vpop.f32.mrf.mxu2  ;;  %v1085_v9 = vadd.f32 %v1084_v5, %v972_v21  ;;  %v1343_v58 = vmax.f32 %v1308_v4, 0.0  ;;  %v1310_v53 = vpop.f32.mrf.mxu3 }
 0x1f4   : > { %4487 = vmatmul.msk.f32.gmra.mxu1 %vm1522_vm2, %v1486_v14  ;;  %v1198_v3 = vadd.f32 %v1197_v49, %v1085_v9 }
 0x1f6   : > { %v1311_v39 = vadd.f32 %v1310_v53, %v1198_v3 }
 0x1f7   : > { %v1409_v22 = vpop.f32.mrf.mxu0 }
 0x1f8   : > { %v1410_v48 = vadd.f32 %v5718_v15, %v1409_v22  ;;  %v1344_v12 = vmax.f32 %v1311_v39, 0.0 }
 0x1fa   : > { %v1487_v25 = vmax.f32 %v1410_v48, 0.0  ;;  %1456 = vmatmul.f32.gmra.mxu0 %v1338_v61  ;;  %v5795_v61 = vld [vmem:[%s7006_s6] ss:$0 sm:$0xff] }
 0x1fc   : > { %4488 = vmatmul.msk.f32.gmra.mxu1 %vm1522_vm2, %v1487_v25 }
 0x1ff   : > { %v1412_v19 = vpop.f32.mrf.mxu0 }
 0x200   : > { %v1413_v8 = vadd.f32 %v5718_v15, %v1412_v19 }
 0x202   : > { %v1488_v35 = vmax.f32 %v1413_v8, 0.0  ;;  %1459 = vmatmul.f32.gmra.mxu0 %v1339_v32 }
 0x204   : > { %4489 = vmatmul.msk.f32.gmra.mxu1 %vm1522_vm2, %v1488_v35 }
 0x207   : > { %v1415_v45 = vpop.f32.mrf.mxu0 }
 0x208   : > { %v1416_v16 = vadd.f32 %v5718_v15, %v1415_v45 }
 0x20a   : > { %v1489_v37 = vmax.f32 %v1416_v16, 0.0  ;;  %1462 = vmatmul.f32.gmra.mxu0 %v1340_v40 }
 0x20c   : > { %4490 = vmatmul.msk.f32.gmra.mxu1 %vm1522_vm2, %v1489_v37 }
 0x20f   : > { %v1418_v28 = vpop.f32.mrf.mxu0 }
 0x210   : > { %v1419_v2 = vadd.f32 %v5718_v15, %v1418_v28 }
 0x212   : > { %v1490_v18 = vmax.f32 %v1419_v2, 0.0  ;;  %1465 = vmatmul.f32.gmra.mxu0 %v1341_v56 }
 0x214   : > { %4491 = vmatmul.msk.f32.gmra.mxu1 %vm1522_vm2, %v1490_v18 }
 0x217   : > { %v1421_v50 = vpop.f32.mrf.mxu0 }
 0x218   : > { %v1422_v59 = vadd.f32 %v5718_v15, %v1421_v50 }
 0x21a   : > { %v1491_v0 = vmax.f32 %v1422_v59, 0.0  ;;  %1468 = vmatmul.f32.gmra.mxu0 %v1342_v62 }
 0x21c   : > { %4492 = vmatmul.msk.f32.gmra.mxu1 %vm1522_vm2, %v1491_v0 }
 0x21f   : > { %v1424_v10 = vpop.f32.mrf.mxu0 }
 0x220   : > { %v1425_v14 = vadd.f32 %v5718_v15, %v1424_v10 }
 0x222   : > { %v1492_v34 = vmax.f32 %v1425_v14, 0.0  ;;  %1471 = vmatmul.f32.gmra.mxu0 %v1343_v58 }
 0x224   : > { %4493 = vmatmul.msk.f32.gmra.mxu1 %vm1522_vm2, %v1492_v34 }
 0x227   : > { %v1427_v6 = vpop.f32.mrf.mxu0 }
 0x228   : > { %v1428_v17 = vadd.f32 %v5718_v15, %v1427_v6 }
 0x22a   : > { %v1493_v22 = vmax.f32 %v1428_v17, 0.0  ;;  %1474 = vmatmul.f32.gmra.mxu0 %v1344_v12 }
 0x22c   : > { %4494 = vmatmul.msk.f32.gmra.mxu1 %vm1522_vm2, %v1493_v22 }
 0x22f   : > { %v1430_v13 = vpop.f32.mrf.mxu0 }
 0x230   : > { %v1431_v48 = vadd.f32 %v5718_v15, %v1430_v13 }
 0x231   : > { %v1636_v51 = vpop.f32.mrf.mxu1 }
 0x232   : > { %v1494_v29 = vmax.f32 %v1431_v48, 0.0  ;;  %v1637_v25 = vadd.f32 %v5795_v61, %v1636_v51 }
 0x234   : > { %v1732_v63 = vmax.f32 %v1637_v25, 0.0  ;;  %4495 = vmatmul.msk.f32.gmra.mxu1 %vm1522_vm2, %v1494_v29 }
 0x236   : > { %4512 = vmatmul.msk.f32.vlgmr.msrb.gmra.mxu2 %vm1773_vm3, %v1732_v63 }
 0x237   : > { %v1433_v33 = vpop.f32.mrf.mxu0 }
 0x238   : > { %v1434_v52 = vadd.f32 %v5718_v15, %v1433_v33 }
 0x239   : > { %v1639_v30 = vpop.f32.mrf.mxu1 }
 0x23a   : > { %v1495_v19 = vmax.f32 %v1434_v52, 0.0  ;;  %v1640_v32 = vadd.f32 %v5795_v61, %v1639_v30 }
 0x23c   : > { %v1733_v41 = vmax.f32 %v1640_v32, 0.0  ;;  %4496 = vmatmul.msk.f32.gmra.mxu1 %vm1522_vm2, %v1495_v19 }
 0x23e   : > { %4513 = vmatmul.msk.f32.gmra.mxu2 %vm1773_vm3, %v1733_v41 }
 0x23f   : > { %v1436_v8 = vpop.f32.mrf.mxu0 }
 0x240   : > { %v1437_v24 = vadd.f32 %v5718_v15, %v1436_v8 }
 0x241   : > { %v1642_v35 = vpop.f32.mrf.mxu1 }
 0x242   : > { %v1496_v20 = vmax.f32 %v1437_v24, 0.0  ;;  %v1643_v43 = vadd.f32 %v5795_v61, %v1642_v35 }
 0x244   : > { %v1734_v42 = vmax.f32 %v1643_v43, 0.0  ;;  %4497 = vmatmul.msk.f32.gmra.mxu1 %vm1522_vm2, %v1496_v20 }
 0x246   : > { %4514 = vmatmul.msk.f32.gmra.mxu2 %vm1773_vm3, %v1734_v42 }
 0x247   : > { %v1439_v26 = vpop.f32.mrf.mxu0 }
 0x248   : > { %v1440_v45 = vadd.f32 %v5718_v15, %v1439_v26 }
 0x249   : > { %v1645_v40 = vpop.f32.mrf.mxu1 }
 0x24a   : > { %v1497_v31 = vmax.f32 %v1440_v45, 0.0  ;;  %v1646_v16 = vadd.f32 %v5795_v61, %v1645_v40 }
 0x24c   : > { %v1735_v11 = vmax.f32 %v1646_v16, 0.0  ;;  %4498 = vmatmul.msk.f32.gmra.mxu1 %vm1522_vm2, %v1497_v31 }
 0x24e   : > { %4515 = vmatmul.msk.f32.gmra.mxu2 %vm1773_vm3, %v1735_v11 }
 0x24f   : > { %v1442_v37 = vpop.f32.mrf.mxu0 }
 0x250   : > { %v1443_v60 = vadd.f32 %v5718_v15, %v1442_v37 }
 0x251   : > { %v1648_v54 = vpop.f32.mrf.mxu1 }
 0x252   : > { %v1498_v44 = vmax.f32 %v1443_v60, 0.0  ;;  %v1649_v28 = vadd.f32 %v5795_v61, %v1648_v54 }
 0x254   : > { %v1736_v56 = vmax.f32 %v1649_v28, 0.0  ;;  %4499 = vmatmul.msk.f32.gmra.mxu1 %vm1522_vm2, %v1498_v44  ;;  %v2489_v28 = vld [vmem:[%s7013_s13 + $0x10] sm:$0x3] }
 0x255   : > { %4609 = vmatpush.msk.msra.mxu1 %vm2123_vm1, %v2489_v28 }
 0x256   : > { %4516 = vmatmul.msk.f32.gmra.mxu2 %vm1773_vm3, %v1736_v56 }
 0x257   : > { %v1445_v1 = vpop.f32.mrf.mxu0 }
 0x258   : > { %v1446_v2 = vadd.f32 %v5718_v15, %v1445_v1 }
 0x259   : > { %v1651_v36 = vpop.f32.mrf.mxu1 }
 0x25a   : > { %v1499_v23 = vmax.f32 %v1446_v2, 0.0  ;;  %v1652_v18 = vadd.f32 %v5795_v61, %v1651_v36 }
 0x25c   : > { %v1737_v38 = vmax.f32 %v1652_v18, 0.0  ;;  %4500 = vmatmul.msk.f32.gmra.mxu1 %vm1522_vm2, %v1499_v23 }
 0x25e   : > { %4517 = vmatmul.msk.f32.gmra.mxu2 %vm1773_vm3, %v1737_v38 }
 0x25f   : > { %v1448_v27 = vpop.f32.mrf.mxu0 }
 0x260   : > { %v1449_v55 = vadd.f32 %v5718_v15, %v1448_v27 }
 0x261   : > { %v1654_v7 = vpop.f32.mrf.mxu1 }
 0x262   : > { %v1500_v50 = vmax.f32 %v1449_v55, 0.0  ;;  %v1655_v62 = vadd.f32 %v5795_v61, %v1654_v7  ;;  %v5873_v7 = vld [vmem:[%s7008_s8] ss:$0 sm:$0xff] }
 0x264   : > { %v1738_v47 = vmax.f32 %v1655_v62, 0.0  ;;  %4501 = vmatmul.msk.f32.gmra.mxu1 %vm1522_vm2, %v1500_v50 }
 0x266   : > { %4518 = vmatmul.msk.f32.gmra.mxu2 %vm1773_vm3, %v1738_v47 }
 0x267   : > { %v1451_v59 = vpop.f32.mrf.mxu0 }
 0x268   : > { %v1452_v21 = vadd.f32 %v5718_v15, %v1451_v59 }
 0x269   : > { %v1657_v0 = vpop.f32.mrf.mxu1 }
 0x26a   : > { %v1501_v5 = vmax.f32 %v1452_v21, 0.0  ;;  %v1658_v4 = vadd.f32 %v5795_v61, %v1657_v0 }
 0x26c   : > { %v1739_v49 = vmax.f32 %v1658_v4, 0.0  ;;  %4502 = vmatmul.msk.f32.gmra.mxu1 %vm1522_vm2, %v1501_v5 }
 0x26e   : > { %4519 = vmatmul.msk.f32.gmra.mxu2 %vm1773_vm3, %v1739_v49 }
 0x26f   : > { %v1454_v9 = vpop.f32.mrf.mxu0 }
 0x270   : > { %v1455_v10 = vadd.f32 %v5718_v15, %v1454_v9 }
 0x271   : > { %v1660_v58 = vpop.f32.mrf.mxu1 }
 0x272   : > { %v1502_v3 = vmax.f32 %v1455_v10, 0.0  ;;  %v1661_v14 = vadd.f32 %v5795_v61, %v1660_v58 }
 0x274   : > { %v1740_v53 = vmax.f32 %v1661_v14, 0.0  ;;  %4503 = vmatmul.msk.f32.gmra.mxu1 %vm1522_vm2, %v1502_v3 }
 0x276   : > { %4520 = vmatmul.msk.f32.gmra.mxu2 %vm1773_vm3, %v1740_v53 }
 0x277   : > { %v1457_v34 = vpop.f32.mrf.mxu0 }
 0x278   : > { %v1458_v39 = vadd.f32 %v5718_v15, %v1457_v34 }
 0x279   : > { %v1663_v57 = vpop.f32.mrf.mxu1 }
 0x27a   : > { %v1503_v6 = vmax.f32 %v1458_v39, 0.0  ;;  %v1664_v12 = vadd.f32 %v5795_v61, %v1663_v57 }
 0x27c   : > { %v1741_v17 = vmax.f32 %v1664_v12, 0.0  ;;  %4504 = vmatmul.msk.f32.gmra.mxu1 %vm1522_vm2, %v1503_v6 }
 0x27e   : > { %4521 = vmatmul.msk.f32.gmra.mxu2 %vm1773_vm3, %v1741_v17 }
 0x27f   : > { %v1460_v22 = vpop.f32.mrf.mxu0 }
 0x280   : > { %v1461_v13 = vadd.f32 %v5718_v15, %v1460_v22 }
 0x281   : > { %v1666_v48 = vpop.f32.mrf.mxu1 }
 0x282   : > { %v1504_v51 = vmax.f32 %v1461_v13, 0.0  ;;  %v1667_v29 = vadd.f32 %v5795_v61, %v1666_v48 }
 0x284   : > { %v1742_v25 = vmax.f32 %v1667_v29, 0.0  ;;  %4505 = vmatmul.msk.f32.gmra.mxu1 %vm1522_vm2, %v1504_v51 }
 0x286   : > { %4522 = vmatmul.msk.f32.gmra.mxu2 %vm1773_vm3, %v1742_v25 }
 0x287   : > { %v1463_v63 = vpop.f32.mrf.mxu0 }
 0x288   : > { %v1464_v33 = vadd.f32 %v5718_v15, %v1463_v63 }
 0x289   : > { %v1669_v52 = vpop.f32.mrf.mxu1 }
 0x28a   : > { %v1505_v30 = vmax.f32 %v1464_v33, 0.0  ;;  %v1670_v19 = vadd.f32 %v5795_v61, %v1669_v52 }
 0x28c   : > { %v1743_v32 = vmax.f32 %v1670_v19, 0.0  ;;  %4506 = vmatmul.msk.f32.gmra.mxu1 %vm1522_vm2, %v1505_v30 }
 0x28e   : > { %4523 = vmatmul.msk.f32.gmra.mxu2 %vm1773_vm3, %v1743_v32 }
 0x28f   : > { %v1466_v41 = vpop.f32.mrf.mxu0 }
 0x290   : > { %v1467_v8 = vadd.f32 %v5718_v15, %v1466_v41 }
 0x291   : > { %v1672_v24 = vpop.f32.mrf.mxu1 }
 0x292   : > { %v1506_v35 = vmax.f32 %v1467_v8, 0.0  ;;  %v1673_v20 = vadd.f32 %v5795_v61, %v1672_v24 }
 0x294   : > { %v1744_v43 = vmax.f32 %v1673_v20, 0.0  ;;  %4507 = vmatmul.msk.f32.gmra.mxu1 %vm1522_vm2, %v1506_v35 }
 0x296   : > { %4524 = vmatmul.msk.f32.gmra.mxu2 %vm1773_vm3, %v1744_v43 }
 0x297   : > { %v1469_v42 = vpop.f32.mrf.mxu0 }
 0x298   : > { %v1470_v26 = vadd.f32 %v5718_v15, %v1469_v42 }
 0x299   : > { %v1675_v45 = vpop.f32.mrf.mxu1 }
 0x29a   : > { %v1507_v40 = vmax.f32 %v1470_v26, 0.0  ;;  %v1676_v31 = vadd.f32 %v5795_v61, %v1675_v45 }
 0x29c   : > { %v1745_v16 = vmax.f32 %v1676_v31, 0.0  ;;  %4508 = vmatmul.msk.f32.gmra.mxu1 %vm1522_vm2, %v1507_v40 }
 0x29e   : > { %4525 = vmatmul.msk.f32.gmra.mxu2 %vm1773_vm3, %v1745_v16 }
 0x29f   : > { %v1472_v11 = vpop.f32.mrf.mxu0 }
 0x2a0   : > { %v1473_v46 = vadd.f32 %v5718_v15, %v1472_v11 }
 0x2a1   : > { %v1678_v37 = vpop.f32.mrf.mxu1 }
 0x2a2   : > { %v1508_v60 = vmax.f32 %v1473_v46, 0.0  ;;  %v1679_v54 = vadd.f32 %v5795_v61, %v1678_v37 }
 0x2a4   : > { %v1746_v44 = vmax.f32 %v1679_v54, 0.0  ;;  %4509 = vmatmul.msk.f32.gmra.mxu1 %vm1522_vm2, %v1508_v60 }
 0x2a6   : > { %4526 = vmatmul.msk.f32.gmra.mxu2 %vm1773_vm3, %v1746_v44 }
 0x2a7   : > { %v1475_v56 = vpop.f32.mrf.mxu0 }
 0x2a8   : > { %v1476_v1 = vadd.f32 %v5718_v15, %v1475_v56 }
 0x2a9   : > { %v1681_v2 = vpop.f32.mrf.mxu1 }
 0x2aa   : > { %v1509_v36 = vmax.f32 %v1476_v1, 0.0  ;;  %v1682_v23 = vadd.f32 %v5795_v61, %v1681_v2  ;;  %v2488_v1 = vld [vmem:[%s7013_s13 + $0x8] sm:$0xff] }
 0x2ab   : > { %2607 = vmatpush.msra.mxu1 %v2488_v1 }
 0x2ac   : > { %v1747_v18 = vmax.f32 %v1682_v23, 0.0  ;;  %4510 = vmatmul.msk.f32.gmra.mxu1 %vm1522_vm2, %v1509_v36 }
 0x2ae   : > { %4527 = vmatmul.msk.f32.gmra.mxu2 %vm1773_vm3, %v1747_v18 }
 0x2b1   : > { %v1684_v38 = vpop.f32.mrf.mxu1 }
 0x2b2   : > { %v1685_v27 = vadd.f32 %v5795_v61, %v1684_v38 }
 0x2b4   : > { %v1748_v55 = vmax.f32 %v1685_v27, 0.0 }
 0x2b6   : > { %4528 = vmatmul.msk.f32.gmra.mxu2 %vm1773_vm3, %v1748_v55 }
 0x2b9   : > { %v1687_v15 = vpop.f32.mrf.mxu1  ;;  %v1891_v50 = vpop.f32.mrf.mxu2 }
 0x2ba   : > { %v1688_v62 = vadd.f32 %v5795_v61, %v1687_v15  ;;  %v1892_v47 = vadd.f32 %v5873_v7, %v1891_v50 }
 0x2bc   : > { %v1749_v59 = vmax.f32 %v1688_v62, 0.0  ;;  %v1987_v21 = vmax.f32 %v1892_v47, 0.0 }
 0x2be   : > { %4529 = vmatmul.msk.f32.gmra.mxu2 %vm1773_vm3, %v1749_v59  ;;  %4545 = vmatmul.msk.f32.vlgmr.msrb.gmra.mxu3 %vm2026_vm4, %v1987_v21 }
 0x2c1   : > { %v1690_v0 = vpop.f32.mrf.mxu1  ;;  %v1894_v5 = vpop.f32.mrf.mxu2 }
 0x2c2   : > { %v1691_v4 = vadd.f32 %v5795_v61, %v1690_v0  ;;  %v1895_v49 = vadd.f32 %v5873_v7, %v1894_v5 }
 0x2c4   : > { %v1750_v9 = vmax.f32 %v1691_v4, 0.0  ;;  %v1988_v10 = vmax.f32 %v1895_v49, 0.0 }
 0x2c6   : > { %4530 = vmatmul.msk.f32.gmra.mxu2 %vm1773_vm3, %v1750_v9  ;;  %4546 = vmatmul.msk.f32.gmra.mxu3 %vm2026_vm4, %v1988_v10 }
 0x2c9   : > { %v1693_v58 = vpop.f32.mrf.mxu1  ;;  %v1897_v3 = vpop.f32.mrf.mxu2 }
 0x2ca   : > { %v1694_v14 = vadd.f32 %v5795_v61, %v1693_v58  ;;  %v1898_v53 = vadd.f32 %v5873_v7, %v1897_v3 }
 0x2cc   : > { %v1751_v34 = vmax.f32 %v1694_v14, 0.0  ;;  %v1989_v39 = vmax.f32 %v1898_v53, 0.0 }
 0x2ce   : > { %4531 = vmatmul.msk.f32.gmra.mxu2 %vm1773_vm3, %v1751_v34  ;;  %4547 = vmatmul.msk.f32.gmra.mxu3 %vm2026_vm4, %v1989_v39 }
 0x2d1   : > { %v1696_v57 = vpop.f32.mrf.mxu1  ;;  %v1900_v6 = vpop.f32.mrf.mxu2 }
 0x2d2   : > { %v1697_v12 = vadd.f32 %v5795_v61, %v1696_v57  ;;  %v1901_v17 = vadd.f32 %v5873_v7, %v1900_v6 }
 0x2d4   : > { %v1752_v22 = vmax.f32 %v1697_v12, 0.0  ;;  %v1990_v13 = vmax.f32 %v1901_v17, 0.0 }
 0x2d6   : > { %4532 = vmatmul.msk.f32.gmra.mxu2 %vm1773_vm3, %v1752_v22  ;;  %4548 = vmatmul.msk.f32.gmra.mxu3 %vm2026_vm4, %v1990_v13  ;;  %v2742_v13 = vld [vmem:[%s7015_s15 + $0x20] sm:$0xf] }
 0x2d7   : > { %4642 = vmatpush.msk.msra.mxu2 %vm1870_vm0, %v2742_v13 }
 0x2d9   : > { %v1699_v48 = vpop.f32.mrf.mxu1  ;;  %v1903_v51 = vpop.f32.mrf.mxu2 }
 0x2da   : > { %v1700_v29 = vadd.f32 %v5795_v61, %v1699_v48  ;;  %v1904_v25 = vadd.f32 %v5873_v7, %v1903_v51 }
 0x2dc   : > { %v1753_v63 = vmax.f32 %v1700_v29, 0.0  ;;  %v1991_v33 = vmax.f32 %v1904_v25, 0.0 }
 0x2de   : > { %4533 = vmatmul.msk.f32.gmra.mxu2 %vm1773_vm3, %v1753_v63  ;;  %4549 = vmatmul.msk.f32.gmra.mxu3 %vm2026_vm4, %v1991_v33 }
 0x2e1   : > { %v1702_v52 = vpop.f32.mrf.mxu1  ;;  %v1906_v30 = vpop.f32.mrf.mxu2 }
 0x2e2   : > { %v1703_v19 = vadd.f32 %v5795_v61, %v1702_v52  ;;  %v1907_v32 = vadd.f32 %v5873_v7, %v1906_v30 }
 0x2e4   : > { %v1754_v41 = vmax.f32 %v1703_v19, 0.0  ;;  %v1992_v8 = vmax.f32 %v1907_v32, 0.0 }
 0x2e6   : > { %4534 = vmatmul.msk.f32.gmra.mxu2 %vm1773_vm3, %v1754_v41  ;;  %4550 = vmatmul.msk.f32.gmra.mxu3 %vm2026_vm4, %v1992_v8 }
 0x2e9   : > { %v1705_v24 = vpop.f32.mrf.mxu1  ;;  %v1909_v35 = vpop.f32.mrf.mxu2 }
 0x2ea   : > { %v1706_v20 = vadd.f32 %v5795_v61, %v1705_v24  ;;  %v1910_v43 = vadd.f32 %v5873_v7, %v1909_v35 }
 0x2ec   : > { %v1755_v42 = vmax.f32 %v1706_v20, 0.0  ;;  %v1993_v26 = vmax.f32 %v1910_v43, 0.0 }
 0x2ee   : > { %4535 = vmatmul.msk.f32.gmra.mxu2 %vm1773_vm3, %v1755_v42  ;;  %4551 = vmatmul.msk.f32.gmra.mxu3 %vm2026_vm4, %v1993_v26 }
 0x2f1   : > { %v1708_v45 = vpop.f32.mrf.mxu1  ;;  %v1912_v40 = vpop.f32.mrf.mxu2 }
 0x2f2   : > { %v1709_v31 = vadd.f32 %v5795_v61, %v1708_v45  ;;  %v1913_v16 = vadd.f32 %v5873_v7, %v1912_v40 }
 0x2f4   : > { %v1756_v11 = vmax.f32 %v1709_v31, 0.0  ;;  %v1994_v46 = vmax.f32 %v1913_v16, 0.0 }
 0x2f6   : > { %4536 = vmatmul.msk.f32.gmra.mxu2 %vm1773_vm3, %v1756_v11  ;;  %4552 = vmatmul.msk.f32.gmra.mxu3 %vm2026_vm4, %v1994_v46 }
 0x2f9   : > { %v1711_v37 = vpop.f32.mrf.mxu1  ;;  %v1915_v60 = vpop.f32.mrf.mxu2 }
 0x2fa   : > { %v1712_v54 = vadd.f32 %v5795_v61, %v1711_v37  ;;  %v1916_v44 = vadd.f32 %v5873_v7, %v1915_v60 }
 0x2fc   : > { %v1757_v28 = vmax.f32 %v1712_v54, 0.0  ;;  %v1995_v56 = vmax.f32 %v1916_v44, 0.0  ;;  %v2487_v44 = vld [vmem:[%s7013_s13] sm:$0xff] }
 0x2fd   : > { %2608 = vmatpush.msra.mxu1 %v2487_v44 }
 0x2fe   : > { %4537 = vmatmul.msk.f32.gmra.mxu2 %vm1773_vm3, %v1757_v28  ;;  %4553 = vmatmul.msk.f32.gmra.mxu3 %vm2026_vm4, %v1995_v56 }
 0x301   : > { %v1714_v2 = vpop.f32.mrf.mxu1  ;;  %v1918_v36 = vpop.f32.mrf.mxu2 }
 0x302   : > { %v1715_v23 = vadd.f32 %v5795_v61, %v1714_v2  ;;  %v1919_v18 = vadd.f32 %v5873_v7, %v1918_v36 }
 0x304   : > { %v1758_v38 = vmax.f32 %v1715_v23, 0.0  ;;  %v1996_v27 = vmax.f32 %v1919_v18, 0.0  ;;  %v2741_v23 = vld [vmem:[%s7015_s15 + $0x18] sm:$0xff] }
 0x305   : > { %2858 = vmatpush.msra.mxu2 %v2741_v23 }
 0x306   : > { %4538 = vmatmul.msk.f32.gmra.mxu2 %vm1773_vm3, %v1758_v38  ;;  %4554 = vmatmul.msk.f32.gmra.mxu3 %vm2026_vm4, %v1996_v27 }
 0x309   : > { %v1717_v55 = vpop.f32.mrf.mxu1  ;;  %v1921_v15 = vpop.f32.mrf.mxu2 }
 0x30a   : > { %v1718_v50 = vadd.f32 %v5795_v61, %v1717_v55  ;;  %v1922_v62 = vadd.f32 %v5873_v7, %v1921_v15 }
 0x30c   : > { %v1759_v47 = vmax.f32 %v1718_v50, 0.0  ;;  %v1997_v59 = vmax.f32 %v1922_v62, 0.0 }
 0x30e   : > { %4539 = vmatmul.msk.f32.gmra.mxu2 %vm1773_vm3, %v1759_v47  ;;  %4555 = vmatmul.msk.f32.gmra.mxu3 %vm2026_vm4, %v1997_v59 }
 0x311   : > { %v1720_v21 = vpop.f32.mrf.mxu1  ;;  %v1924_v0 = vpop.f32.mrf.mxu2 }
 0x312   : > { %v1721_v5 = vadd.f32 %v5795_v61, %v1720_v21  ;;  %v1925_v4 = vadd.f32 %v5873_v7, %v1924_v0 }
 0x314   : > { %v1760_v49 = vmax.f32 %v1721_v5, 0.0  ;;  %v1998_v9 = vmax.f32 %v1925_v4, 0.0 }
 0x316   : > { %4540 = vmatmul.msk.f32.gmra.mxu2 %vm1773_vm3, %v1760_v49  ;;  %4556 = vmatmul.msk.f32.gmra.mxu3 %vm2026_vm4, %v1998_v9 }
 0x319   : > { %v1723_v10 = vpop.f32.mrf.mxu1  ;;  %v1927_v58 = vpop.f32.mrf.mxu2 }
 0x31a   : > { %v1724_v3 = vadd.f32 %v5795_v61, %v1723_v10  ;;  %v1928_v14 = vadd.f32 %v5873_v7, %v1927_v58 }
 0x31c   : > { %v1761_v53 = vmax.f32 %v1724_v3, 0.0  ;;  %v1999_v34 = vmax.f32 %v1928_v14, 0.0 }
 0x31e   : > { %4541 = vmatmul.msk.f32.gmra.mxu2 %vm1773_vm3, %v1761_v53  ;;  %4557 = vmatmul.msk.f32.gmra.mxu3 %vm2026_vm4, %v1999_v34 }
 0x321   : > { %v1726_v39 = vpop.f32.mrf.mxu1  ;;  %v1930_v57 = vpop.f32.mrf.mxu2 }
 0x322   : > { %v1727_v6 = vadd.f32 %v5795_v61, %v1726_v39  ;;  %v1931_v12 = vadd.f32 %v5873_v7, %v1930_v57 }
 0x324   : > { %v1762_v17 = vmax.f32 %v1727_v6, 0.0  ;;  %v2000_v22 = vmax.f32 %v1931_v12, 0.0 }
 0x326   : > { %4542 = vmatmul.msk.f32.gmra.mxu2 %vm1773_vm3, %v1762_v17  ;;  %4558 = vmatmul.msk.f32.gmra.mxu3 %vm2026_vm4, %v2000_v22 }
 0x329   : > { %v1729_v48 = vpop.f32.mrf.mxu1  ;;  %v1933_v51 = vpop.f32.mrf.mxu2 }
 0x32a   : > { %v1730_v29 = vadd.f32 %v5795_v61, %v1729_v48  ;;  %v1934_v25 = vadd.f32 %v5873_v7, %v1933_v51  ;;  %v5949_v61 = vld [vmem:[%s7010_s10] ss:$0 sm:$0xff] }
 0x32c   : > { %v1763_v63 = vmax.f32 %v1730_v29, 0.0  ;;  %v2001_v33 = vmax.f32 %v1934_v25, 0.0  ;;  %v2740_v29 = vld [vmem:[%s7015_s15 + $0x10] sm:$0xff] }
 0x32d   : > { %2859 = vmatpush.msra.mxu2 %v2740_v29 }
 0x32e   : > { %4543 = vmatmul.msk.f32.gmra.mxu2 %vm1773_vm3, %v1763_v63  ;;  %4559 = vmatmul.msk.f32.gmra.mxu3 %vm2026_vm4, %v2001_v33 }
 0x331   : > { %v1936_v52 = vpop.f32.mrf.mxu2 }
 0x332   : > { %v1937_v30 = vadd.f32 %v5873_v7, %v1936_v52 }
 0x334   : > { %v2002_v19 = vmax.f32 %v1937_v30, 0.0 }
 0x336   : > { %4560 = vmatmul.msk.f32.gmra.mxu3 %vm2026_vm4, %v2002_v19 }
 0x339   : > { %v1939_v32 = vpop.f32.mrf.mxu2 }
 0x33a   : > { %v1940_v41 = vadd.f32 %v5873_v7, %v1939_v32 }
 0x33c   : > { %v2003_v8 = vmax.f32 %v1940_v41, 0.0 }
 0x33e   : > { %4561 = vmatmul.msk.f32.gmra.mxu3 %vm2026_vm4, %v2003_v8 }
 0x341   : > { %v1942_v24 = vpop.f32.mrf.mxu2  ;;  %v2144_v35 = vpop.f32.mrf.mxu3 }
 0x342   : > { %v1943_v20 = vadd.f32 %v5873_v7, %v1942_v24  ;;  %v2145_v43 = vadd.f32 %v5949_v61, %v2144_v35 }
 0x344   : > { %v2004_v42 = vmax.f32 %v1943_v20, 0.0  ;;  %4577 = vmatmul.msk.f32.vlgmr.msra.gmra.mxu0 %vm2245_vm5, %v2145_v43 }
 0x346   : > { %4562 = vmatmul.msk.f32.gmra.mxu3 %vm2026_vm4, %v2004_v42 }
 0x349   : > { %v1945_v26 = vpop.f32.mrf.mxu2  ;;  %v2147_v45 = vpop.f32.mrf.mxu3 }
 0x34a   : > { %v1946_v40 = vadd.f32 %v5873_v7, %v1945_v26  ;;  %v2148_v31 = vadd.f32 %v5949_v61, %v2147_v45 }
 0x34c   : > { %v2005_v16 = vmax.f32 %v1946_v40, 0.0  ;;  %4578 = vmatmul.msk.f32.gmra.mxu0 %vm2245_vm5, %v2148_v31 }
 0x34e   : > { %4563 = vmatmul.msk.f32.gmra.mxu3 %vm2026_vm4, %v2005_v16 }
 0x351   : > { %v1948_v11 = vpop.f32.mrf.mxu2  ;;  %v2150_v46 = vpop.f32.mrf.mxu3 }
 0x352   : > { %v1949_v37 = vadd.f32 %v5873_v7, %v1948_v11  ;;  %v2151_v60 = vadd.f32 %v5949_v61, %v2150_v46  ;;  %v2998_v46 = vld [vmem:[%s7017_s17 + $0x38] sm:$0xff] }
 0x353   : > { %3107 = vmatpush.msra.mxu3 %v2998_v46  ;;  %v2995_v46 = vld [vmem:[%s7017_s17 + $0x20] sm:$0xff] }
 0x354   : > { %v2006_v54 = vmax.f32 %v1949_v37, 0.0  ;;  %4579 = vmatmul.msk.f32.gmra.mxu0 %vm2245_vm5, %v2151_v60 }
 0x356   : > { %4564 = vmatmul.msk.f32.gmra.mxu3 %vm2026_vm4, %v2006_v54 }
 0x359   : > { %v1951_v28 = vpop.f32.mrf.mxu2  ;;  %v2153_v56 = vpop.f32.mrf.mxu3 }
 0x35a   : > { %v1952_v1 = vadd.f32 %v5873_v7, %v1951_v28  ;;  %v2154_v2 = vadd.f32 %v5949_v61, %v2153_v56 }
 0x35c   : > { %v2007_v36 = vmax.f32 %v1952_v1, 0.0  ;;  %4580 = vmatmul.msk.f32.gmra.mxu0 %vm2245_vm5, %v2154_v2  ;;  %v6028_v2 = vld [vmem:[%s7012_s12] ss:$0 sm:$0xff] }
 0x35e   : > { %4565 = vmatmul.msk.f32.gmra.mxu3 %vm2026_vm4, %v2007_v36 }
 0x361   : > { %v1954_v18 = vpop.f32.mrf.mxu2  ;;  %v2156_v38 = vpop.f32.mrf.mxu3 }
 0x362   : > { %v1955_v27 = vadd.f32 %v5873_v7, %v1954_v18  ;;  %v2157_v55 = vadd.f32 %v5949_v61, %v2156_v38 }
 0x364   : > { %v2008_v15 = vmax.f32 %v1955_v27, 0.0  ;;  %4581 = vmatmul.msk.f32.gmra.mxu0 %vm2245_vm5, %v2157_v55  ;;  %v2739_v27 = vld [vmem:[%s7015_s15 + $0x8] sm:$0xff] }
 0x365   : > { %2860 = vmatpush.msra.mxu2 %v2739_v27 }
 0x366   : > { %4566 = vmatmul.msk.f32.gmra.mxu3 %vm2026_vm4, %v2008_v15 }
 0x369   : > { %v1957_v50 = vpop.f32.mrf.mxu2  ;;  %v2159_v62 = vpop.f32.mrf.mxu3 }
 0x36a   : > { %v1958_v47 = vadd.f32 %v5873_v7, %v1957_v50  ;;  %v2160_v59 = vadd.f32 %v5949_v61, %v2159_v62 }
 0x36c   : > { %v2009_v21 = vmax.f32 %v1958_v47, 0.0  ;;  %4582 = vmatmul.msk.f32.gmra.mxu0 %vm2245_vm5, %v2160_v59  ;;  %v2997_v59 = vld [vmem:[%s7017_s17 + $0x30] sm:$0xff] }
 0x36d   : > { %3108 = vmatpush.msra.mxu3 %v2997_v59 }
 0x36e   : > { %4567 = vmatmul.msk.f32.gmra.mxu3 %vm2026_vm4, %v2009_v21 }
 0x371   : > { %v1960_v0 = vpop.f32.mrf.mxu2  ;;  %v2162_v5 = vpop.f32.mrf.mxu3 }
 0x372   : > { %v1961_v4 = vadd.f32 %v5873_v7, %v1960_v0  ;;  %v2163_v49 = vadd.f32 %v5949_v61, %v2162_v5 }
 0x374   : > { %v2010_v9 = vmax.f32 %v1961_v4, 0.0  ;;  %4583 = vmatmul.msk.f32.gmra.mxu0 %vm2245_vm5, %v2163_v49 }
 0x376   : > { %4568 = vmatmul.msk.f32.gmra.mxu3 %vm2026_vm4, %v2010_v9 }
 0x379   : > { %v1963_v10 = vpop.f32.mrf.mxu2  ;;  %v2165_v58 = vpop.f32.mrf.mxu3 }
 0x37a   : > { %v1964_v3 = vadd.f32 %v5873_v7, %v1963_v10  ;;  %v2166_v14 = vadd.f32 %v5949_v61, %v2165_v58 }
 0x37c   : > { %v2011_v53 = vmax.f32 %v1964_v3, 0.0  ;;  %4584 = vmatmul.msk.f32.gmra.mxu0 %vm2245_vm5, %v2166_v14 }
 0x37e   : > { %4569 = vmatmul.msk.f32.gmra.mxu3 %vm2026_vm4, %v2011_v53 }
 0x381   : > { %v1966_v34 = vpop.f32.mrf.mxu2  ;;  %v2168_v39 = vpop.f32.mrf.mxu3 }
 0x382   : > { %v1967_v57 = vadd.f32 %v5873_v7, %v1966_v34  ;;  %v2169_v6 = vadd.f32 %v5949_v61, %v2168_v39 }
 0x384   : > { %v2012_v12 = vmax.f32 %v1967_v57, 0.0  ;;  %4585 = vmatmul.msk.f32.gmra.mxu0 %vm2245_vm5, %v2169_v6 }
 0x386   : > { %4570 = vmatmul.msk.f32.gmra.mxu3 %vm2026_vm4, %v2012_v12 }
 0x389   : > { %v1969_v17 = vpop.f32.mrf.mxu2  ;;  %v2171_v22 = vpop.f32.mrf.mxu3 }
 0x38a   : > { %v1970_v13 = vadd.f32 %v5873_v7, %v1969_v17  ;;  %v2172_v48 = vadd.f32 %v5949_v61, %v2171_v22 }
 0x38c   : > { %v2013_v51 = vmax.f32 %v1970_v13, 0.0  ;;  %4586 = vmatmul.msk.f32.gmra.mxu0 %vm2245_vm5, %v2172_v48 }
 0x38e   : > { %4571 = vmatmul.msk.f32.gmra.mxu3 %vm2026_vm4, %v2013_v51  ;;  %v2996_v51 = vld [vmem:[%s7017_s17 + $0x28] sm:$0xff] }
 0x38f   : > { %3109 = vmatpush.msra.mxu3 %v2996_v51 }
 0x391   : > { %v1972_v25 = vpop.f32.mrf.mxu2  ;;  %v2174_v63 = vpop.f32.mrf.mxu3  ;;  %3110 = vmatpush.msra.mxu3 %v2995_v46 }
 0x392   : > { %v1973_v33 = vadd.f32 %v5873_v7, %v1972_v25  ;;  %v2175_v52 = vadd.f32 %v5949_v61, %v2174_v63 }
 0x394   : > { %v2014_v30 = vmax.f32 %v1973_v33, 0.0  ;;  %4587 = vmatmul.msk.f32.gmra.mxu0 %vm2245_vm5, %v2175_v52 }
 0x396   : > { %4572 = vmatmul.msk.f32.gmra.mxu3 %vm2026_vm4, %v2014_v30  ;;  %v2738_v30 = vld [vmem:[%s7015_s15] sm:$0xff] }
 0x397   : > { %2861 = vmatpush.msra.mxu2 %v2738_v30 }
 0x399   : > { %v1975_v19 = vpop.f32.mrf.mxu2  ;;  %v2177_v32 = vpop.f32.mrf.mxu3 }
 0x39a   : > { %v1976_v41 = vadd.f32 %v5873_v7, %v1975_v19  ;;  %v2178_v8 = vadd.f32 %v5949_v61, %v2177_v32 }
 0x39c   : > { %v2015_v24 = vmax.f32 %v1976_v41, 0.0  ;;  %4588 = vmatmul.msk.f32.gmra.mxu0 %vm2245_vm5, %v2178_v8 }
 0x39e   : > { %4573 = vmatmul.msk.f32.gmra.mxu3 %vm2026_vm4, %v2015_v24 }
 0x3a1   : > { %v1978_v35 = vpop.f32.mrf.mxu2  ;;  %v2180_v20 = vpop.f32.mrf.mxu3 }
 0x3a2   : > { %v1979_v43 = vadd.f32 %v5873_v7, %v1978_v35  ;;  %v2181_v42 = vadd.f32 %v5949_v61, %v2180_v20 }
 0x3a4   : > { %v2016_v26 = vmax.f32 %v1979_v43, 0.0  ;;  %4589 = vmatmul.msk.f32.gmra.mxu0 %vm2245_vm5, %v2181_v42 }
 0x3a6   : > { %4574 = vmatmul.msk.f32.gmra.mxu3 %vm2026_vm4, %v2016_v26 }
 0x3a9   : > { %v1981_v45 = vpop.f32.mrf.mxu2  ;;  %v2183_v40 = vpop.f32.mrf.mxu3 }
 0x3aa   : > { %v1982_v31 = vadd.f32 %v5873_v7, %v1981_v45  ;;  %v2184_v16 = vadd.f32 %v5949_v61, %v2183_v40 }
 0x3ac   : > { %v2017_v11 = vmax.f32 %v1982_v31, 0.0  ;;  %4590 = vmatmul.msk.f32.gmra.mxu0 %vm2245_vm5, %v2184_v16 }
 0x3ae   : > { %4575 = vmatmul.msk.f32.gmra.mxu3 %vm2026_vm4, %v2017_v11 }
 0x3b1   : > { %v1984_v37 = vpop.f32.mrf.mxu2  ;;  %v2186_v60 = vpop.f32.mrf.mxu3 }
 0x3b2   : > { %v1985_v54 = vadd.f32 %v5873_v7, %v1984_v37  ;;  %v2187_v44 = vadd.f32 %v5949_v61, %v2186_v60 }
 0x3b4   : > { %v2018_v28 = vmax.f32 %v1985_v54, 0.0  ;;  %4591 = vmatmul.msk.f32.gmra.mxu0 %vm2245_vm5, %v2187_v44 }
 0x3b6   : > { %4576 = vmatmul.msk.f32.gmra.mxu3 %vm2026_vm4, %v2018_v28 }
 0x3b9   : > { %v2189_v56 = vpop.f32.mrf.mxu3 }
 0x3ba   : > { %v2190_v1 = vadd.f32 %v5949_v61, %v2189_v56 }
 0x3bc   : > { %4592 = vmatmul.msk.f32.gmra.mxu0 %vm2245_vm5, %v2190_v1 }
 0x3c1   : > { %v2192_v36 = vpop.f32.mrf.mxu3  ;;  %v2359_v23 = vpop.f32.mrf.mxu0 }
 0x3c2   : > { %v2193_v7 = vadd.f32 %v5949_v61, %v2192_v36  ;;  %v2360_v18 = vadd.f32 %v6028_v2, %v2359_v23 }
 0x3c4   : > { %v2455_v38 = vmax.f32 %v2360_v18, 0.0  ;;  %4593 = vmatmul.msk.f32.gmra.mxu0 %vm2245_vm5, %v2193_v7 }
 0x3c6   : > { %4610 = vmatmul.msk.f32.vlgmr.msra.gmra.mxu1 %vm2026_vm4, %v2455_v38 }
 0x3c9   : > { %v2195_v55 = vpop.f32.mrf.mxu3  ;;  %v2362_v15 = vpop.f32.mrf.mxu0 }
 0x3ca   : > { %v2196_v50 = vadd.f32 %v5949_v61, %v2195_v55  ;;  %v2363_v62 = vadd.f32 %v6028_v2, %v2362_v15 }
 0x3cc   : > { %v2456_v47 = vmax.f32 %v2363_v62, 0.0  ;;  %4594 = vmatmul.msk.f32.gmra.mxu0 %vm2245_vm5, %v2196_v50 }
 0x3ce   : > { %4611 = vmatmul.msk.f32.gmra.mxu1 %vm2026_vm4, %v2456_v47 }
 0x3d1   : > { %v2198_v21 = vpop.f32.mrf.mxu3  ;;  %v2365_v0 = vpop.f32.mrf.mxu0 }
 0x3d2   : > { %v2199_v5 = vadd.f32 %v5949_v61, %v2198_v21  ;;  %v2366_v4 = vadd.f32 %v6028_v2, %v2365_v0  ;;  %v2994_v0 = vld [vmem:[%s7017_s17 + $0x18] sm:$0xff] }
 0x3d3   : > { %3111 = vmatpush.msra.mxu3 %v2994_v0 }
 0x3d4   : > { %v2457_v49 = vmax.f32 %v2366_v4, 0.0  ;;  %4595 = vmatmul.msk.f32.gmra.mxu0 %vm2245_vm5, %v2199_v5 }
 0x3d6   : > { %4612 = vmatmul.msk.f32.gmra.mxu1 %vm2026_vm4, %v2457_v49 }
 0x3d9   : > { %v2201_v9 = vpop.f32.mrf.mxu3  ;;  %v2368_v10 = vpop.f32.mrf.mxu0 }
 0x3da   : > { %v2202_v58 = vadd.f32 %v5949_v61, %v2201_v9  ;;  %v2369_v3 = vadd.f32 %v6028_v2, %v2368_v10 }
 0x3dc   : > { %v2458_v14 = vmax.f32 %v2369_v3, 0.0  ;;  %4596 = vmatmul.msk.f32.gmra.mxu0 %vm2245_vm5, %v2202_v58 }
 0x3de   : > { %4613 = vmatmul.msk.f32.gmra.mxu1 %vm2026_vm4, %v2458_v14 }
 0x3e1   : > { %v2204_v53 = vpop.f32.mrf.mxu3  ;;  %v2371_v34 = vpop.f32.mrf.mxu0 }
 0x3e2   : > { %v2205_v39 = vadd.f32 %v5949_v61, %v2204_v53  ;;  %v2372_v57 = vadd.f32 %v6028_v2, %v2371_v34 }
 0x3e4   : > { %v2459_v6 = vmax.f32 %v2372_v57, 0.0  ;;  %4597 = vmatmul.msk.f32.gmra.mxu0 %vm2245_vm5, %v2205_v39  ;;  %v6115_v39 = vld [vmem:[%s7014_s14] ss:$0 sm:$0xff] }
 0x3e6   : > { %4614 = vmatmul.msk.f32.gmra.mxu1 %vm2026_vm4, %v2459_v6 }
 0x3e9   : > { %v2207_v12 = vpop.f32.mrf.mxu3  ;;  %v2374_v17 = vpop.f32.mrf.mxu0 }
 0x3ea   : > { %v2208_v22 = vadd.f32 %v5949_v61, %v2207_v12  ;;  %v2375_v13 = vadd.f32 %v6028_v2, %v2374_v17 }
 0x3ec   : > { %v2460_v48 = vmax.f32 %v2375_v13, 0.0  ;;  %4598 = vmatmul.msk.f32.gmra.mxu0 %vm2245_vm5, %v2208_v22 }
 0x3ee   : > { %4615 = vmatmul.msk.f32.gmra.mxu1 %vm2026_vm4, %v2460_v48 }
 0x3f1   : > { %v2210_v29 = vpop.f32.mrf.mxu3  ;;  %v2377_v25 = vpop.f32.mrf.mxu0 }
 0x3f2   : > { %v2211_v63 = vadd.f32 %v5949_v61, %v2210_v29  ;;  %v2378_v33 = vadd.f32 %v6028_v2, %v2377_v25 }
 0x3f4   : > { %v2461_v52 = vmax.f32 %v2378_v33, 0.0  ;;  %4599 = vmatmul.msk.f32.gmra.mxu0 %vm2245_vm5, %v2211_v63  ;;  %v2993_v33 = vld [vmem:[%s7017_s17 + $0x10] sm:$0xff] }
 0x3f5   : > { %3112 = vmatpush.msra.mxu3 %v2993_v33 }
 0x3f6   : > { %4616 = vmatmul.msk.f32.gmra.mxu1 %vm2026_vm4, %v2461_v52 }
 0x3f9   : > { %v2213_v19 = vpop.f32.mrf.mxu3  ;;  %v2380_v32 = vpop.f32.mrf.mxu0 }
 0x3fa   : > { %v2214_v41 = vadd.f32 %v5949_v61, %v2213_v19  ;;  %v2381_v8 = vadd.f32 %v6028_v2, %v2380_v32 }
 0x3fc   : > { %v2462_v24 = vmax.f32 %v2381_v8, 0.0  ;;  %4600 = vmatmul.msk.f32.gmra.mxu0 %vm2245_vm5, %v2214_v41 }
 0x3fe   : > { %4617 = vmatmul.msk.f32.gmra.mxu1 %vm2026_vm4, %v2462_v24 }
 0x401   : > { %v2216_v35 = vpop.f32.mrf.mxu3  ;;  %v2383_v20 = vpop.f32.mrf.mxu0 }
 0x402   : > { %v2217_v43 = vadd.f32 %v5949_v61, %v2216_v35  ;;  %v2384_v42 = vadd.f32 %v6028_v2, %v2383_v20 }
 0x404   : > { %v2463_v26 = vmax.f32 %v2384_v42, 0.0  ;;  %4601 = vmatmul.msk.f32.gmra.mxu0 %vm2245_vm5, %v2217_v43 }
 0x406   : > { %4618 = vmatmul.msk.f32.gmra.mxu1 %vm2026_vm4, %v2463_v26 }
 0x409   : > { %v2219_v45 = vpop.f32.mrf.mxu3  ;;  %v2386_v40 = vpop.f32.mrf.mxu0 }
 0x40a   : > { %v2220_v31 = vadd.f32 %v5949_v61, %v2219_v45  ;;  %v2387_v16 = vadd.f32 %v6028_v2, %v2386_v40 }
 0x40c   : > { %v2464_v11 = vmax.f32 %v2387_v16, 0.0  ;;  %4602 = vmatmul.msk.f32.gmra.mxu0 %vm2245_vm5, %v2220_v31 }
 0x40e   : > { %4619 = vmatmul.msk.f32.gmra.mxu1 %vm2026_vm4, %v2464_v11 }
 0x411   : > { %v2222_v37 = vpop.f32.mrf.mxu3  ;;  %v2389_v60 = vpop.f32.mrf.mxu0 }
 0x412   : > { %v2223_v54 = vadd.f32 %v5949_v61, %v2222_v37  ;;  %v2390_v44 = vadd.f32 %v6028_v2, %v2389_v60 }
 0x414   : > { %v2465_v28 = vmax.f32 %v2390_v44, 0.0  ;;  %4603 = vmatmul.msk.f32.gmra.mxu0 %vm2245_vm5, %v2223_v54 }
 0x416   : > { %4620 = vmatmul.msk.f32.gmra.mxu1 %vm2026_vm4, %v2465_v28 }
 0x419   : > { %v2225_v56 = vpop.f32.mrf.mxu3  ;;  %v2392_v1 = vpop.f32.mrf.mxu0 }
 0x41a   : > { %v2226_v36 = vadd.f32 %v5949_v61, %v2225_v56  ;;  %v2393_v23 = vadd.f32 %v6028_v2, %v2392_v1  ;;  %v2992_v1 = vld [vmem:[%s7017_s17 + $0x8] sm:$0xff] }
 0x41b   : > { %3113 = vmatpush.msra.mxu3 %v2992_v1 }
 0x41c   : > { %v2466_v7 = vmax.f32 %v2393_v23, 0.0  ;;  %4604 = vmatmul.msk.f32.gmra.mxu0 %vm2245_vm5, %v2226_v36 }
 0x41e   : > { %4621 = vmatmul.msk.f32.gmra.mxu1 %vm2026_vm4, %v2466_v7 }
 0x421   : > { %v2228_v18 = vpop.f32.mrf.mxu3  ;;  %v2395_v38 = vpop.f32.mrf.mxu0 }
 0x422   : > { %v2229_v27 = vadd.f32 %v5949_v61, %v2228_v18  ;;  %v2396_v55 = vadd.f32 %v6028_v2, %v2395_v38 }
 0x424   : > { %v2467_v15 = vmax.f32 %v2396_v55, 0.0  ;;  %4605 = vmatmul.msk.f32.gmra.mxu0 %vm2245_vm5, %v2229_v27 }
 0x426   : > { %4622 = vmatmul.msk.f32.gmra.mxu1 %vm2026_vm4, %v2467_v15 }
 0x429   : > { %v2231_v50 = vpop.f32.mrf.mxu3  ;;  %v2398_v62 = vpop.f32.mrf.mxu0 }
 0x42a   : > { %v2232_v47 = vadd.f32 %v5949_v61, %v2231_v50  ;;  %v2399_v59 = vadd.f32 %v6028_v2, %v2398_v62 }
 0x42c   : > { %v2468_v21 = vmax.f32 %v2399_v59, 0.0  ;;  %4606 = vmatmul.msk.f32.gmra.mxu0 %vm2245_vm5, %v2232_v47 }
 0x42e   : > { %4623 = vmatmul.msk.f32.gmra.mxu1 %vm2026_vm4, %v2468_v21 }
 0x431   : > { %v2234_v5 = vpop.f32.mrf.mxu3  ;;  %v2401_v4 = vpop.f32.mrf.mxu0 }
 0x432   : > { %v2235_v49 = vadd.f32 %v5949_v61, %v2234_v5  ;;  %v2402_v9 = vadd.f32 %v6028_v2, %v2401_v4 }
 0x434   : > { %v2469_v10 = vmax.f32 %v2402_v9, 0.0  ;;  %4607 = vmatmul.msk.f32.gmra.mxu0 %vm2245_vm5, %v2235_v49 }
 0x436   : > { %4624 = vmatmul.msk.f32.gmra.mxu1 %vm2026_vm4, %v2469_v10 }
 0x439   : > { %v2237_v58 = vpop.f32.mrf.mxu3  ;;  %v2404_v3 = vpop.f32.mrf.mxu0 }
 0x43a   : > { %v2238_v14 = vadd.f32 %v5949_v61, %v2237_v58  ;;  %v2405_v53 = vadd.f32 %v6028_v2, %v2404_v3 }
 0x43c   : > { %v2470_v34 = vmax.f32 %v2405_v53, 0.0  ;;  %4608 = vmatmul.msk.f32.gmra.mxu0 %vm2245_vm5, %v2238_v14 }
 0x43e   : > { %4625 = vmatmul.msk.f32.gmra.mxu1 %vm2026_vm4, %v2470_v34 }
 0x441   : > { %v2407_v57 = vpop.f32.mrf.mxu0 }
 0x442   : > { %v2408_v6 = vadd.f32 %v6028_v2, %v2407_v57  ;;  %v2991_v57 = vld [vmem:[%s7017_s17] sm:$0xff] }
 0x443   : > { %v2610_v12 = vpop.f32.mrf.mxu1  ;;  %3114 = vmatpush.msra.mxu3 %v2991_v57  ;;  %v3296_v57 = vld [vmem:[%s7019_s19 + $0x1a0] sm:$0xff] }
 0x444   : > { %v2471_v17 = vmax.f32 %v2408_v6, 0.0  ;;  %v2611_v22 = vadd.f32 %v6115_v39, %v2610_v12 }
 0x446   : > { %v2706_v61 = vmax.f32 %v2611_v22, 0.0  ;;  %4626 = vmatmul.msk.f32.gmra.mxu1 %vm2026_vm4, %v2471_v17 }
 0x448   : > { %4643 = vmatmul.msk.f32.vlgmr.msra.gmra.mxu2 %vm1773_vm3, %v2706_v61 }
 0x449   : > { %v2410_v13 = vpop.f32.mrf.mxu0 }
 0x44a   : > { %v2411_v48 = vadd.f32 %v6028_v2, %v2410_v13 }
 0x44b   : > { %v2613_v51 = vpop.f32.mrf.mxu1 }
 0x44c   : > { %v2472_v29 = vmax.f32 %v2411_v48, 0.0  ;;  %v2614_v25 = vadd.f32 %v6115_v39, %v2613_v51 }
 0x44e   : > { %v2707_v63 = vmax.f32 %v2614_v25, 0.0  ;;  %4627 = vmatmul.msk.f32.gmra.mxu1 %vm2026_vm4, %v2472_v29 }
 0x450   : > { %4644 = vmatmul.msk.f32.gmra.mxu2 %vm1773_vm3, %v2707_v63 }
 0x451   : > { %v2413_v52 = vpop.f32.mrf.mxu0 }
 0x452   : > { %v2414_v30 = vadd.f32 %v6028_v2, %v2413_v52 }
 0x453   : > { %v2616_v19 = vpop.f32.mrf.mxu1 }
 0x454   : > { %v2473_v32 = vmax.f32 %v2414_v30, 0.0  ;;  %v2617_v41 = vadd.f32 %v6115_v39, %v2616_v19 }
 0x456   : > { %v2708_v8 = vmax.f32 %v2617_v41, 0.0  ;;  %4628 = vmatmul.msk.f32.gmra.mxu1 %vm2026_vm4, %v2473_v32 }
 0x458   : > { %4645 = vmatmul.msk.f32.gmra.mxu2 %vm1773_vm3, %v2708_v8 }
 0x459   : > { %v2416_v24 = vpop.f32.mrf.mxu0 }
 0x45a   : > { %v2417_v35 = vadd.f32 %v6028_v2, %v2416_v24 }
 0x45b   : > { %v2619_v20 = vpop.f32.mrf.mxu1 }
 0x45c   : > { %v2474_v43 = vmax.f32 %v2417_v35, 0.0  ;;  %v2620_v42 = vadd.f32 %v6115_v39, %v2619_v20 }
 0x45e   : > { %v2709_v26 = vmax.f32 %v2620_v42, 0.0  ;;  %4629 = vmatmul.msk.f32.gmra.mxu1 %vm2026_vm4, %v2474_v43 }
 0x460   : > { %4646 = vmatmul.msk.f32.gmra.mxu2 %vm1773_vm3, %v2709_v26 }
 0x461   : > { %v2419_v45 = vpop.f32.mrf.mxu0 }
 0x462   : > { %v2420_v40 = vadd.f32 %v6028_v2, %v2419_v45  ;;  %v3306_v45 = vld [vmem:[%s7019_s19 + $0x1f0] sm:$0xff] }
 0x463   : > { %v2622_v31 = vpop.f32.mrf.mxu1  ;;  %3544 = vmatpush.msrb.mxu2 %v3306_v45  ;;  %v3291_v45 = vld [vmem:[%s7019_s19 + $0x178] sm:$0xff] }
 0x464   : > { %v2475_v16 = vmax.f32 %v2420_v40, 0.0  ;;  %v2623_v11 = vadd.f32 %v6115_v39, %v2622_v31  ;;  %v3307_v40 = vld [vmem:[%s7019_s19 + $0x1f8] sm:$0xff] }
 0x465   : > { %3657 = vmatpush.msrb.mxu3 %v3307_v40 }
 0x466   : > { %v2710_v46 = vmax.f32 %v2623_v11, 0.0  ;;  %4630 = vmatmul.msk.f32.gmra.mxu1 %vm2026_vm4, %v2475_v16 }
 0x468   : > { %4647 = vmatmul.msk.f32.gmra.mxu2 %vm1773_vm3, %v2710_v46 }
 0x469   : > { %v2422_v37 = vpop.f32.mrf.mxu0 }
 0x46a   : > { %v2423_v60 = vadd.f32 %v6028_v2, %v2422_v37 }
 0x46b   : > { %v2625_v54 = vpop.f32.mrf.mxu1 }
 0x46c   : > { %v2476_v44 = vmax.f32 %v2423_v60, 0.0  ;;  %v2626_v28 = vadd.f32 %v6115_v39, %v2625_v54  ;;  %v3304_v54 = vld [vmem:[%s7019_s19 + $0x1e0] sm:$0xff] }
 0x46d   : > { %3318 = vmatpush.msrb.mxu0 %v3304_v54  ;;  %v3289_v54 = vld [vmem:[%s7019_s19 + $0x168] sm:$0xff] }
 0x46e   : > { %v2711_v56 = vmax.f32 %v2626_v28, 0.0  ;;  %4631 = vmatmul.msk.f32.gmra.mxu1 %vm2026_vm4, %v2476_v44  ;;  %v3305_v44 = vld [vmem:[%s7019_s19 + $0x1e8] sm:$0xff] }
 0x46f   : > { %3431 = vmatpush.msrb.mxu1 %v3305_v44 }
 0x470   : > { %4648 = vmatmul.msk.f32.gmra.mxu2 %vm1773_vm3, %v2711_v56 }
 0x471   : > { %v2425_v36 = vpop.f32.mrf.mxu0 }
 0x472   : > { %v2426_v23 = vadd.f32 %v6028_v2, %v2425_v36 }
 0x473   : > { %v2628_v7 = vpop.f32.mrf.mxu1 }
 0x474   : > { %v2477_v18 = vmax.f32 %v2426_v23, 0.0  ;;  %v2629_v38 = vadd.f32 %v6115_v39, %v2628_v7 }
 0x476   : > { %v2712_v27 = vmax.f32 %v2629_v38, 0.0  ;;  %4632 = vmatmul.msk.f32.gmra.mxu1 %vm2026_vm4, %v2477_v18  ;;  %v3302_v18 = vld [vmem:[%s7019_s19 + $0x1d0] sm:$0xff]  ;;  %v3303_v38 = vld [vmem:[%s7019_s19 + $0x1d8] sm:$0xff] }
 0x477   : > { %3545 = vmatpush.msrb.mxu2 %v3302_v18  ;;  %3658 = vmatpush.msrb.mxu3 %v3303_v38  ;;  %v3287_v18 = vld [vmem:[%s7019_s19 + $0x158] sm:$0xff] }
 0x478   : > { %4649 = vmatmul.msk.f32.gmra.mxu2 %vm1773_vm3, %v2712_v27 }
 0x479   : > { %v2428_v55 = vpop.f32.mrf.mxu0 }
 0x47a   : > { %v2429_v15 = vadd.f32 %v6028_v2, %v2428_v55 }
 0x47b   : > { %v2631_v50 = vpop.f32.mrf.mxu1 }
 0x47c   : > { %v2478_v62 = vmax.f32 %v2429_v15, 0.0  ;;  %v2632_v47 = vadd.f32 %v6115_v39, %v2631_v50  ;;  %v3300_v15 = vld [vmem:[%s7019_s19 + $0x1c0] sm:$0xff]  ;;  %v3301_v50 = vld [vmem:[%s7019_s19 + $0x1c8] sm:$0xff] }
 0x47d   : > { %3319 = vmatpush.msrb.mxu0 %v3300_v15  ;;  %3432 = vmatpush.msrb.mxu1 %v3301_v50 }
 0x47e   : > { %v2713_v59 = vmax.f32 %v2632_v47, 0.0  ;;  %4633 = vmatmul.msk.f32.gmra.mxu1 %vm2026_vm4, %v2478_v62  ;;  %v6219_v62 = vld [vmem:[%s7016_s16] ss:$0 sm:$0xff] }
 0x47f   : > { %3320 = vmatpush.msrb.mxu0 %v3296_v57 }
 0x480   : > { %4650 = vmatmul.msk.f32.gmra.mxu2 %vm1773_vm3, %v2713_v59 }
 0x481   : > { %v2431_v21 = vpop.f32.mrf.mxu0 }
 0x482   : > { %v2432_v0 = vadd.f32 %v6028_v2, %v2431_v21 }
 0x483   : > { %v2634_v5 = vpop.f32.mrf.mxu1 }
 0x484   : > { %v2479_v4 = vmax.f32 %v2432_v0, 0.0  ;;  %v2635_v49 = vadd.f32 %v6115_v39, %v2634_v5 }
 0x486   : > { %v2714_v9 = vmax.f32 %v2635_v49, 0.0  ;;  %4634 = vmatmul.msk.f32.gmra.mxu1 %vm2026_vm4, %v2479_v4  ;;  %v3298_v49 = vld [vmem:[%s7019_s19 + $0x1b0] sm:$0xff] }
 0x487   : > { %3546 = vmatpush.msrb.mxu2 %v3298_v49 }
 0x488   : > { %4651 = vmatmul.msk.f32.gmra.mxu2 %vm1773_vm3, %v2714_v9  ;;  %v3299_v9 = vld [vmem:[%s7019_s19 + $0x1b8] sm:$0xff] }
 0x489   : > { %v2434_v10 = vpop.f32.mrf.mxu0  ;;  %3659 = vmatpush.msrb.mxu3 %v3299_v9 }
 0x48a   : > { %v2435_v58 = vadd.f32 %v6028_v2, %v2434_v10 }
 0x48b   : > { %v2637_v3 = vpop.f32.mrf.mxu1 }
 0x48c   : > { %v2480_v14 = vmax.f32 %v2435_v58, 0.0  ;;  %v2638_v53 = vadd.f32 %v6115_v39, %v2637_v3 }
 0x48e   : > { %v2715_v34 = vmax.f32 %v2638_v53, 0.0  ;;  %4635 = vmatmul.msk.f32.gmra.mxu1 %vm2026_vm4, %v2480_v14 }
 0x490   : > { %4652 = vmatmul.msk.f32.gmra.mxu2 %vm1773_vm3, %v2715_v34 }
 0x491   : > { %v2437_v6 = vpop.f32.mrf.mxu0 }
 0x492   : > { %v2438_v12 = vadd.f32 %v6028_v2, %v2437_v6  ;;  %v3297_v6 = vld [vmem:[%s7019_s19 + $0x1a8] sm:$0xff] }
 0x493   : > { %v2640_v17 = vpop.f32.mrf.mxu1  ;;  %3433 = vmatpush.msrb.mxu1 %v3297_v6 }
 0x494   : > { %v2481_v22 = vmax.f32 %v2438_v12, 0.0  ;;  %v2641_v61 = vadd.f32 %v6115_v39, %v2640_v17 }
 0x496   : > { %v2716_v13 = vmax.f32 %v2641_v61, 0.0  ;;  %4636 = vmatmul.msk.f32.gmra.mxu1 %vm2026_vm4, %v2481_v22 }
 0x498   : > { %4653 = vmatmul.msk.f32.gmra.mxu2 %vm1773_vm3, %v2716_v13 }
 0x499   : > { %v2440_v48 = vpop.f32.mrf.mxu0 }
 0x49a   : > { %v2441_v51 = vadd.f32 %v6028_v2, %v2440_v48 }
 0x49b   : > { %v2643_v29 = vpop.f32.mrf.mxu1 }
 0x49c   : > { %v2482_v25 = vmax.f32 %v2441_v51, 0.0  ;;  %v2644_v63 = vadd.f32 %v6115_v39, %v2643_v29  ;;  %v3294_v51 = vld [vmem:[%s7019_s19 + $0x190] sm:$0xff]  ;;  %v3295_v29 = vld [vmem:[%s7019_s19 + $0x198] sm:$0xff] }
 0x49d   : > { %3547 = vmatpush.msrb.mxu2 %v3294_v51  ;;  %3660 = vmatpush.msrb.mxu3 %v3295_v29 }
 0x49e   : > { %v2717_v33 = vmax.f32 %v2644_v63, 0.0  ;;  %4637 = vmatmul.msk.f32.gmra.mxu1 %vm2026_vm4, %v2482_v25 }
 0x49f   : > { %3661 = vmatpush.msrb.mxu3 %v3291_v45  ;;  %v3268_v45 = vld [vmem:[%s7019_s19 + $0xc0] sm:$0xff] }
 0x4a0   : > { %4654 = vmatmul.msk.f32.gmra.mxu2 %vm1773_vm3, %v2717_v33 }
 0x4a1   : > { %v2443_v52 = vpop.f32.mrf.mxu0  ;;  %3662 = vmatpush.msrb.mxu3 %v3287_v18  ;;  %v3258_v18 = vld [vmem:[%s7019_s19 + $0x70] sm:$0xff] }
 0x4a2   : > { %v2444_v30 = vadd.f32 %v6028_v2, %v2443_v52 }
 0x4a3   : > { %v2646_v19 = vpop.f32.mrf.mxu1 }
 0x4a4   : > { %v2483_v32 = vmax.f32 %v2444_v30, 0.0  ;;  %v2647_v41 = vadd.f32 %v6115_v39, %v2646_v19 }
 0x4a6   : > { %v2718_v8 = vmax.f32 %v2647_v41, 0.0  ;;  %4638 = vmatmul.msk.f32.gmra.mxu1 %vm2026_vm4, %v2483_v32  ;;  %v3292_v32 = vld [vmem:[%s7019_s19 + $0x180] sm:$0xff]  ;;  %v3293_v41 = vld [vmem:[%s7019_s19 + $0x188] sm:$0xff] }
 0x4a7   : > { %3321 = vmatpush.msrb.mxu0 %v3292_v32  ;;  %3434 = vmatpush.msrb.mxu1 %v3293_v41 }
 0x4a8   : > { %4655 = vmatmul.msk.f32.gmra.mxu2 %vm1773_vm3, %v2718_v8 }
 0x4a9   : > { %v2446_v24 = vpop.f32.mrf.mxu0  ;;  %3435 = vmatpush.msrb.mxu1 %v3289_v54 }
 0x4aa   : > { %v2447_v35 = vadd.f32 %v6028_v2, %v2446_v24 }
 0x4ab   : > { %v2649_v20 = vpop.f32.mrf.mxu1 }
 0x4ac   : > { %v2484_v43 = vmax.f32 %v2447_v35, 0.0  ;;  %v2650_v42 = vadd.f32 %v6115_v39, %v2649_v20 }
 0x4ae   : > { %v2719_v26 = vmax.f32 %v2650_v42, 0.0  ;;  %4639 = vmatmul.msk.f32.gmra.mxu1 %vm2026_vm4, %v2484_v43 }
 0x4b0   : > { %4656 = vmatmul.msk.f32.gmra.mxu2 %vm1773_vm3, %v2719_v26  ;;  %v3290_v26 = vld [vmem:[%s7019_s19 + $0x170] sm:$0xff] }
 0x4b1   : > { %v2449_v31 = vpop.f32.mrf.mxu0  ;;  %3548 = vmatpush.msrb.mxu2 %v3290_v26 }
 0x4b2   : > { %v2450_v16 = vadd.f32 %v6028_v2, %v2449_v31 }
 0x4b3   : > { %v2652_v11 = vpop.f32.mrf.mxu1 }
 0x4b4   : > { %v2485_v46 = vmax.f32 %v2450_v16, 0.0  ;;  %v2653_v37 = vadd.f32 %v6115_v39, %v2652_v11 }
 0x4b6   : > { %v2720_v60 = vmax.f32 %v2653_v37, 0.0  ;;  %4640 = vmatmul.msk.f32.gmra.mxu1 %vm2026_vm4, %v2485_v46 }
 0x4b8   : > { %4657 = vmatmul.msk.f32.gmra.mxu2 %vm1773_vm3, %v2720_v60  ;;  %v3288_v60 = vld [vmem:[%s7019_s19 + $0x160] sm:$0xff] }
 0x4b9   : > { %v2452_v28 = vpop.f32.mrf.mxu0  ;;  %3322 = vmatpush.msrb.mxu0 %v3288_v60  ;;  %v3266_v60 = vld [vmem:[%s7019_s19 + $0xb0] sm:$0xff] }
 0x4ba   : > { %v2453_v56 = vadd.f32 %v6028_v2, %v2452_v28 }
 0x4bb   : > { %v2655_v1 = vpop.f32.mrf.mxu1 }
 0x4bc   : > { %v2486_v36 = vmax.f32 %v2453_v56, 0.0  ;;  %v2656_v23 = vadd.f32 %v6115_v39, %v2655_v1 }
 0x4be   : > { %v2721_v7 = vmax.f32 %v2656_v23, 0.0  ;;  %4641 = vmatmul.msk.f32.gmra.mxu1 %vm2026_vm4, %v2486_v36 }
 0x4c0   : > { %4658 = vmatmul.msk.f32.gmra.mxu2 %vm1773_vm3, %v2721_v7  ;;  %v3286_v7 = vld [vmem:[%s7019_s19 + $0x150] sm:$0xff] }
 0x4c1   : > { %3549 = vmatpush.msrb.mxu2 %v3286_v7  ;;  %v3257_v7 = vld [vmem:[%s7019_s19 + $0x68] sm:$0xff] }
 0x4c3   : > { %v2658_v2 = vpop.f32.mrf.mxu1 }
 0x4c4   : > { %v2659_v27 = vadd.f32 %v6115_v39, %v2658_v2 }
 0x4c6   : > { %v2722_v55 = vmax.f32 %v2659_v27, 0.0 }
 0x4c8   : > { %4659 = vmatmul.msk.f32.gmra.mxu2 %vm1773_vm3, %v2722_v55 }
 0x4cb   : > { %v2661_v47 = vpop.f32.mrf.mxu1  ;;  %v2863_v59 = vpop.f32.mrf.mxu2 }
 0x4cc   : > { %v2662_v21 = vadd.f32 %v6115_v39, %v2661_v47  ;;  %v2864_v0 = vadd.f32 %v6219_v62, %v2863_v59  ;;  %v3284_v47 = vld [vmem:[%s7019_s19 + $0x140] sm:$0xff]  ;;  %v3285_v59 = vld [vmem:[%s7019_s19 + $0x148] sm:$0xff] }
 0x4cd   : > { %3323 = vmatpush.msrb.mxu0 %v3284_v47  ;;  %3436 = vmatpush.msrb.mxu1 %v3285_v59  ;;  %v3254_v47 = vld [vmem:[%s7019_s19 + $0x50] sm:$0xff]  ;;  %v3248_v59 = vld [vmem:[%s7019_s19 + $0x20] sm:$0xff] }
 0x4ce   : > { %v2723_v5 = vmax.f32 %v2662_v21, 0.0  ;;  %v2959_v4 = vmax.f32 %v2864_v0, 0.0 }
 0x4d0   : > { %4660 = vmatmul.msk.f32.gmra.mxu2 %vm1773_vm3, %v2723_v5  ;;  %4675 = vmatmul.msk.f32.vlgmr.msra.gmra.mxu3 %vm1522_vm2, %v2959_v4 }
 0x4d3   : > { %v2664_v10 = vpop.f32.mrf.mxu1  ;;  %v2866_v58 = vpop.f32.mrf.mxu2 }
 0x4d4   : > { %v2665_v3 = vadd.f32 %v6115_v39, %v2664_v10  ;;  %v2867_v14 = vadd.f32 %v6219_v62, %v2866_v58  ;;  %v3282_v10 = vld [vmem:[%s7019_s19 + $0x130] sm:$0xff]  ;;  %v3283_v58 = vld [vmem:[%s7019_s19 + $0x138] sm:$0xff] }
 0x4d5   : > { %3550 = vmatpush.msrb.mxu2 %v3282_v10  ;;  %3663 = vmatpush.msrb.mxu3 %v3283_v58  ;;  %v3246_v10 = vld [vmem:[%s7019_s19 + $0x10] sm:$0xff] }
 0x4d6   : > { %v2724_v53 = vmax.f32 %v2665_v3, 0.0  ;;  %v2960_v34 = vmax.f32 %v2867_v14, 0.0 }
 0x4d8   : > { %4661 = vmatmul.msk.f32.gmra.mxu2 %vm1773_vm3, %v2724_v53  ;;  %4676 = vmatmul.msk.f32.gmra.mxu3 %vm1522_vm2, %v2960_v34 }
 0x4db   : > { %v2667_v12 = vpop.f32.mrf.mxu1  ;;  %v2869_v17 = vpop.f32.mrf.mxu2 }
 0x4dc   : > { %v2668_v22 = vadd.f32 %v6115_v39, %v2667_v12  ;;  %v2870_v61 = vadd.f32 %v6219_v62, %v2869_v17  ;;  %v3280_v12 = vld [vmem:[%s7019_s19 + $0x120] sm:$0xff]  ;;  %v3281_v17 = vld [vmem:[%s7019_s19 + $0x128] sm:$0xff] }
 0x4dd   : > { %3324 = vmatpush.msrb.mxu0 %v3280_v12  ;;  %3437 = vmatpush.msrb.mxu1 %v3281_v17 }
 0x4de   : > { %v2725_v13 = vmax.f32 %v2668_v22, 0.0  ;;  %v2961_v48 = vmax.f32 %v2870_v61, 0.0 }
 0x4e0   : > { %4662 = vmatmul.msk.f32.gmra.mxu2 %vm1773_vm3, %v2725_v13  ;;  %4677 = vmatmul.msk.f32.gmra.mxu3 %vm1522_vm2, %v2961_v48 }
 0x4e3   : > { %v2670_v25 = vpop.f32.mrf.mxu1  ;;  %v2872_v63 = vpop.f32.mrf.mxu2 }
 0x4e4   : > { %v2671_v33 = vadd.f32 %v6115_v39, %v2670_v25  ;;  %v2873_v52 = vadd.f32 %v6219_v62, %v2872_v63  ;;  %v3278_v25 = vld [vmem:[%s7019_s19 + $0x110] sm:$0xff]  ;;  %v3279_v63 = vld [vmem:[%s7019_s19 + $0x118] sm:$0xff] }
 0x4e5   : > { %3551 = vmatpush.msrb.mxu2 %v3278_v25  ;;  %3664 = vmatpush.msrb.mxu3 %v3279_v63 }
 0x4e6   : > { %v2726_v30 = vmax.f32 %v2671_v33, 0.0  ;;  %v2962_v19 = vmax.f32 %v2873_v52, 0.0 }
 0x4e8   : > { %4663 = vmatmul.msk.f32.gmra.mxu2 %vm1773_vm3, %v2726_v30  ;;  %4678 = vmatmul.msk.f32.gmra.mxu3 %vm1522_vm2, %v2962_v19 }
 0x4eb   : > { %v2673_v8 = vpop.f32.mrf.mxu1  ;;  %v2875_v24 = vpop.f32.mrf.mxu2 }
 0x4ec   : > { %v2674_v35 = vadd.f32 %v6115_v39, %v2673_v8  ;;  %v2876_v20 = vadd.f32 %v6219_v62, %v2875_v24  ;;  %v3276_v8 = vld [vmem:[%s7019_s19 + $0x100] sm:$0xff]  ;;  %v3277_v24 = vld [vmem:[%s7019_s19 + $0x108] sm:$0xff] }
 0x4ed   : > { %3325 = vmatpush.msrb.mxu0 %v3276_v8  ;;  %3438 = vmatpush.msrb.mxu1 %v3277_v24 }
 0x4ee   : > { %v2727_v43 = vmax.f32 %v2674_v35, 0.0  ;;  %v2963_v42 = vmax.f32 %v2876_v20, 0.0  ;;  %v3272_v35 = vld [vmem:[%s7019_s19 + $0xe0] sm:$0xff]  ;;  %v3273_v20 = vld [vmem:[%s7019_s19 + $0xe8] sm:$0xff] }
 0x4ef   : > { %3326 = vmatpush.msrb.mxu0 %v3272_v35  ;;  %3439 = vmatpush.msrb.mxu1 %v3273_v20  ;;  %v3263_v20 = vld [vmem:[%s7019_s19 + $0x98] sm:$0xff] }
 0x4f0   : > { %4664 = vmatmul.msk.f32.gmra.mxu2 %vm1773_vm3, %v2727_v43  ;;  %4679 = vmatmul.msk.f32.gmra.mxu3 %vm1522_vm2, %v2963_v42  ;;  %v3274_v43 = vld [vmem:[%s7019_s19 + $0xf0] sm:$0xff] }
 0x4f1   : > { %3552 = vmatpush.msrb.mxu2 %v3274_v43  ;;  %3327 = vmatpush.msrb.mxu0 %v3268_v45 }
 0x4f3   : > { %v2676_v40 = vpop.f32.mrf.mxu1  ;;  %v2878_v31 = vpop.f32.mrf.mxu2 }
 0x4f4   : > { %v2677_v16 = vadd.f32 %v6115_v39, %v2676_v40  ;;  %v2879_v11 = vadd.f32 %v6219_v62, %v2878_v31  ;;  %v3269_v40 = vld [vmem:[%s7019_s19 + $0xc8] sm:$0xff]  ;;  %v3270_v31 = vld [vmem:[%s7019_s19 + $0xd0] sm:$0xff] }
 0x4f5   : > { %3440 = vmatpush.msrb.mxu1 %v3269_v40  ;;  %3553 = vmatpush.msrb.mxu2 %v3270_v31 }
 0x4f6   : > { %v2728_v46 = vmax.f32 %v2677_v16, 0.0  ;;  %v2964_v37 = vmax.f32 %v2879_v11, 0.0 }
 0x4f7   : > { %3554 = vmatpush.msrb.mxu2 %v3266_v60 }
 0x4f8   : > { %4665 = vmatmul.msk.f32.gmra.mxu2 %vm1773_vm3, %v2728_v46  ;;  %4680 = vmatmul.msk.f32.gmra.mxu3 %vm1522_vm2, %v2964_v37  ;;  %v3264_v46 = vld [vmem:[%s7019_s19 + $0xa0] sm:$0xff]  ;;  %v3265_v37 = vld [vmem:[%s7019_s19 + $0xa8] sm:$0xff] }
 0x4f9   : > { %3328 = vmatpush.msrb.mxu0 %v3264_v46  ;;  %3441 = vmatpush.msrb.mxu1 %v3265_v37 }
 0x4fb   : > { %v2679_v44 = vpop.f32.mrf.mxu1  ;;  %v2881_v28 = vpop.f32.mrf.mxu2 }
 0x4fc   : > { %v2680_v56 = vadd.f32 %v6115_v39, %v2679_v44  ;;  %v2882_v1 = vadd.f32 %v6219_v62, %v2881_v28  ;;  %v3260_v28 = vld [vmem:[%s7019_s19 + $0x80] sm:$0xff] }
 0x4fd   : > { %3329 = vmatpush.msrb.mxu0 %v3260_v28 }
 0x4fe   : > { %v2729_v36 = vmax.f32 %v2680_v56, 0.0  ;;  %v2965_v23 = vmax.f32 %v2882_v1, 0.0  ;;  %v3261_v56 = vld [vmem:[%s7019_s19 + $0x88] sm:$0xff]  ;;  %v3262_v1 = vld [vmem:[%s7019_s19 + $0x90] sm:$0xff] }
 0x4ff   : > { %3442 = vmatpush.msrb.mxu1 %v3261_v56  ;;  %3555 = vmatpush.msrb.mxu2 %v3262_v1 }
 0x500   : > { %4666 = vmatmul.msk.f32.gmra.mxu2 %vm1773_vm3, %v2729_v36  ;;  %4681 = vmatmul.msk.f32.gmra.mxu3 %vm1522_vm2, %v2965_v23  ;;  %v3275_v36 = vld [vmem:[%s7019_s19 + $0xf8] sm:$0xff]  ;;  %v3256_v23 = vld [vmem:[%s7019_s19 + $0x60] sm:$0xff] }
 0x501   : > { %3665 = vmatpush.msrb.mxu3 %v3275_v36  ;;  %3330 = vmatpush.msrb.mxu0 %v3256_v23 }
 0x502   : > { %3443 = vmatpush.msrb.mxu1 %v3257_v7  ;;  %3556 = vmatpush.msrb.mxu2 %v3258_v18 }
 0x503   : > { %v2682_v38 = vpop.f32.mrf.mxu1  ;;  %v2884_v2 = vpop.f32.mrf.mxu2 }
 0x504   : > { %v2683_v27 = vadd.f32 %v6115_v39, %v2682_v38  ;;  %v2885_v55 = vadd.f32 %v6219_v62, %v2884_v2  ;;  %3557 = vmatpush.msrb.mxu2 %v3254_v47 }
 0x506   : > { %v2730_v15 = vmax.f32 %v2683_v27, 0.0  ;;  %v2966_v50 = vmax.f32 %v2885_v55, 0.0  ;;  %v3252_v27 = vld [vmem:[%s7019_s19 + $0x40] sm:$0xff]  ;;  %v3253_v55 = vld [vmem:[%s7019_s19 + $0x48] sm:$0xff] }
 0x507   : > { %3331 = vmatpush.msrb.mxu0 %v3252_v27  ;;  %3444 = vmatpush.msrb.mxu1 %v3253_v55 }
 0x508   : > { %4667 = vmatmul.msk.f32.gmra.mxu2 %vm1773_vm3, %v2730_v15  ;;  %4682 = vmatmul.msk.f32.gmra.mxu3 %vm1522_vm2, %v2966_v50 }
 0x509   : > { %3332 = vmatpush.msrb.mxu0 %v3248_v59 }
 0x50b   : > { %v2685_v21 = vpop.f32.mrf.mxu1  ;;  %v2887_v0 = vpop.f32.mrf.mxu2 }
 0x50c   : > { %v2686_v5 = vadd.f32 %v6115_v39, %v2685_v21  ;;  %v2888_v4 = vadd.f32 %v6219_v62, %v2887_v0  ;;  %v3249_v21 = vld [vmem:[%s7019_s19 + $0x28] sm:$0xff] }
 0x50d   : > { %3445 = vmatpush.msrb.mxu1 %v3249_v21 }
 0x50e   : > { %v2731_v49 = vmax.f32 %v2686_v5, 0.0  ;;  %v2967_v9 = vmax.f32 %v2888_v4, 0.0  ;;  %v3250_v4 = vld [vmem:[%s7019_s19 + $0x30] sm:$0xff] }
 0x50f   : > { %3558 = vmatpush.msrb.mxu2 %v3250_v4 }
 0x510   : > { %4668 = vmatmul.msk.f32.gmra.mxu2 %vm1773_vm3, %v2731_v49  ;;  %4683 = vmatmul.msk.f32.gmra.mxu3 %vm1522_vm2, %v2967_v9  ;;  %v3244_v49 = vld [vmem:[%s7019_s19] sm:$0xff]  ;;  %v3245_v9 = vld [vmem:[%s7019_s19 + $0x8] sm:$0xff] }
 0x511   : > { %3333 = vmatpush.msrb.mxu0 %v3244_v49  ;;  %3446 = vmatpush.msrb.mxu1 %v3245_v9 }
 0x512   : > { %3559 = vmatpush.msrb.mxu2 %v3246_v10 }
 0x513   : > { %v2688_v3 = vpop.f32.mrf.mxu1  ;;  %v2890_v14 = vpop.f32.mrf.mxu2 }
 0x514   : > { %v2689_v53 = vadd.f32 %v6115_v39, %v2688_v3  ;;  %v2891_v34 = vadd.f32 %v6219_v62, %v2890_v14 }
 0x516   : > { %v2732_v57 = vmax.f32 %v2689_v53, 0.0  ;;  %v2968_v6 = vmax.f32 %v2891_v34, 0.0 }
 0x518   : > { %4669 = vmatmul.msk.f32.gmra.mxu2 %vm1773_vm3, %v2732_v57  ;;  %4684 = vmatmul.msk.f32.gmra.mxu3 %vm1522_vm2, %v2968_v6  ;;  %v3271_v6 = vld [vmem:[%s7019_s19 + $0xd8] sm:$0xff] }
 0x519   : > { %3666 = vmatpush.msrb.mxu3 %v3271_v6 }
 0x51b   : > { %v2691_v22 = vpop.f32.mrf.mxu1  ;;  %v2893_v61 = vpop.f32.mrf.mxu2 }
 0x51c   : > { %v2692_v13 = vadd.f32 %v6115_v39, %v2691_v22  ;;  %v2894_v48 = vadd.f32 %v6219_v62, %v2893_v61 }
 0x51e   : > { %v2733_v51 = vmax.f32 %v2692_v13, 0.0  ;;  %v2969_v29 = vmax.f32 %v2894_v48, 0.0  ;;  %v6438_v48 = vld [vmem:[%s7018_s18] ss:$0 sm:$0xff] }
 0x520   : > { %4670 = vmatmul.msk.f32.gmra.mxu2 %vm1773_vm3, %v2733_v51  ;;  %4685 = vmatmul.msk.f32.gmra.mxu3 %vm1522_vm2, %v2969_v29  ;;  %v3267_v51 = vld [vmem:[%s7019_s19 + $0xb8] sm:$0xff] }
 0x521   : > { %3667 = vmatpush.msrb.mxu3 %v3267_v51 }
 0x523   : > { %v2694_v33 = vpop.f32.mrf.mxu1  ;;  %v2896_v52 = vpop.f32.mrf.mxu2  ;;  %3668 = vmatpush.msrb.mxu3 %v3263_v20 }
 0x524   : > { %v2695_v30 = vadd.f32 %v6115_v39, %v2694_v33  ;;  %v2897_v19 = vadd.f32 %v6219_v62, %v2896_v52 }
 0x526   : > { %v2734_v32 = vmax.f32 %v2695_v30, 0.0  ;;  %v2970_v41 = vmax.f32 %v2897_v19, 0.0 }
 0x528   : > { %4671 = vmatmul.msk.f32.gmra.mxu2 %vm1773_vm3, %v2734_v32  ;;  %4686 = vmatmul.msk.f32.gmra.mxu3 %vm1522_vm2, %v2970_v41 }
 0x52b   : > { %v2697_v42 = vpop.f32.mrf.mxu1  ;;  %v2899_v26 = vpop.f32.mrf.mxu2 }
 0x52c   : > { %v2698_v16 = vadd.f32 %v6115_v39, %v2697_v42  ;;  %v2900_v11 = vadd.f32 %v6219_v62, %v2899_v26 }
 0x52e   : > { %v2735_v54 = vmax.f32 %v2698_v16, 0.0  ;;  %v2971_v44 = vmax.f32 %v2900_v11, 0.0 }
 0x530   : > { %4672 = vmatmul.msk.f32.gmra.mxu2 %vm1773_vm3, %v2735_v54  ;;  %4687 = vmatmul.msk.f32.gmra.mxu3 %vm1522_vm2, %v2971_v44  ;;  %v3259_v44 = vld [vmem:[%s7019_s19 + $0x78] sm:$0xff] }
 0x531   : > { %3669 = vmatpush.msrb.mxu3 %v3259_v44 }
 0x533   : > { %v2700_v38 = vpop.f32.mrf.mxu1  ;;  %v2902_v2 = vpop.f32.mrf.mxu2 }
 0x534   : > { %v2701_v15 = vadd.f32 %v6115_v39, %v2700_v38  ;;  %v2903_v50 = vadd.f32 %v6219_v62, %v2902_v2 }
 0x536   : > { %v2736_v0 = vmax.f32 %v2701_v15, 0.0  ;;  %v2972_v5 = vmax.f32 %v2903_v50, 0.0  ;;  %v3255_v50 = vld [vmem:[%s7019_s19 + $0x58] sm:$0xff] }
 0x537   : > { %3670 = vmatpush.msrb.mxu3 %v3255_v50 }
 0x538   : > { %4673 = vmatmul.msk.f32.gmra.mxu2 %vm1773_vm3, %v2736_v0  ;;  %4688 = vmatmul.msk.f32.gmra.mxu3 %vm1522_vm2, %v2972_v5 }
 0x53b   : > { %v2703_v58 = vpop.f32.mrf.mxu1  ;;  %v2905_v3 = vpop.f32.mrf.mxu2 }
 0x53c   : > { %v2704_v14 = vadd.f32 %v6115_v39, %v2703_v58  ;;  %v2906_v53 = vadd.f32 %v6219_v62, %v2905_v3 }
 0x53e   : > { %v2737_v34 = vmax.f32 %v2704_v14, 0.0  ;;  %v2973_v57 = vmax.f32 %v2906_v53, 0.0  ;;  %v3251_v53 = vld [vmem:[%s7019_s19 + $0x38] sm:$0xff] }
 0x53f   : > { %3671 = vmatpush.msrb.mxu3 %v3251_v53 }
 0x540   : > { %4674 = vmatmul.msk.f32.gmra.mxu2 %vm1773_vm3, %v2737_v34  ;;  %4689 = vmatmul.msk.f32.gmra.mxu3 %vm1522_vm2, %v2973_v57 }
 0x543   : > { %v2908_v12 = vpop.f32.mrf.mxu2 }
 0x544   : > { %v2909_v17 = vadd.f32 %v6219_v62, %v2908_v12 }
 0x546   : > { %v2974_v22 = vmax.f32 %v2909_v17, 0.0 }
 0x548   : > { %4690 = vmatmul.msk.f32.gmra.mxu3 %vm1522_vm2, %v2974_v22 }
 0x54b   : > { %v2911_v39 = vpop.f32.mrf.mxu2 }
 0x54c   : > { %v2912_v61 = vadd.f32 %v6219_v62, %v2911_v39 }
 0x54e   : > { %v2975_v13 = vmax.f32 %v2912_v61, 0.0 }
 0x550   : > { %4691 = vmatmul.msk.f32.gmra.mxu3 %vm1522_vm2, %v2975_v13 }
 0x553   : > { %v2914_v29 = vpop.f32.mrf.mxu2  ;;  %v3116_v25 = vpop.f32.mrf.mxu3 }
 0x554   : > { %v2915_v63 = vadd.f32 %v6219_v62, %v2914_v29  ;;  %v3117_v33 = vadd.f32 %v6438_v48, %v3116_v25 }
 0x556   : > { %v2976_v52 = vmax.f32 %v2915_v63, 0.0  ;;  %v6445_v30 = vmax.f32 %v3117_v33, 0.0  ;;  %v3247_v63 = vld [vmem:[%s7019_s19 + $0x18] sm:$0xff] }
 0x557   : > { %3672 = vmatpush.msrb.mxu3 %v3247_v63 }
 0x558   : > { %4692 = vmatmul.msk.f32.gmra.mxu3 %vm1522_vm2, %v2976_v52  ;;  %3334 = vmatmul.f32.vlgmr.msrb.gmra.mxu0 %v6445_v30 }
 0x559   : > { %3447 = vmatmul.f32.vlgmr.msrb.gmra.mxu1 %v6445_v30  ;;  %3560 = vmatmul.f32.vlgmr.msrb.gmra.mxu2 %v6445_v30 }
 0x55b   : > { %v2917_v19 = vpop.f32.mrf.mxu2  ;;  %v3119_v32 = vpop.f32.mrf.mxu3 }
 0x55c   : > { %v2918_v41 = vadd.f32 %v6219_v62, %v2917_v19  ;;  %v3120_v8 = vadd.f32 %v6438_v48, %v3119_v32 }
 0x55e   : > { %v2977_v24 = vmax.f32 %v2918_v41, 0.0  ;;  %v6453_v35 = vmax.f32 %v3120_v8, 0.0 }
 0x560   : > { %4693 = vmatmul.msk.f32.gmra.mxu3 %vm1522_vm2, %v2977_v24  ;;  %3337 = vmatmul.f32.gmra.mxu0 %v6453_v35 }
 0x561   : > { %3450 = vmatmul.f32.gmra.mxu1 %v6453_v35  ;;  %3563 = vmatmul.f32.gmra.mxu2 %v6453_v35 }
 0x563   : > { %v2920_v43 = vpop.f32.mrf.mxu2  ;;  %v3122_v42 = vpop.f32.mrf.mxu3 }
 0x564   : > { %v2921_v26 = vadd.f32 %v6219_v62, %v2920_v43  ;;  %v3123_v45 = vadd.f32 %v6438_v48, %v3122_v42 }
 0x566   : > { %v2978_v40 = vmax.f32 %v2921_v26, 0.0  ;;  %v6464_v31 = vmax.f32 %v3123_v45, 0.0 }
 0x568   : > { %4694 = vmatmul.msk.f32.gmra.mxu3 %vm1522_vm2, %v2978_v40  ;;  %3340 = vmatmul.f32.gmra.mxu0 %v6464_v31 }
 0x569   : > { %3453 = vmatmul.f32.gmra.mxu1 %v6464_v31  ;;  %3566 = vmatmul.f32.gmra.mxu2 %v6464_v31 }
 0x56b   : > { %v2923_v16 = vpop.f32.mrf.mxu2  ;;  %v3125_v11 = vpop.f32.mrf.mxu3 }
 0x56c   : > { %v2924_v46 = vadd.f32 %v6219_v62, %v2923_v16  ;;  %v3126_v37 = vadd.f32 %v6438_v48, %v3125_v11 }
 0x56e   : > { %v2979_v60 = vmax.f32 %v2924_v46, 0.0  ;;  %v6472_v54 = vmax.f32 %v3126_v37, 0.0 }
 0x570   : > { %4695 = vmatmul.msk.f32.gmra.mxu3 %vm1522_vm2, %v2979_v60  ;;  %3343 = vmatmul.f32.gmra.mxu0 %v6472_v54 }
 0x571   : > { %3456 = vmatmul.f32.gmra.mxu1 %v6472_v54  ;;  %3569 = vmatmul.f32.gmra.mxu2 %v6472_v54 }
 0x573   : > { %v2926_v28 = vpop.f32.mrf.mxu2  ;;  %v3128_v56 = vpop.f32.mrf.mxu3 }
 0x574   : > { %v2927_v1 = vadd.f32 %v6219_v62, %v2926_v28  ;;  %v3129_v36 = vadd.f32 %v6438_v48, %v3128_v56 }
 0x576   : > { %v2980_v23 = vmax.f32 %v2927_v1, 0.0  ;;  %v6483_v7 = vmax.f32 %v3129_v36, 0.0 }
 0x578   : > { %4696 = vmatmul.msk.f32.gmra.mxu3 %vm1522_vm2, %v2980_v23  ;;  %3346 = vmatmul.f32.gmra.mxu0 %v6483_v7 }
 0x579   : > { %3459 = vmatmul.f32.gmra.mxu1 %v6483_v7  ;;  %3572 = vmatmul.f32.gmra.mxu2 %v6483_v7 }
 0x57b   : > { %v2929_v18 = vpop.f32.mrf.mxu2  ;;  %v3131_v38 = vpop.f32.mrf.mxu3 }
 0x57c   : > { %v2930_v2 = vadd.f32 %v6219_v62, %v2929_v18  ;;  %v3132_v27 = vadd.f32 %v6438_v48, %v3131_v38 }
 0x57e   : > { %v2981_v55 = vmax.f32 %v2930_v2, 0.0  ;;  %v6491_v15 = vmax.f32 %v3132_v27, 0.0 }
 0x580   : > { %4697 = vmatmul.msk.f32.gmra.mxu3 %vm1522_vm2, %v2981_v55  ;;  %3349 = vmatmul.f32.gmra.mxu0 %v6491_v15 }
 0x581   : > { %3462 = vmatmul.f32.gmra.mxu1 %v6491_v15  ;;  %3575 = vmatmul.f32.gmra.mxu2 %v6491_v15 }
 0x583   : > { %v2932_v47 = vpop.f32.mrf.mxu2  ;;  %v3134_v59 = vpop.f32.mrf.mxu3 }
 0x584   : > { %v2933_v21 = vadd.f32 %v6219_v62, %v2932_v47  ;;  %v3135_v0 = vadd.f32 %v6438_v48, %v3134_v59 }
 0x586   : > { %v2982_v5 = vmax.f32 %v2933_v21, 0.0  ;;  %v6502_v4 = vmax.f32 %v3135_v0, 0.0 }
 0x588   : > { %4698 = vmatmul.msk.f32.gmra.mxu3 %vm1522_vm2, %v2982_v5  ;;  %3352 = vmatmul.f32.gmra.mxu0 %v6502_v4 }
 0x589   : > { %3465 = vmatmul.f32.gmra.mxu1 %v6502_v4  ;;  %3578 = vmatmul.f32.gmra.mxu2 %v6502_v4 }
 0x58b   : > { %v2935_v49 = vpop.f32.mrf.mxu2  ;;  %v3137_v9 = vpop.f32.mrf.mxu3 }
 0x58c   : > { %v2936_v10 = vadd.f32 %v6219_v62, %v2935_v49  ;;  %v3138_v58 = vadd.f32 %v6438_v48, %v3137_v9 }
 0x58e   : > { %v2983_v3 = vmax.f32 %v2936_v10, 0.0  ;;  %v6510_v14 = vmax.f32 %v3138_v58, 0.0 }
 0x590   : > { %4699 = vmatmul.msk.f32.gmra.mxu3 %vm1522_vm2, %v2983_v3  ;;  %3355 = vmatmul.f32.gmra.mxu0 %v6510_v14 }
 0x591   : > { %3468 = vmatmul.f32.gmra.mxu1 %v6510_v14  ;;  %3581 = vmatmul.f32.gmra.mxu2 %v6510_v14 }
 0x593   : > { %v2938_v34 = vpop.f32.mrf.mxu2  ;;  %v3140_v57 = vpop.f32.mrf.mxu3 }
 0x594   : > { %v2939_v6 = vadd.f32 %v6219_v62, %v2938_v34  ;;  %v3141_v12 = vadd.f32 %v6438_v48, %v3140_v57 }
 0x596   : > { %v2984_v17 = vmax.f32 %v2939_v6, 0.0  ;;  %v6521_v22 = vmax.f32 %v3141_v12, 0.0 }
 0x598   : > { %4700 = vmatmul.msk.f32.gmra.mxu3 %vm1522_vm2, %v2984_v17  ;;  %3358 = vmatmul.f32.gmra.mxu0 %v6521_v22 }
 0x599   : > { %3471 = vmatmul.f32.gmra.mxu1 %v6521_v22  ;;  %3584 = vmatmul.f32.gmra.mxu2 %v6521_v22 }
 0x59b   : > { %v2941_v39 = vpop.f32.mrf.mxu2  ;;  %v3143_v61 = vpop.f32.mrf.mxu3 }
 0x59c   : > { %v2942_v13 = vadd.f32 %v6219_v62, %v2941_v39  ;;  %v3144_v51 = vadd.f32 %v6438_v48, %v3143_v61 }
 0x59e   : > { %v2985_v29 = vmax.f32 %v2942_v13, 0.0  ;;  %v6529_v25 = vmax.f32 %v3144_v51, 0.0 }
 0x5a0   : > { %4701 = vmatmul.msk.f32.gmra.mxu3 %vm1522_vm2, %v2985_v29  ;;  %3361 = vmatmul.f32.gmra.mxu0 %v6529_v25 }
 0x5a1   : > { %3474 = vmatmul.f32.gmra.mxu1 %v6529_v25  ;;  %3587 = vmatmul.f32.gmra.mxu2 %v6529_v25 }
 0x5a3   : > { %v2944_v33 = vpop.f32.mrf.mxu2  ;;  %v3146_v52 = vpop.f32.mrf.mxu3 }
 0x5a4   : > { %v2945_v19 = vadd.f32 %v6219_v62, %v2944_v33  ;;  %v3147_v32 = vadd.f32 %v6438_v48, %v3146_v52 }
 0x5a6   : > { %v2986_v41 = vmax.f32 %v2945_v19, 0.0  ;;  %v6540_v8 = vmax.f32 %v3147_v32, 0.0 }
 0x5a8   : > { %4702 = vmatmul.msk.f32.gmra.mxu3 %vm1522_vm2, %v2986_v41  ;;  %3364 = vmatmul.f32.gmra.mxu0 %v6540_v8 }
 0x5a9   : > { %3477 = vmatmul.f32.gmra.mxu1 %v6540_v8  ;;  %3590 = vmatmul.f32.gmra.mxu2 %v6540_v8 }
 0x5ab   : > { %v2947_v24 = vpop.f32.mrf.mxu2  ;;  %v3149_v20 = vpop.f32.mrf.mxu3 }
 0x5ac   : > { %v2948_v43 = vadd.f32 %v6219_v62, %v2947_v24  ;;  %v3150_v42 = vadd.f32 %v6438_v48, %v3149_v20 }
 0x5ae   : > { %v2987_v26 = vmax.f32 %v2948_v43, 0.0  ;;  %v6548_v45 = vmax.f32 %v3150_v42, 0.0 }
 0x5b0   : > { %4703 = vmatmul.msk.f32.gmra.mxu3 %vm1522_vm2, %v2987_v26  ;;  %3367 = vmatmul.f32.gmra.mxu0 %v6548_v45 }
 0x5b1   : > { %3480 = vmatmul.f32.gmra.mxu1 %v6548_v45  ;;  %3593 = vmatmul.f32.gmra.mxu2 %v6548_v45 }
 0x5b3   : > { %v2950_v40 = vpop.f32.mrf.mxu2  ;;  %v3152_v16 = vpop.f32.mrf.mxu3 }
 0x5b4   : > { %v2951_v11 = vadd.f32 %v6219_v62, %v2950_v40  ;;  %v3153_v46 = vadd.f32 %v6438_v48, %v3152_v16 }
 0x5b6   : > { %v2988_v37 = vmax.f32 %v2951_v11, 0.0  ;;  %v6556_v60 = vmax.f32 %v3153_v46, 0.0 }
 0x5b8   : > { %4704 = vmatmul.msk.f32.gmra.mxu3 %vm1522_vm2, %v2988_v37  ;;  %3370 = vmatmul.f32.gmra.mxu0 %v6556_v60 }
 0x5b9   : > { %3483 = vmatmul.f32.gmra.mxu1 %v6556_v60  ;;  %3596 = vmatmul.f32.gmra.mxu2 %v6556_v60 }
 0x5bb   : > { %v2953_v44 = vpop.f32.mrf.mxu2  ;;  %v3155_v28 = vpop.f32.mrf.mxu3 }
 0x5bc   : > { %v2954_v56 = vadd.f32 %v6219_v62, %v2953_v44  ;;  %v3156_v1 = vadd.f32 %v6438_v48, %v3155_v28 }
 0x5be   : > { %v2989_v36 = vmax.f32 %v2954_v56, 0.0  ;;  %v6564_v23 = vmax.f32 %v3156_v1, 0.0 }
 0x5c0   : > { %4705 = vmatmul.msk.f32.gmra.mxu3 %vm1522_vm2, %v2989_v36  ;;  %3373 = vmatmul.f32.gmra.mxu0 %v6564_v23 }
 0x5c1   : > { %3486 = vmatmul.f32.gmra.mxu1 %v6564_v23  ;;  %3599 = vmatmul.f32.gmra.mxu2 %v6564_v23 }
 0x5c3   : > { %v2956_v18 = vpop.f32.mrf.mxu2  ;;  %v3158_v38 = vpop.f32.mrf.mxu3 }
 0x5c4   : > { %v2957_v2 = vadd.f32 %v6219_v62, %v2956_v18  ;;  %v3159_v27 = vadd.f32 %v6438_v48, %v3158_v38  ;;  %v6584_v62 = vld [vmem:[%s7020_s20] sm:$0xf] }
 0x5c5   : > { %v6591_v0 = vperm.slane %v6584_v62, 0  ;;  %v6594_v49 = vperm.slane %v6584_v62, 1  ;;  %v6606_v6 = vperm.slane %v6584_v62, 2 }
 0x5c6   : > { %v2990_v55 = vmax.f32 %v2957_v2, 0.0  ;;  %v6572_v50 = vmax.f32 %v3159_v27, 0.0 }
 0x5c8   : > { %4706 = vmatmul.msk.f32.gmra.mxu3 %vm1522_vm2, %v2990_v55  ;;  %3376 = vmatmul.f32.gmra.mxu0 %v6572_v50 }
 0x5c9   : > { %3489 = vmatmul.f32.gmra.mxu1 %v6572_v50  ;;  %3602 = vmatmul.f32.gmra.mxu2 %v6572_v50 }
 0x5cb   : > { %v3161_v47 = vpop.f32.mrf.mxu3 }
 0x5cc   : > { %v3162_v59 = vadd.f32 %v6438_v48, %v3161_v47 }
 0x5ce   : > { %v6579_v21 = vmax.f32 %v3162_v59, 0.0 }
 0x5d0   : > { %3379 = vmatmul.f32.gmra.mxu0 %v6579_v21  ;;  %3673 = vmatmul.f32.vlgmr.msrb.gmra.mxu3 %v6445_v30 }
 0x5d1   : > { %3492 = vmatmul.f32.gmra.mxu1 %v6579_v21  ;;  %3605 = vmatmul.f32.gmra.mxu2 %v6579_v21 }
 0x5d3   : > { %v3164_v5 = vpop.f32.mrf.mxu3 }
 0x5d4   : > { %v3165_v9 = vadd.f32 %v6438_v48, %v3164_v5 }
 0x5d5   : > { %v3335_v10 = vpop.f32.mrf.mxu0 }
 0x5d6   : > { %v6597_v58 = vmax.f32 %v3165_v9, 0.0  ;;  %v3336_v3 = vadd.f32 %v3335_v10, %v6591_v0  ;;  %v3448_v53 = vpop.f32.mrf.mxu1 }
 0x5d7   : > { %v3449_v30 = vadd.f32 %v3448_v53, %v6594_v49 }
 0x5d8   : > { %v3770_v34 = vmul.f32 0.5, %v3336_v3  ;;  %3382 = vmatmul.f32.gmra.mxu0 %v6597_v58  ;;  %3676 = vmatmul.f32.gmra.mxu3 %v6453_v35 }
 0x5d9   : > { %v3771_v57 = vmul.f32 0.5, %v3449_v30  ;;  %3495 = vmatmul.f32.gmra.mxu1 %v6597_v58  ;;  %3608 = vmatmul.f32.gmra.mxu2 %v6597_v58 }
 0x5da   : > { %4728 = vtanh.f32 %v3770_v34 }
 0x5db   : > { %4730 = vtanh.f32 %v3771_v57  ;;  %v3167_v12 = vpop.f32.mrf.mxu3 }
 0x5dc   : > { %v3168_v17 = vadd.f32 %v6438_v48, %v3167_v12  ;;  %v3561_v39 = vpop.f32.mrf.mxu2 }
 0x5dd   : > { %v3562_v61 = vadd.f32 %v3561_v39, %v6606_v6  ;;  %v3338_v13 = vpop.f32.mrf.mxu0 }
 0x5de   : > { %v6610_v51 = vmax.f32 %v3168_v17, 0.0  ;;  %v3339_v35 = vadd.f32 %v3338_v13, %v6591_v0  ;;  %v3451_v29 = vpop.f32.mrf.mxu1 }
 0x5df   : > { %v3772_v63 = vmul.f32 0.5, %v3562_v61  ;;  %v3452_v33 = vadd.f32 %v3451_v29, %v6594_v49 }
 0x5e0   : > { %v4729_v52 = vpop.eup %4728  ;;  %v3774_v19 = vmul.f32 0.5, %v3339_v35  ;;  %3385 = vmatmul.f32.gmra.mxu0 %v6610_v51  ;;  %3679 = vmatmul.f32.gmra.mxu3 %v6464_v31 }
 0x5e1   : > { %v4731_v32 = vpop.eup %4730  ;;  %v4026_v41 = vmul.f32 0.5, %v4729_v52  ;;  %4732 = vtanh.f32 %v3772_v63  ;;  %v3775_v24 = vmul.f32 0.5, %v3452_v33  ;;  %3498 = vmatmul.f32.gmra.mxu1 %v6610_v51  ;;  %3611 = vmatmul.f32.gmra.mxu2 %v6610_v51 }
 0x5e2   : > { %v4027_v20 = vmul.f32 0.5, %v4731_v32  ;;  %4734 = vtanh.f32 %v3774_v19 }
 0x5e3   : > { %v4154_v43 = vadd.f32 0.5, %v4026_v41  ;;  %4736 = vtanh.f32 %v3775_v24  ;;  %v3170_v31 = vpop.f32.mrf.mxu3 }
 0x5e4   : > { %v4155_v42 = vadd.f32 0.5, %v4027_v20  ;;  %v3171_v26 = vadd.f32 %v6438_v48, %v3170_v31  ;;  %v3564_v40 = vpop.f32.mrf.mxu2 }
 0x5e5   : > { %4282 = vst [vmem:[%s6623_s22] sm:$0xff] %v4154_v43  ;;  %v3565_v16 = vadd.f32 %v3564_v40, %v6606_v6  ;;  %v3341_v11 = vpop.f32.mrf.mxu0 }
 0x5e6   : > { %4283 = vst [vmem:[%s6623_s22 + $0x8] sm:$0xff] %v4155_v42  ;;  %v6629_v46 = vmax.f32 %v3171_v26, 0.0  ;;  %v3342_v37 = vadd.f32 %v3341_v11, %v6591_v0  ;;  %v3454_v44 = vpop.f32.mrf.mxu1 }
 0x5e7   : > { %v4733_v28 = vpop.eup %4732  ;;  %v3776_v56 = vmul.f32 0.5, %v3565_v16  ;;  %v3455_v1 = vadd.f32 %v3454_v44, %v6594_v49 }
 0x5e8   : > { %v4735_v36 = vpop.eup %4734  ;;  %v4028_v18 = vmul.f32 0.5, %v4733_v28  ;;  %v3778_v38 = vmul.f32 0.5, %v3342_v37  ;;  %3388 = vmatmul.f32.gmra.mxu0 %v6629_v46  ;;  %3682 = vmatmul.f32.gmra.mxu3 %v6472_v54 }
 0x5e9   : > { %v4737_v2 = vpop.eup %4736  ;;  %v4030_v27 = vmul.f32 0.5, %v4735_v36  ;;  %4738 = vtanh.f32 %v3776_v56  ;;  %v3779_v55 = vmul.f32 0.5, %v3455_v1  ;;  %3501 = vmatmul.f32.gmra.mxu1 %v6629_v46  ;;  %3614 = vmatmul.f32.gmra.mxu2 %v6629_v46 }
 0x5ea   : > { %v4156_v47 = vadd.f32 0.5, %v4028_v18  ;;  %v4031_v59 = vmul.f32 0.5, %v4737_v2  ;;  %4740 = vtanh.f32 %v3778_v38 }
 0x5eb   : > { %v4158_v5 = vadd.f32 0.5, %v4030_v27  ;;  %4742 = vtanh.f32 %v3779_v55  ;;  %v3173_v9 = vpop.f32.mrf.mxu3 }
 0x5ec   : > { %4284 = vst [vmem:[%s6623_s22 + $0x10] sm:$0xff] %v4156_v47  ;;  %v4159_v10 = vadd.f32 0.5, %v4031_v59  ;;  %v3174_v54 = vadd.f32 %v6438_v48, %v3173_v9  ;;  %v3567_v3 = vpop.f32.mrf.mxu2 }
 0x5ed   : > { %4286 = vst [vmem:[%s6623_s22 + $0x20] sm:$0xff] %v4158_v5  ;;  %v3568_v53 = vadd.f32 %v3567_v3, %v6606_v6  ;;  %v3344_v30 = vpop.f32.mrf.mxu0 }
 0x5ee   : > { %4287 = vst [vmem:[%s6623_s22 + $0x28] sm:$0xff] %v4159_v10  ;;  %v6642_v34 = vmax.f32 %v3174_v54, 0.0  ;;  %v3345_v57 = vadd.f32 %v3344_v30, %v6591_v0  ;;  %v3457_v12 = vpop.f32.mrf.mxu1 }
 0x5ef   : > { %v4739_v17 = vpop.eup %4738  ;;  %v3780_v39 = vmul.f32 0.5, %v3568_v53  ;;  %v3458_v61 = vadd.f32 %v3457_v12, %v6594_v49 }
 0x5f0   : > { %v4741_v13 = vpop.eup %4740  ;;  %v4032_v35 = vmul.f32 0.5, %v4739_v17  ;;  %v3782_v29 = vmul.f32 0.5, %v3345_v57  ;;  %3391 = vmatmul.f32.gmra.mxu0 %v6642_v34  ;;  %3685 = vmatmul.f32.gmra.mxu3 %v6483_v7 }
 0x5f1   : > { %v4743_v63 = vpop.eup %4742  ;;  %v4034_v33 = vmul.f32 0.5, %v4741_v13  ;;  %4744 = vtanh.f32 %v3780_v39  ;;  %v3783_v52 = vmul.f32 0.5, %v3458_v61  ;;  %3504 = vmatmul.f32.gmra.mxu1 %v6642_v34  ;;  %3617 = vmatmul.f32.gmra.mxu2 %v6642_v34 }
 0x5f2   : > { %v4160_v19 = vadd.f32 0.5, %v4032_v35  ;;  %v4035_v32 = vmul.f32 0.5, %v4743_v63  ;;  %4746 = vtanh.f32 %v3782_v29 }
 0x5f3   : > { %v4162_v41 = vadd.f32 0.5, %v4034_v33  ;;  %4748 = vtanh.f32 %v3783_v52  ;;  %v3176_v24 = vpop.f32.mrf.mxu3 }
 0x5f4   : > { %4288 = vst [vmem:[%s6623_s22 + $0x30] sm:$0xff] %v4160_v19  ;;  %v4163_v20 = vadd.f32 0.5, %v4035_v32  ;;  %v3177_v7 = vadd.f32 %v6438_v48, %v3176_v24  ;;  %v3570_v43 = vpop.f32.mrf.mxu2 }
 0x5f5   : > { %4290 = vst [vmem:[%s6623_s22 + $0x40] sm:$0xff] %v4162_v41  ;;  %v3571_v31 = vadd.f32 %v3570_v43, %v6606_v6  ;;  %v3347_v42 = vpop.f32.mrf.mxu0 }
 0x5f6   : > { %4291 = vst [vmem:[%s6623_s22 + $0x48] sm:$0xff] %v4163_v20  ;;  %v6655_v26 = vmax.f32 %v3177_v7, 0.0  ;;  %v3348_v40 = vadd.f32 %v3347_v42, %v6591_v0  ;;  %v3460_v16 = vpop.f32.mrf.mxu1 }
 0x5f7   : > { %v4745_v11 = vpop.eup %4744  ;;  %v3784_v37 = vmul.f32 0.5, %v3571_v31  ;;  %v3461_v44 = vadd.f32 %v3460_v16, %v6594_v49 }
 0x5f8   : > { %v4747_v28 = vpop.eup %4746  ;;  %v4036_v56 = vmul.f32 0.5, %v4745_v11  ;;  %v3786_v1 = vmul.f32 0.5, %v3348_v40  ;;  %3394 = vmatmul.f32.gmra.mxu0 %v6655_v26  ;;  %3688 = vmatmul.f32.gmra.mxu3 %v6491_v15 }
 0x5f9   : > { %v4749_v36 = vpop.eup %4748  ;;  %v4038_v18 = vmul.f32 0.5, %v4747_v28  ;;  %4750 = vtanh.f32 %v3784_v37  ;;  %v3787_v38 = vmul.f32 0.5, %v3461_v44  ;;  %3507 = vmatmul.f32.gmra.mxu1 %v6655_v26  ;;  %3620 = vmatmul.f32.gmra.mxu2 %v6655_v26 }
 0x5fa   : > { %v4164_v2 = vadd.f32 0.5, %v4036_v56  ;;  %v4039_v27 = vmul.f32 0.5, %v4749_v36  ;;  %4752 = vtanh.f32 %v3786_v1 }
 0x5fb   : > { %v4166_v55 = vadd.f32 0.5, %v4038_v18  ;;  %4754 = vtanh.f32 %v3787_v38  ;;  %v3179_v47 = vpop.f32.mrf.mxu3 }
 0x5fc   : > { %4292 = vst [vmem:[%s6623_s22 + $0x50] sm:$0xff] %v4164_v2  ;;  %v4167_v59 = vadd.f32 0.5, %v4039_v27  ;;  %v3180_v15 = vadd.f32 %v6438_v48, %v3179_v47  ;;  %v3573_v5 = vpop.f32.mrf.mxu2 }
 0x5fd   : > { %4294 = vst [vmem:[%s6623_s22 + $0x60] sm:$0xff] %v4166_v55  ;;  %v3574_v9 = vadd.f32 %v3573_v5, %v6606_v6  ;;  %v3350_v10 = vpop.f32.mrf.mxu0 }
 0x5fe   : > { %4295 = vst [vmem:[%s6623_s22 + $0x68] sm:$0xff] %v4167_v59  ;;  %v6668_v54 = vmax.f32 %v3180_v15, 0.0  ;;  %v3351_v3 = vadd.f32 %v3350_v10, %v6591_v0  ;;  %v3463_v53 = vpop.f32.mrf.mxu1 }
 0x5ff   : > { %v4751_v30 = vpop.eup %4750  ;;  %v3788_v57 = vmul.f32 0.5, %v3574_v9  ;;  %v3464_v12 = vadd.f32 %v3463_v53, %v6594_v49 }
 0x600   : > { %v4753_v17 = vpop.eup %4752  ;;  %v4040_v39 = vmul.f32 0.5, %v4751_v30  ;;  %v3790_v61 = vmul.f32 0.5, %v3351_v3  ;;  %3397 = vmatmul.f32.gmra.mxu0 %v6668_v54  ;;  %3691 = vmatmul.f32.gmra.mxu3 %v6502_v4 }
 0x601   : > { %v4755_v13 = vpop.eup %4754  ;;  %v4042_v35 = vmul.f32 0.5, %v4753_v17  ;;  %4756 = vtanh.f32 %v3788_v57  ;;  %v3791_v29 = vmul.f32 0.5, %v3464_v12  ;;  %3510 = vmatmul.f32.gmra.mxu1 %v6668_v54  ;;  %3623 = vmatmul.f32.gmra.mxu2 %v6668_v54 }
 0x602   : > { %v4168_v63 = vadd.f32 0.5, %v4040_v39  ;;  %v4043_v33 = vmul.f32 0.5, %v4755_v13  ;;  %4758 = vtanh.f32 %v3790_v61 }
 0x603   : > { %v4170_v52 = vadd.f32 0.5, %v4042_v35  ;;  %4760 = vtanh.f32 %v3791_v29  ;;  %v3182_v19 = vpop.f32.mrf.mxu3 }
 0x604   : > { %4296 = vst [vmem:[%s6623_s22 + $0x70] sm:$0xff] %v4168_v63  ;;  %v4171_v32 = vadd.f32 0.5, %v4043_v33  ;;  %v3183_v4 = vadd.f32 %v6438_v48, %v3182_v19  ;;  %v3576_v41 = vpop.f32.mrf.mxu2 }
 0x605   : > { %4298 = vst [vmem:[%s6623_s22 + $0x80] sm:$0xff] %v4170_v52  ;;  %v3577_v24 = vadd.f32 %v3576_v41, %v6606_v6  ;;  %v3353_v20 = vpop.f32.mrf.mxu0 }
 0x606   : > { %4299 = vst [vmem:[%s6623_s22 + $0x88] sm:$0xff] %v4171_v32  ;;  %v6681_v7 = vmax.f32 %v3183_v4, 0.0  ;;  %v3354_v43 = vadd.f32 %v3353_v20, %v6591_v0  ;;  %v3466_v31 = vpop.f32.mrf.mxu1 }
 0x607   : > { %v4757_v42 = vpop.eup %4756  ;;  %v3792_v40 = vmul.f32 0.5, %v3577_v24  ;;  %v3467_v16 = vadd.f32 %v3466_v31, %v6594_v49 }
 0x608   : > { %v4759_v11 = vpop.eup %4758  ;;  %v4044_v37 = vmul.f32 0.5, %v4757_v42  ;;  %v3794_v44 = vmul.f32 0.5, %v3354_v43  ;;  %3400 = vmatmul.f32.gmra.mxu0 %v6681_v7  ;;  %3694 = vmatmul.f32.gmra.mxu3 %v6510_v14 }
 0x609   : > { %v4761_v28 = vpop.eup %4760  ;;  %v4046_v56 = vmul.f32 0.5, %v4759_v11  ;;  %4762 = vtanh.f32 %v3792_v40  ;;  %v3795_v1 = vmul.f32 0.5, %v3467_v16  ;;  %3513 = vmatmul.f32.gmra.mxu1 %v6681_v7  ;;  %3626 = vmatmul.f32.gmra.mxu2 %v6681_v7 }
 0x60a   : > { %v4172_v36 = vadd.f32 0.5, %v4044_v37  ;;  %v4047_v18 = vmul.f32 0.5, %v4761_v28  ;;  %4764 = vtanh.f32 %v3794_v44 }
 0x60b   : > { %v4174_v38 = vadd.f32 0.5, %v4046_v56  ;;  %4766 = vtanh.f32 %v3795_v1  ;;  %v3185_v2 = vpop.f32.mrf.mxu3 }
 0x60c   : > { %4300 = vst [vmem:[%s6623_s22 + $0x90] sm:$0xff] %v4172_v36  ;;  %v4175_v27 = vadd.f32 0.5, %v4047_v18  ;;  %v3186_v14 = vadd.f32 %v6438_v48, %v3185_v2  ;;  %v3579_v55 = vpop.f32.mrf.mxu2 }
 0x60d   : > { %4302 = vst [vmem:[%s6623_s22 + $0xa0] sm:$0xff] %v4174_v38  ;;  %v3580_v47 = vadd.f32 %v3579_v55, %v6606_v6  ;;  %v3356_v59 = vpop.f32.mrf.mxu0 }
 0x60e   : > { %4303 = vst [vmem:[%s6623_s22 + $0xa8] sm:$0xff] %v4175_v27  ;;  %v6694_v15 = vmax.f32 %v3186_v14, 0.0  ;;  %v3357_v5 = vadd.f32 %v3356_v59, %v6591_v0  ;;  %v3469_v9 = vpop.f32.mrf.mxu1 }
 0x60f   : > { %v4763_v10 = vpop.eup %4762  ;;  %v3796_v3 = vmul.f32 0.5, %v3580_v47  ;;  %v3470_v53 = vadd.f32 %v3469_v9, %v6594_v49 }
 0x610   : > { %v4765_v30 = vpop.eup %4764  ;;  %v4048_v57 = vmul.f32 0.5, %v4763_v10  ;;  %v3798_v12 = vmul.f32 0.5, %v3357_v5  ;;  %3403 = vmatmul.f32.gmra.mxu0 %v6694_v15  ;;  %3697 = vmatmul.f32.gmra.mxu3 %v6521_v22 }
 0x611   : > { %v4767_v17 = vpop.eup %4766  ;;  %v4050_v39 = vmul.f32 0.5, %v4765_v30  ;;  %4768 = vtanh.f32 %v3796_v3  ;;  %v3799_v61 = vmul.f32 0.5, %v3470_v53  ;;  %3516 = vmatmul.f32.gmra.mxu1 %v6694_v15  ;;  %3629 = vmatmul.f32.gmra.mxu2 %v6694_v15 }
 0x612   : > { %v4176_v13 = vadd.f32 0.5, %v4048_v57  ;;  %v4051_v35 = vmul.f32 0.5, %v4767_v17  ;;  %4770 = vtanh.f32 %v3798_v12 }
 0x613   : > { %v4178_v29 = vadd.f32 0.5, %v4050_v39  ;;  %4772 = vtanh.f32 %v3799_v61  ;;  %v3188_v63 = vpop.f32.mrf.mxu3 }
 0x614   : > { %4304 = vst [vmem:[%s6623_s22 + $0xb0] sm:$0xff] %v4176_v13  ;;  %v4179_v33 = vadd.f32 0.5, %v4051_v35  ;;  %v3189_v22 = vadd.f32 %v6438_v48, %v3188_v63  ;;  %v3582_v52 = vpop.f32.mrf.mxu2 }
 0x615   : > { %4306 = vst [vmem:[%s6623_s22 + $0xc0] sm:$0xff] %v4178_v29  ;;  %v3583_v19 = vadd.f32 %v3582_v52, %v6606_v6  ;;  %v3359_v32 = vpop.f32.mrf.mxu0 }
 0x616   : > { %4307 = vst [vmem:[%s6623_s22 + $0xc8] sm:$0xff] %v4179_v33  ;;  %v6707_v4 = vmax.f32 %v3189_v22, 0.0  ;;  %v3360_v41 = vadd.f32 %v3359_v32, %v6591_v0  ;;  %v3472_v24 = vpop.f32.mrf.mxu1 }
 0x617   : > { %v4769_v20 = vpop.eup %4768  ;;  %v3800_v43 = vmul.f32 0.5, %v3583_v19  ;;  %v3473_v31 = vadd.f32 %v3472_v24, %v6594_v49 }
 0x618   : > { %v4771_v42 = vpop.eup %4770  ;;  %v4052_v40 = vmul.f32 0.5, %v4769_v20  ;;  %v3802_v16 = vmul.f32 0.5, %v3360_v41  ;;  %3406 = vmatmul.f32.gmra.mxu0 %v6707_v4  ;;  %3700 = vmatmul.f32.gmra.mxu3 %v6529_v25 }
 0x619   : > { %v4773_v11 = vpop.eup %4772  ;;  %v4054_v37 = vmul.f32 0.5, %v4771_v42  ;;  %4774 = vtanh.f32 %v3800_v43  ;;  %v3803_v44 = vmul.f32 0.5, %v3473_v31  ;;  %3519 = vmatmul.f32.gmra.mxu1 %v6707_v4  ;;  %3632 = vmatmul.f32.gmra.mxu2 %v6707_v4 }
 0x61a   : > { %v4180_v28 = vadd.f32 0.5, %v4052_v40  ;;  %v4055_v56 = vmul.f32 0.5, %v4773_v11  ;;  %4776 = vtanh.f32 %v3802_v16 }
 0x61b   : > { %v4182_v1 = vadd.f32 0.5, %v4054_v37  ;;  %4778 = vtanh.f32 %v3803_v44  ;;  %v3191_v36 = vpop.f32.mrf.mxu3 }
 0x61c   : > { %4308 = vst [vmem:[%s6623_s22 + $0xd0] sm:$0xff] %v4180_v28  ;;  %v4183_v18 = vadd.f32 0.5, %v4055_v56  ;;  %v3192_v25 = vadd.f32 %v6438_v48, %v3191_v36  ;;  %v3585_v38 = vpop.f32.mrf.mxu2 }
 0x61d   : > { %4310 = vst [vmem:[%s6623_s22 + $0xe0] sm:$0xff] %v4182_v1  ;;  %v3586_v2 = vadd.f32 %v3585_v38, %v6606_v6  ;;  %v3362_v27 = vpop.f32.mrf.mxu0 }
 0x61e   : > { %4311 = vst [vmem:[%s6623_s22 + $0xe8] sm:$0xff] %v4183_v18  ;;  %v6720_v14 = vmax.f32 %v3192_v25, 0.0  ;;  %v3363_v55 = vadd.f32 %v3362_v27, %v6591_v0  ;;  %v3475_v47 = vpop.f32.mrf.mxu1 }
 0x61f   : > { %v4775_v59 = vpop.eup %4774  ;;  %v3804_v5 = vmul.f32 0.5, %v3586_v2  ;;  %v3476_v9 = vadd.f32 %v3475_v47, %v6594_v49 }
 0x620   : > { %v4777_v10 = vpop.eup %4776  ;;  %v4056_v3 = vmul.f32 0.5, %v4775_v59  ;;  %v3806_v53 = vmul.f32 0.5, %v3363_v55  ;;  %3409 = vmatmul.f32.gmra.mxu0 %v6720_v14  ;;  %3703 = vmatmul.f32.gmra.mxu3 %v6540_v8 }
 0x621   : > { %v4779_v30 = vpop.eup %4778  ;;  %v4058_v57 = vmul.f32 0.5, %v4777_v10  ;;  %4780 = vtanh.f32 %v3804_v5  ;;  %v3807_v12 = vmul.f32 0.5, %v3476_v9  ;;  %3522 = vmatmul.f32.gmra.mxu1 %v6720_v14  ;;  %3635 = vmatmul.f32.gmra.mxu2 %v6720_v14 }
 0x622   : > { %v4184_v17 = vadd.f32 0.5, %v4056_v3  ;;  %v4059_v39 = vmul.f32 0.5, %v4779_v30  ;;  %4782 = vtanh.f32 %v3806_v53 }
 0x623   : > { %v4186_v61 = vadd.f32 0.5, %v4058_v57  ;;  %4784 = vtanh.f32 %v3807_v12  ;;  %v3194_v13 = vpop.f32.mrf.mxu3 }
 0x624   : > { %4312 = vst [vmem:[%s6623_s22 + $0xf0] sm:$0xff] %v4184_v17  ;;  %v4187_v35 = vadd.f32 0.5, %v4059_v39  ;;  %v3195_v8 = vadd.f32 %v6438_v48, %v3194_v13  ;;  %v3588_v29 = vpop.f32.mrf.mxu2 }
 0x625   : > { %4314 = vst [vmem:[%s6623_s22 + $0x100] sm:$0xff] %v4186_v61  ;;  %v3589_v63 = vadd.f32 %v3588_v29, %v6606_v6  ;;  %v3365_v33 = vpop.f32.mrf.mxu0 }
 0x626   : > { %4315 = vst [vmem:[%s6623_s22 + $0x108] sm:$0xff] %v4187_v35  ;;  %v6733_v22 = vmax.f32 %v3195_v8, 0.0  ;;  %v3366_v52 = vadd.f32 %v3365_v33, %v6591_v0  ;;  %v3478_v19 = vpop.f32.mrf.mxu1 }
 0x627   : > { %v4781_v32 = vpop.eup %4780  ;;  %v3808_v41 = vmul.f32 0.5, %v3589_v63  ;;  %v3479_v24 = vadd.f32 %v3478_v19, %v6594_v49 }
 0x628   : > { %v4783_v20 = vpop.eup %4782  ;;  %v4060_v43 = vmul.f32 0.5, %v4781_v32  ;;  %v3810_v31 = vmul.f32 0.5, %v3366_v52  ;;  %3412 = vmatmul.f32.gmra.mxu0 %v6733_v22  ;;  %3706 = vmatmul.f32.gmra.mxu3 %v6548_v45 }
 0x629   : > { %v4785_v42 = vpop.eup %4784  ;;  %v4062_v40 = vmul.f32 0.5, %v4783_v20  ;;  %4786 = vtanh.f32 %v3808_v41  ;;  %v3811_v16 = vmul.f32 0.5, %v3479_v24  ;;  %3525 = vmatmul.f32.gmra.mxu1 %v6733_v22  ;;  %3638 = vmatmul.f32.gmra.mxu2 %v6733_v22 }
 0x62a   : > { %v4188_v11 = vadd.f32 0.5, %v4060_v43  ;;  %v4063_v37 = vmul.f32 0.5, %v4785_v42  ;;  %4788 = vtanh.f32 %v3810_v31 }
 0x62b   : > { %v4190_v44 = vadd.f32 0.5, %v4062_v40  ;;  %4790 = vtanh.f32 %v3811_v16  ;;  %v3197_v28 = vpop.f32.mrf.mxu3 }
 0x62c   : > { %4316 = vst [vmem:[%s6623_s22 + $0x110] sm:$0xff] %v4188_v11  ;;  %v4191_v56 = vadd.f32 0.5, %v4063_v37  ;;  %v3198_v45 = vadd.f32 %v6438_v48, %v3197_v28  ;;  %v3591_v1 = vpop.f32.mrf.mxu2 }
 0x62d   : > { %4318 = vst [vmem:[%s6623_s22 + $0x120] sm:$0xff] %v4190_v44  ;;  %v3592_v36 = vadd.f32 %v3591_v1, %v6606_v6  ;;  %v3368_v18 = vpop.f32.mrf.mxu0 }
 0x62e   : > { %4319 = vst [vmem:[%s6623_s22 + $0x128] sm:$0xff] %v4191_v56  ;;  %v6746_v25 = vmax.f32 %v3198_v45, 0.0  ;;  %v3369_v38 = vadd.f32 %v3368_v18, %v6591_v0  ;;  %v3481_v2 = vpop.f32.mrf.mxu1 }
 0x62f   : > { %v4787_v27 = vpop.eup %4786  ;;  %v3812_v55 = vmul.f32 0.5, %v3592_v36  ;;  %v3482_v47 = vadd.f32 %v3481_v2, %v6594_v49 }
 0x630   : > { %v4789_v59 = vpop.eup %4788  ;;  %v4064_v5 = vmul.f32 0.5, %v4787_v27  ;;  %v3814_v9 = vmul.f32 0.5, %v3369_v38  ;;  %3415 = vmatmul.f32.gmra.mxu0 %v6746_v25  ;;  %3709 = vmatmul.f32.gmra.mxu3 %v6556_v60  ;;  %v6758_v60 = vld [vmem:[%s7018_s18] ss:$0 sm:$0xff] }
 0x631   : > { %v4791_v48 = vpop.eup %4790  ;;  %v4066_v10 = vmul.f32 0.5, %v4789_v59  ;;  %4792 = vtanh.f32 %v3812_v55  ;;  %v3815_v3 = vmul.f32 0.5, %v3482_v47  ;;  %3528 = vmatmul.f32.gmra.mxu1 %v6746_v25  ;;  %3641 = vmatmul.f32.gmra.mxu2 %v6746_v25 }
 0x632   : > { %v4192_v53 = vadd.f32 0.5, %v4064_v5  ;;  %v4067_v30 = vmul.f32 0.5, %v4791_v48  ;;  %4794 = vtanh.f32 %v3814_v9 }
 0x633   : > { %v4194_v57 = vadd.f32 0.5, %v4066_v10  ;;  %4796 = vtanh.f32 %v3815_v3  ;;  %v3200_v12 = vpop.f32.mrf.mxu3 }
 0x634   : > { %4320 = vst [vmem:[%s6623_s22 + $0x130] sm:$0xff] %v4192_v53  ;;  %v4195_v17 = vadd.f32 0.5, %v4067_v30  ;;  %v3201_v39 = vadd.f32 %v6758_v60, %v3200_v12  ;;  %v3594_v61 = vpop.f32.mrf.mxu2 }
 0x635   : > { %4322 = vst [vmem:[%s6623_s22 + $0x140] sm:$0xff] %v4194_v57  ;;  %v3595_v13 = vadd.f32 %v3594_v61, %v6606_v6  ;;  %v3371_v35 = vpop.f32.mrf.mxu0 }
 0x636   : > { %4323 = vst [vmem:[%s6623_s22 + $0x148] sm:$0xff] %v4195_v17  ;;  %v6764_v8 = vmax.f32 %v3201_v39, 0.0  ;;  %v3372_v29 = vadd.f32 %v3371_v35, %v6591_v0  ;;  %v3484_v63 = vpop.f32.mrf.mxu1 }
 0x637   : > { %v4793_v33 = vpop.eup %4792  ;;  %v3816_v52 = vmul.f32 0.5, %v3595_v13  ;;  %v3485_v19 = vadd.f32 %v3484_v63, %v6594_v49 }
 0x638   : > { %v4795_v32 = vpop.eup %4794  ;;  %v4068_v41 = vmul.f32 0.5, %v4793_v33  ;;  %v3818_v24 = vmul.f32 0.5, %v3372_v29  ;;  %3418 = vmatmul.f32.gmra.mxu0 %v6764_v8  ;;  %3712 = vmatmul.f32.gmra.mxu3 %v6564_v23 }
 0x639   : > { %v4797_v20 = vpop.eup %4796  ;;  %v4070_v43 = vmul.f32 0.5, %v4795_v32  ;;  %4798 = vtanh.f32 %v3816_v52  ;;  %v3819_v31 = vmul.f32 0.5, %v3485_v19  ;;  %3531 = vmatmul.f32.gmra.mxu1 %v6764_v8  ;;  %3644 = vmatmul.f32.gmra.mxu2 %v6764_v8 }
 0x63a   : > { %v4196_v42 = vadd.f32 0.5, %v4068_v41  ;;  %v4071_v40 = vmul.f32 0.5, %v4797_v20  ;;  %4800 = vtanh.f32 %v3818_v24 }
 0x63b   : > { %v4198_v16 = vadd.f32 0.5, %v4070_v43  ;;  %4802 = vtanh.f32 %v3819_v31  ;;  %v3203_v11 = vpop.f32.mrf.mxu3 }
 0x63c   : > { %4324 = vst [vmem:[%s6623_s22 + $0x150] sm:$0xff] %v4196_v42  ;;  %v4199_v37 = vadd.f32 0.5, %v4071_v40  ;;  %v3204_v23 = vadd.f32 %v6758_v60, %v3203_v11  ;;  %v3597_v44 = vpop.f32.mrf.mxu2 }
 0x63d   : > { %4326 = vst [vmem:[%s6623_s22 + $0x160] sm:$0xff] %v4198_v16  ;;  %v3598_v28 = vadd.f32 %v3597_v44, %v6606_v6  ;;  %v3374_v56 = vpop.f32.mrf.mxu0 }
 0x63e   : > { %4327 = vst [vmem:[%s6623_s22 + $0x168] sm:$0xff] %v4199_v37  ;;  %v6777_v45 = vmax.f32 %v3204_v23, 0.0  ;;  %v3375_v1 = vadd.f32 %v3374_v56, %v6591_v0  ;;  %v3487_v36 = vpop.f32.mrf.mxu1 }
 0x63f   : > { %v4799_v18 = vpop.eup %4798  ;;  %v3820_v38 = vmul.f32 0.5, %v3598_v28  ;;  %v3488_v2 = vadd.f32 %v3487_v36, %v6594_v49 }
 0x640   : > { %v4801_v27 = vpop.eup %4800  ;;  %v4072_v55 = vmul.f32 0.5, %v4799_v18  ;;  %v3822_v47 = vmul.f32 0.5, %v3375_v1  ;;  %3421 = vmatmul.f32.gmra.mxu0 %v6777_v45  ;;  %3715 = vmatmul.f32.gmra.mxu3 %v6572_v50 }
 0x641   : > { %v4803_v59 = vpop.eup %4802  ;;  %v4074_v5 = vmul.f32 0.5, %v4801_v27  ;;  %4804 = vtanh.f32 %v3820_v38  ;;  %v3823_v9 = vmul.f32 0.5, %v3488_v2  ;;  %3534 = vmatmul.f32.gmra.mxu1 %v6777_v45  ;;  %3647 = vmatmul.f32.gmra.mxu2 %v6777_v45 }
 0x642   : > { %v4200_v48 = vadd.f32 0.5, %v4072_v55  ;;  %v4075_v10 = vmul.f32 0.5, %v4803_v59  ;;  %4806 = vtanh.f32 %v3822_v47 }
 0x643   : > { %v4202_v3 = vadd.f32 0.5, %v4074_v5  ;;  %4808 = vtanh.f32 %v3823_v9  ;;  %v3206_v53 = vpop.f32.mrf.mxu3 }
 0x644   : > { %4328 = vst [vmem:[%s6623_s22 + $0x170] sm:$0xff] %v4200_v48  ;;  %v4203_v30 = vadd.f32 0.5, %v4075_v10  ;;  %v3207_v50 = vadd.f32 %v6758_v60, %v3206_v53  ;;  %v3600_v57 = vpop.f32.mrf.mxu2 }
 0x645   : > { %4330 = vst [vmem:[%s6623_s22 + $0x180] sm:$0xff] %v4202_v3  ;;  %v3601_v12 = vadd.f32 %v3600_v57, %v6606_v6  ;;  %v3377_v17 = vpop.f32.mrf.mxu0 }
 0x646   : > { %4331 = vst [vmem:[%s6623_s22 + $0x188] sm:$0xff] %v4203_v30  ;;  %v6790_v39 = vmax.f32 %v3207_v50, 0.0  ;;  %v3378_v61 = vadd.f32 %v3377_v17, %v6591_v0  ;;  %v3490_v13 = vpop.f32.mrf.mxu1 }
 0x647   : > { %v4805_v35 = vpop.eup %4804  ;;  %v3824_v29 = vmul.f32 0.5, %v3601_v12  ;;  %v3491_v63 = vadd.f32 %v3490_v13, %v6594_v49 }
 0x648   : > { %v4807_v33 = vpop.eup %4806  ;;  %v4076_v52 = vmul.f32 0.5, %v4805_v35  ;;  %v3826_v19 = vmul.f32 0.5, %v3378_v61  ;;  %3424 = vmatmul.f32.gmra.mxu0 %v6790_v39  ;;  %3718 = vmatmul.f32.gmra.mxu3 %v6579_v21 }
 0x649   : > { %v4809_v32 = vpop.eup %4808  ;;  %v4078_v41 = vmul.f32 0.5, %v4807_v33  ;;  %4810 = vtanh.f32 %v3824_v29  ;;  %v3827_v24 = vmul.f32 0.5, %v3491_v63  ;;  %3537 = vmatmul.f32.gmra.mxu1 %v6790_v39  ;;  %3650 = vmatmul.f32.gmra.mxu2 %v6790_v39 }
 0x64a   : > { %v4204_v20 = vadd.f32 0.5, %v4076_v52  ;;  %v4079_v43 = vmul.f32 0.5, %v4809_v32  ;;  %4812 = vtanh.f32 %v3826_v19 }
 0x64b   : > { %v4206_v31 = vadd.f32 0.5, %v4078_v41  ;;  %4814 = vtanh.f32 %v3827_v24  ;;  %v3209_v42 = vpop.f32.mrf.mxu3 }
 0x64c   : > { %4332 = vst [vmem:[%s6623_s22 + $0x190] sm:$0xff] %v4204_v20  ;;  %v4207_v40 = vadd.f32 0.5, %v4079_v43  ;;  %v3210_v21 = vadd.f32 %v6758_v60, %v3209_v42  ;;  %v3603_v16 = vpop.f32.mrf.mxu2  ;;  %v6810_v60 = vperm.slane %v6584_v62, 3 }
 0x64d   : > { %4334 = vst [vmem:[%s6623_s22 + $0x1a0] sm:$0xff] %v4206_v31  ;;  %v3604_v11 = vadd.f32 %v3603_v16, %v6606_v6  ;;  %v3380_v37 = vpop.f32.mrf.mxu0 }
 0x64e   : > { %4335 = vst [vmem:[%s6623_s22 + $0x1a8] sm:$0xff] %v4207_v40  ;;  %v6803_v23 = vmax.f32 %v3210_v21, 0.0  ;;  %v3381_v44 = vadd.f32 %v3380_v37, %v6591_v0  ;;  %v3493_v28 = vpop.f32.mrf.mxu1 }
 0x64f   : > { %v4811_v56 = vpop.eup %4810  ;;  %v3828_v1 = vmul.f32 0.5, %v3604_v11  ;;  %v3494_v36 = vadd.f32 %v3493_v28, %v6594_v49 }
 0x650   : > { %v4813_v18 = vpop.eup %4812  ;;  %v4080_v38 = vmul.f32 0.5, %v4811_v56  ;;  %v3830_v2 = vmul.f32 0.5, %v3381_v44  ;;  %3427 = vmatmul.f32.gmra.mxu0 %v6803_v23  ;;  %3721 = vmatmul.f32.gmra.mxu3 %v6597_v58 }
 0x651   : > { %v4815_v27 = vpop.eup %4814  ;;  %v4082_v55 = vmul.f32 0.5, %v4813_v18  ;;  %4816 = vtanh.f32 %v3828_v1  ;;  %v3831_v47 = vmul.f32 0.5, %v3494_v36  ;;  %3540 = vmatmul.f32.gmra.mxu1 %v6803_v23  ;;  %3653 = vmatmul.f32.gmra.mxu2 %v6803_v23 }
 0x652   : > { %v4208_v59 = vadd.f32 0.5, %v4080_v38  ;;  %v4083_v5 = vmul.f32 0.5, %v4815_v27  ;;  %4818 = vtanh.f32 %v3830_v2 }
 0x653   : > { %v4210_v9 = vadd.f32 0.5, %v4082_v55  ;;  %4820 = vtanh.f32 %v3831_v47  ;;  %v3674_v48 = vpop.f32.mrf.mxu3 }
 0x654   : > { %4336 = vst [vmem:[%s6623_s22 + $0x1b0] sm:$0xff] %v4208_v59  ;;  %v4211_v58 = vadd.f32 0.5, %v4083_v5  ;;  %v3606_v62 = vpop.f32.mrf.mxu2  ;;  %v3675_v10 = vadd.f32 %v3674_v48, %v6810_v60 }
 0x655   : > { %4338 = vst [vmem:[%s6623_s22 + $0x1c0] sm:$0xff] %v4210_v9  ;;  %v3607_v3 = vadd.f32 %v3606_v62, %v6606_v6  ;;  %v3383_v53 = vpop.f32.mrf.mxu0 }
 0x656   : > { %4339 = vst [vmem:[%s6623_s22 + $0x1c8] sm:$0xff] %v4211_v58  ;;  %v3773_v30 = vmul.f32 0.5, %v3675_v10  ;;  %v3384_v50 = vadd.f32 %v3383_v53, %v6591_v0  ;;  %v3496_v57 = vpop.f32.mrf.mxu1 }
 0x657   : > { %v4817_v12 = vpop.eup %4816  ;;  %v3832_v17 = vmul.f32 0.5, %v3607_v3  ;;  %v3497_v61 = vadd.f32 %v3496_v57, %v6594_v49 }
 0x658   : > { %v4819_v13 = vpop.eup %4818  ;;  %v4084_v35 = vmul.f32 0.5, %v4817_v12  ;;  %4822 = vtanh.f32 %v3773_v30  ;;  %v3834_v29 = vmul.f32 0.5, %v3384_v50  ;;  %3724 = vmatmul.f32.gmra.mxu3 %v6610_v51 }
 0x659   : > { %v4821_v63 = vpop.eup %4820  ;;  %v4086_v33 = vmul.f32 0.5, %v4819_v13  ;;  %4824 = vtanh.f32 %v3832_v17  ;;  %v3835_v52 = vmul.f32 0.5, %v3497_v61 }
 0x65a   : > { %v4212_v19 = vadd.f32 0.5, %v4084_v35  ;;  %v4087_v32 = vmul.f32 0.5, %v4821_v63  ;;  %4826 = vtanh.f32 %v3834_v29 }
 0x65b   : > { %v4214_v41 = vadd.f32 0.5, %v4086_v33  ;;  %4828 = vtanh.f32 %v3835_v52  ;;  %v3677_v24 = vpop.f32.mrf.mxu3 }
 0x65c   : > { %4340 = vst [vmem:[%s6623_s22 + $0x1d0] sm:$0xff] %v4212_v19  ;;  %v4215_v20 = vadd.f32 0.5, %v4087_v32  ;;  %v3609_v43 = vpop.f32.mrf.mxu2  ;;  %v3678_v31 = vadd.f32 %v3677_v24, %v6810_v60 }
 0x65d   : > { %4342 = vst [vmem:[%s6623_s22 + $0x1e0] sm:$0xff] %v4214_v41  ;;  %v3610_v42 = vadd.f32 %v3609_v43, %v6606_v6  ;;  %v3386_v51 = vpop.f32.mrf.mxu0 }
 0x65e   : > { %v4823_v40 = vpop.eup %4822  ;;  %4343 = vst [vmem:[%s6623_s22 + $0x1e8] sm:$0xff] %v4215_v20  ;;  %v3777_v21 = vmul.f32 0.5, %v3678_v31  ;;  %v3387_v16 = vadd.f32 %v3386_v51, %v6591_v0  ;;  %v3499_v11 = vpop.f32.mrf.mxu1 }
 0x65f   : > { %v4825_v37 = vpop.eup %4824  ;;  %v4029_v44 = vmul.f32 0.5, %v4823_v40  ;;  %v3836_v28 = vmul.f32 0.5, %v3610_v42  ;;  %v3500_v56 = vadd.f32 %v3499_v11, %v6594_v49 }
 0x660   : > { %v4827_v1 = vpop.eup %4826  ;;  %v4088_v36 = vmul.f32 0.5, %v4825_v37  ;;  %4830 = vtanh.f32 %v3777_v21  ;;  %v3838_v18 = vmul.f32 0.5, %v3387_v16  ;;  %3727 = vmatmul.f32.gmra.mxu3 %v6629_v46 }
 0x661   : > { %v4829_v38 = vpop.eup %4828  ;;  %v4157_v2 = vadd.f32 0.5, %v4029_v44  ;;  %v4090_v27 = vmul.f32 0.5, %v4827_v1  ;;  %4832 = vtanh.f32 %v3836_v28  ;;  %v3839_v55 = vmul.f32 0.5, %v3500_v56 }
 0x662   : > { %v4216_v47 = vadd.f32 0.5, %v4088_v36  ;;  %v4091_v59 = vmul.f32 0.5, %v4829_v38  ;;  %4834 = vtanh.f32 %v3838_v18 }
 0x663   : > { %4285 = vst [vmem:[%s6623_s22 + $0x18] sm:$0xff] %v4157_v2  ;;  %v4218_v5 = vadd.f32 0.5, %v4090_v27  ;;  %4836 = vtanh.f32 %v3839_v55  ;;  %v3680_v9 = vpop.f32.mrf.mxu3 }
 0x664   : > { %4344 = vst [vmem:[%s6623_s22 + $0x1f0] sm:$0xff] %v4216_v47  ;;  %v4219_v48 = vadd.f32 0.5, %v4091_v59  ;;  %v3612_v58 = vpop.f32.mrf.mxu2  ;;  %v3681_v62 = vadd.f32 %v3680_v9, %v6810_v60 }
 0x665   : > { %4346 = vst [vmem:[%s6623_s22 + $0x200] sm:$0xff] %v4218_v5  ;;  %v3613_v46 = vadd.f32 %v3612_v58, %v6606_v6  ;;  %v3389_v10 = vpop.f32.mrf.mxu0 }
 0x666   : > { %v4831_v3 = vpop.eup %4830  ;;  %4347 = vst [vmem:[%s6623_s22 + $0x208] sm:$0xff] %v4219_v48  ;;  %v3781_v53 = vmul.f32 0.5, %v3681_v62  ;;  %v3390_v30 = vadd.f32 %v3389_v10, %v6591_v0  ;;  %v3502_v50 = vpop.f32.mrf.mxu1 }
 0x667   : > { %v4833_v57 = vpop.eup %4832  ;;  %v4033_v12 = vmul.f32 0.5, %v4831_v3  ;;  %v3840_v17 = vmul.f32 0.5, %v3613_v46  ;;  %v3503_v61 = vadd.f32 %v3502_v50, %v6594_v49 }
 0x668   : > { %v4835_v13 = vpop.eup %4834  ;;  %v4092_v35 = vmul.f32 0.5, %v4833_v57  ;;  %4838 = vtanh.f32 %v3781_v53  ;;  %v3842_v29 = vmul.f32 0.5, %v3390_v30  ;;  %3730 = vmatmul.f32.gmra.mxu3 %v6642_v34 }
 0x669   : > { %v4837_v63 = vpop.eup %4836  ;;  %v4161_v33 = vadd.f32 0.5, %v4033_v12  ;;  %v4094_v52 = vmul.f32 0.5, %v4835_v13  ;;  %4840 = vtanh.f32 %v3840_v17  ;;  %v3843_v19 = vmul.f32 0.5, %v3503_v61 }
 0x66a   : > { %v4220_v32 = vadd.f32 0.5, %v4092_v35  ;;  %v4095_v41 = vmul.f32 0.5, %v4837_v63  ;;  %4842 = vtanh.f32 %v3842_v29 }
 0x66b   : > { %4289 = vst [vmem:[%s6623_s22 + $0x38] sm:$0xff] %v4161_v33  ;;  %v4222_v24 = vadd.f32 0.5, %v4094_v52  ;;  %4844 = vtanh.f32 %v3843_v19  ;;  %v3683_v20 = vpop.f32.mrf.mxu3 }
 0x66c   : > { %4348 = vst [vmem:[%s6623_s22 + $0x210] sm:$0xff] %v4220_v32  ;;  %v4223_v43 = vadd.f32 0.5, %v4095_v41  ;;  %v3615_v31 = vpop.f32.mrf.mxu2  ;;  %v3684_v42 = vadd.f32 %v3683_v20, %v6810_v60 }
 0x66d   : > { %4350 = vst [vmem:[%s6623_s22 + $0x220] sm:$0xff] %v4222_v24  ;;  %v3616_v34 = vadd.f32 %v3615_v31, %v6606_v6  ;;  %v3392_v51 = vpop.f32.mrf.mxu0 }
 0x66e   : > { %v4839_v40 = vpop.eup %4838  ;;  %4351 = vst [vmem:[%s6623_s22 + $0x228] sm:$0xff] %v4223_v43  ;;  %v3785_v21 = vmul.f32 0.5, %v3684_v42  ;;  %v3393_v16 = vadd.f32 %v3392_v51, %v6591_v0  ;;  %v3505_v11 = vpop.f32.mrf.mxu1 }
 0x66f   : > { %v4841_v37 = vpop.eup %4840  ;;  %v4037_v44 = vmul.f32 0.5, %v4839_v40  ;;  %v3844_v28 = vmul.f32 0.5, %v3616_v34  ;;  %v3506_v56 = vadd.f32 %v3505_v11, %v6594_v49 }
 0x670   : > { %v4843_v1 = vpop.eup %4842  ;;  %v4096_v36 = vmul.f32 0.5, %v4841_v37  ;;  %4846 = vtanh.f32 %v3785_v21  ;;  %v3846_v18 = vmul.f32 0.5, %v3393_v16  ;;  %3733 = vmatmul.f32.gmra.mxu3 %v6655_v26 }
 0x671   : > { %v4845_v38 = vpop.eup %4844  ;;  %v4165_v2 = vadd.f32 0.5, %v4037_v44  ;;  %v4098_v27 = vmul.f32 0.5, %v4843_v1  ;;  %4848 = vtanh.f32 %v3844_v28  ;;  %v3847_v55 = vmul.f32 0.5, %v3506_v56 }
 0x672   : > { %v4224_v47 = vadd.f32 0.5, %v4096_v36  ;;  %v4099_v59 = vmul.f32 0.5, %v4845_v38  ;;  %4850 = vtanh.f32 %v3846_v18 }
 0x673   : > { %4293 = vst [vmem:[%s6623_s22 + $0x58] sm:$0xff] %v4165_v2  ;;  %v4226_v5 = vadd.f32 0.5, %v4098_v27  ;;  %4852 = vtanh.f32 %v3847_v55  ;;  %v3686_v9 = vpop.f32.mrf.mxu3 }
 0x674   : > { %4352 = vst [vmem:[%s6623_s22 + $0x230] sm:$0xff] %v4224_v47  ;;  %v4227_v48 = vadd.f32 0.5, %v4099_v59  ;;  %v3618_v58 = vpop.f32.mrf.mxu2  ;;  %v3687_v62 = vadd.f32 %v3686_v9, %v6810_v60 }
 0x675   : > { %4354 = vst [vmem:[%s6623_s22 + $0x240] sm:$0xff] %v4226_v5  ;;  %v3619_v26 = vadd.f32 %v3618_v58, %v6606_v6  ;;  %v3395_v46 = vpop.f32.mrf.mxu0 }
 0x676   : > { %v4847_v10 = vpop.eup %4846  ;;  %4355 = vst [vmem:[%s6623_s22 + $0x248] sm:$0xff] %v4227_v48  ;;  %v3789_v3 = vmul.f32 0.5, %v3687_v62  ;;  %v3396_v53 = vadd.f32 %v3395_v46, %v6591_v0  ;;  %v3508_v30 = vpop.f32.mrf.mxu1 }
 0x677   : > { %v4849_v50 = vpop.eup %4848  ;;  %v4041_v57 = vmul.f32 0.5, %v4847_v10  ;;  %v3848_v12 = vmul.f32 0.5, %v3619_v26  ;;  %v3509_v17 = vadd.f32 %v3508_v30, %v6594_v49 }
 0x678   : > { %v4851_v61 = vpop.eup %4850  ;;  %v4100_v13 = vmul.f32 0.5, %v4849_v50  ;;  %4854 = vtanh.f32 %v3789_v3  ;;  %v3850_v35 = vmul.f32 0.5, %v3396_v53  ;;  %3736 = vmatmul.f32.gmra.mxu3 %v6668_v54 }
 0x679   : > { %v4853_v29 = vpop.eup %4852  ;;  %v4169_v63 = vadd.f32 0.5, %v4041_v57  ;;  %v4102_v33 = vmul.f32 0.5, %v4851_v61  ;;  %4856 = vtanh.f32 %v3848_v12  ;;  %v3851_v52 = vmul.f32 0.5, %v3509_v17 }
 0x67a   : > { %v4228_v19 = vadd.f32 0.5, %v4100_v13  ;;  %v4103_v32 = vmul.f32 0.5, %v4853_v29  ;;  %4858 = vtanh.f32 %v3850_v35 }
 0x67b   : > { %4297 = vst [vmem:[%s6623_s22 + $0x78] sm:$0xff] %v4169_v63  ;;  %v4230_v41 = vadd.f32 0.5, %v4102_v33  ;;  %4860 = vtanh.f32 %v3851_v52  ;;  %v3689_v24 = vpop.f32.mrf.mxu3 }
 0x67c   : > { %4356 = vst [vmem:[%s6623_s22 + $0x250] sm:$0xff] %v4228_v19  ;;  %v4231_v20 = vadd.f32 0.5, %v4103_v32  ;;  %v3621_v43 = vpop.f32.mrf.mxu2  ;;  %v3690_v31 = vadd.f32 %v3689_v24, %v6810_v60 }
 0x67d   : > { %4358 = vst [vmem:[%s6623_s22 + $0x260] sm:$0xff] %v4230_v41  ;;  %v3622_v54 = vadd.f32 %v3621_v43, %v6606_v6  ;;  %v3398_v42 = vpop.f32.mrf.mxu0 }
 0x67e   : > { %v4855_v34 = vpop.eup %4854  ;;  %4359 = vst [vmem:[%s6623_s22 + $0x268] sm:$0xff] %v4231_v20  ;;  %v3793_v51 = vmul.f32 0.5, %v3690_v31  ;;  %v3399_v40 = vadd.f32 %v3398_v42, %v6591_v0  ;;  %v3511_v21 = vpop.f32.mrf.mxu1 }
 0x67f   : > { %v4857_v16 = vpop.eup %4856  ;;  %v4045_v11 = vmul.f32 0.5, %v4855_v34  ;;  %v3852_v37 = vmul.f32 0.5, %v3622_v54  ;;  %v3512_v44 = vadd.f32 %v3511_v21, %v6594_v49 }
 0x680   : > { %v4859_v28 = vpop.eup %4858  ;;  %v4104_v56 = vmul.f32 0.5, %v4857_v16  ;;  %4862 = vtanh.f32 %v3793_v51  ;;  %v3854_v1 = vmul.f32 0.5, %v3399_v40  ;;  %3739 = vmatmul.f32.gmra.mxu3 %v6681_v7 }
 0x681   : > { %v4861_v36 = vpop.eup %4860  ;;  %v4173_v18 = vadd.f32 0.5, %v4045_v11  ;;  %v4106_v38 = vmul.f32 0.5, %v4859_v28  ;;  %4864 = vtanh.f32 %v3852_v37  ;;  %v3855_v2 = vmul.f32 0.5, %v3512_v44 }
 0x682   : > { %v4232_v27 = vadd.f32 0.5, %v4104_v56  ;;  %v4107_v55 = vmul.f32 0.5, %v4861_v36  ;;  %4866 = vtanh.f32 %v3854_v1 }
 0x683   : > { %4301 = vst [vmem:[%s6623_s22 + $0x98] sm:$0xff] %v4173_v18  ;;  %v4234_v47 = vadd.f32 0.5, %v4106_v38  ;;  %4868 = vtanh.f32 %v3855_v2  ;;  %v3692_v59 = vpop.f32.mrf.mxu3 }
 0x684   : > { %4360 = vst [vmem:[%s6623_s22 + $0x270] sm:$0xff] %v4232_v27  ;;  %v4235_v5 = vadd.f32 0.5, %v4107_v55  ;;  %v3624_v9 = vpop.f32.mrf.mxu2  ;;  %v3693_v48 = vadd.f32 %v3692_v59, %v6810_v60 }
 0x685   : > { %4362 = vst [vmem:[%s6623_s22 + $0x280] sm:$0xff] %v4234_v47  ;;  %v3625_v7 = vadd.f32 %v3624_v9, %v6606_v6  ;;  %v3401_v58 = vpop.f32.mrf.mxu0 }
 0x686   : > { %v4863_v62 = vpop.eup %4862  ;;  %4363 = vst [vmem:[%s6623_s22 + $0x288] sm:$0xff] %v4235_v5  ;;  %v3797_v26 = vmul.f32 0.5, %v3693_v48  ;;  %v3402_v46 = vadd.f32 %v3401_v58, %v6591_v0  ;;  %v3514_v10 = vpop.f32.mrf.mxu1 }
 0x687   : > { %v4865_v3 = vpop.eup %4864  ;;  %v4049_v53 = vmul.f32 0.5, %v4863_v62  ;;  %v3856_v30 = vmul.f32 0.5, %v3625_v7  ;;  %v3515_v50 = vadd.f32 %v3514_v10, %v6594_v49 }
 0x688   : > { %v4867_v57 = vpop.eup %4866  ;;  %v4108_v12 = vmul.f32 0.5, %v4865_v3  ;;  %4870 = vtanh.f32 %v3797_v26  ;;  %v3858_v17 = vmul.f32 0.5, %v3402_v46  ;;  %3742 = vmatmul.f32.gmra.mxu3 %v6694_v15 }
 0x689   : > { %v4869_v61 = vpop.eup %4868  ;;  %v4177_v13 = vadd.f32 0.5, %v4049_v53  ;;  %v4110_v35 = vmul.f32 0.5, %v4867_v57  ;;  %4872 = vtanh.f32 %v3856_v30  ;;  %v3859_v29 = vmul.f32 0.5, %v3515_v50 }
 0x68a   : > { %v4236_v63 = vadd.f32 0.5, %v4108_v12  ;;  %v4111_v33 = vmul.f32 0.5, %v4869_v61  ;;  %4874 = vtanh.f32 %v3858_v17 }
 0x68b   : > { %4305 = vst [vmem:[%s6623_s22 + $0xb8] sm:$0xff] %v4177_v13  ;;  %v4238_v52 = vadd.f32 0.5, %v4110_v35  ;;  %4876 = vtanh.f32 %v3859_v29  ;;  %v3695_v19 = vpop.f32.mrf.mxu3 }
 0x68c   : > { %4364 = vst [vmem:[%s6623_s22 + $0x290] sm:$0xff] %v4236_v63  ;;  %v4239_v32 = vadd.f32 0.5, %v4111_v33  ;;  %v3627_v41 = vpop.f32.mrf.mxu2  ;;  %v3696_v24 = vadd.f32 %v3695_v19, %v6810_v60 }
 0x68d   : > { %4366 = vst [vmem:[%s6623_s22 + $0x2a0] sm:$0xff] %v4238_v52  ;;  %v3628_v15 = vadd.f32 %v3627_v41, %v6606_v6  ;;  %v3404_v20 = vpop.f32.mrf.mxu0 }
 0x68e   : > { %v4871_v43 = vpop.eup %4870  ;;  %4367 = vst [vmem:[%s6623_s22 + $0x2a8] sm:$0xff] %v4239_v32  ;;  %v3801_v31 = vmul.f32 0.5, %v3696_v24  ;;  %v3405_v54 = vadd.f32 %v3404_v20, %v6591_v0  ;;  %v3517_v42 = vpop.f32.mrf.mxu1 }
 0x68f   : > { %v4873_v34 = vpop.eup %4872  ;;  %v4053_v51 = vmul.f32 0.5, %v4871_v43  ;;  %v3860_v40 = vmul.f32 0.5, %v3628_v15  ;;  %v3518_v21 = vadd.f32 %v3517_v42, %v6594_v49 }
 0x690   : > { %v4875_v16 = vpop.eup %4874  ;;  %v4112_v11 = vmul.f32 0.5, %v4873_v34  ;;  %4878 = vtanh.f32 %v3801_v31  ;;  %v3862_v37 = vmul.f32 0.5, %v3405_v54  ;;  %3745 = vmatmul.f32.gmra.mxu3 %v6707_v4 }
 0x691   : > { %v4877_v44 = vpop.eup %4876  ;;  %v4181_v28 = vadd.f32 0.5, %v4053_v51  ;;  %v4114_v56 = vmul.f32 0.5, %v4875_v16  ;;  %4880 = vtanh.f32 %v3860_v40  ;;  %v3863_v1 = vmul.f32 0.5, %v3518_v21 }
 0x692   : > { %v4240_v36 = vadd.f32 0.5, %v4112_v11  ;;  %v4115_v18 = vmul.f32 0.5, %v4877_v44  ;;  %4882 = vtanh.f32 %v3862_v37 }
 0x693   : > { %4309 = vst [vmem:[%s6623_s22 + $0xd8] sm:$0xff] %v4181_v28  ;;  %v4242_v38 = vadd.f32 0.5, %v4114_v56  ;;  %4884 = vtanh.f32 %v3863_v1  ;;  %v3698_v2 = vpop.f32.mrf.mxu3 }
 0x694   : > { %4368 = vst [vmem:[%s6623_s22 + $0x2b0] sm:$0xff] %v4240_v36  ;;  %v4243_v27 = vadd.f32 0.5, %v4115_v18  ;;  %v3630_v55 = vpop.f32.mrf.mxu2  ;;  %v3699_v47 = vadd.f32 %v3698_v2, %v6810_v60 }
 0x695   : > { %4370 = vst [vmem:[%s6623_s22 + $0x2c0] sm:$0xff] %v4242_v38  ;;  %v3631_v4 = vadd.f32 %v3630_v55, %v6606_v6  ;;  %v3407_v59 = vpop.f32.mrf.mxu0 }
 0x696   : > { %v4879_v5 = vpop.eup %4878  ;;  %4371 = vst [vmem:[%s6623_s22 + $0x2c8] sm:$0xff] %v4243_v27  ;;  %v3805_v9 = vmul.f32 0.5, %v3699_v47  ;;  %v3408_v48 = vadd.f32 %v3407_v59, %v6591_v0  ;;  %v3520_v7 = vpop.f32.mrf.mxu1 }
 0x697   : > { %v4881_v58 = vpop.eup %4880  ;;  %v4057_v62 = vmul.f32 0.5, %v4879_v5  ;;  %v3864_v26 = vmul.f32 0.5, %v3631_v4  ;;  %v3521_v46 = vadd.f32 %v3520_v7, %v6594_v49 }
 0x698   : > { %v4883_v10 = vpop.eup %4882  ;;  %v4116_v3 = vmul.f32 0.5, %v4881_v58  ;;  %4886 = vtanh.f32 %v3805_v9  ;;  %v3866_v53 = vmul.f32 0.5, %v3408_v48  ;;  %3748 = vmatmul.f32.gmra.mxu3 %v6720_v14 }
 0x699   : > { %v4885_v30 = vpop.eup %4884  ;;  %v4185_v50 = vadd.f32 0.5, %v4057_v62  ;;  %v4118_v57 = vmul.f32 0.5, %v4883_v10  ;;  %4888 = vtanh.f32 %v3864_v26  ;;  %v3867_v12 = vmul.f32 0.5, %v3521_v46 }
 0x69a   : > { %v4244_v17 = vadd.f32 0.5, %v4116_v3  ;;  %v4119_v61 = vmul.f32 0.5, %v4885_v30  ;;  %4890 = vtanh.f32 %v3866_v53 }
 0x69b   : > { %4313 = vst [vmem:[%s6623_s22 + $0xf8] sm:$0xff] %v4185_v50  ;;  %v4246_v13 = vadd.f32 0.5, %v4118_v57  ;;  %4892 = vtanh.f32 %v3867_v12  ;;  %v3701_v35 = vpop.f32.mrf.mxu3 }
 0x69c   : > { %4372 = vst [vmem:[%s6623_s22 + $0x2d0] sm:$0xff] %v4244_v17  ;;  %v4247_v29 = vadd.f32 0.5, %v4119_v61  ;;  %v3633_v63 = vpop.f32.mrf.mxu2  ;;  %v3702_v33 = vadd.f32 %v3701_v35, %v6810_v60 }
 0x69d   : > { %4374 = vst [vmem:[%s6623_s22 + $0x2e0] sm:$0xff] %v4246_v13  ;;  %v3634_v14 = vadd.f32 %v3633_v63, %v6606_v6  ;;  %v3410_v52 = vpop.f32.mrf.mxu0 }
 0x69e   : > { %v4887_v19 = vpop.eup %4886  ;;  %4375 = vst [vmem:[%s6623_s22 + $0x2e8] sm:$0xff] %v4247_v29  ;;  %v3809_v32 = vmul.f32 0.5, %v3702_v33  ;;  %v3411_v41 = vadd.f32 %v3410_v52, %v6591_v0  ;;  %v3523_v24 = vpop.f32.mrf.mxu1 }
 0x69f   : > { %v4889_v15 = vpop.eup %4888  ;;  %v4061_v20 = vmul.f32 0.5, %v4887_v19  ;;  %v3868_v43 = vmul.f32 0.5, %v3634_v14  ;;  %v3524_v31 = vadd.f32 %v3523_v24, %v6594_v49 }
 0x6a0   : > { %v4891_v54 = vpop.eup %4890  ;;  %v4120_v42 = vmul.f32 0.5, %v4889_v15  ;;  %4894 = vtanh.f32 %v3809_v32  ;;  %v3870_v34 = vmul.f32 0.5, %v3411_v41  ;;  %3751 = vmatmul.f32.gmra.mxu3 %v6733_v22 }
 0x6a1   : > { %v4893_v51 = vpop.eup %4892  ;;  %v4189_v40 = vadd.f32 0.5, %v4061_v20  ;;  %v4122_v21 = vmul.f32 0.5, %v4891_v54  ;;  %4896 = vtanh.f32 %v3868_v43  ;;  %v3871_v16 = vmul.f32 0.5, %v3524_v31 }
 0x6a2   : > { %v4248_v11 = vadd.f32 0.5, %v4120_v42  ;;  %v4123_v37 = vmul.f32 0.5, %v4893_v51  ;;  %4898 = vtanh.f32 %v3870_v34 }
 0x6a3   : > { %4317 = vst [vmem:[%s6623_s22 + $0x118] sm:$0xff] %v4189_v40  ;;  %v4250_v44 = vadd.f32 0.5, %v4122_v21  ;;  %4900 = vtanh.f32 %v3871_v16  ;;  %v3704_v28 = vpop.f32.mrf.mxu3 }
 0x6a4   : > { %4376 = vst [vmem:[%s6623_s22 + $0x2f0] sm:$0xff] %v4248_v11  ;;  %v4251_v56 = vadd.f32 0.5, %v4123_v37  ;;  %v3636_v1 = vpop.f32.mrf.mxu2  ;;  %v3705_v36 = vadd.f32 %v3704_v28, %v6810_v60 }
 0x6a5   : > { %4378 = vst [vmem:[%s6623_s22 + $0x300] sm:$0xff] %v4250_v44  ;;  %v3637_v22 = vadd.f32 %v3636_v1, %v6606_v6  ;;  %v3413_v18 = vpop.f32.mrf.mxu0 }
 0x6a6   : > { %v4895_v38 = vpop.eup %4894  ;;  %4379 = vst [vmem:[%s6623_s22 + $0x308] sm:$0xff] %v4251_v56  ;;  %v3813_v2 = vmul.f32 0.5, %v3705_v36  ;;  %v3414_v27 = vadd.f32 %v3413_v18, %v6591_v0  ;;  %v3526_v55 = vpop.f32.mrf.mxu1 }
 0x6a7   : > { %v4897_v47 = vpop.eup %4896  ;;  %v4065_v4 = vmul.f32 0.5, %v4895_v38  ;;  %v3872_v59 = vmul.f32 0.5, %v3637_v22  ;;  %v3527_v5 = vadd.f32 %v3526_v55, %v6594_v49 }
 0x6a8   : > { %v4899_v9 = vpop.eup %4898  ;;  %v4124_v48 = vmul.f32 0.5, %v4897_v47  ;;  %4902 = vtanh.f32 %v3813_v2  ;;  %v3874_v7 = vmul.f32 0.5, %v3414_v27  ;;  %3754 = vmatmul.f32.gmra.mxu3 %v6746_v25 }
 0x6a9   : > { %v4901_v58 = vpop.eup %4900  ;;  %v4193_v62 = vadd.f32 0.5, %v4065_v4  ;;  %v4126_v26 = vmul.f32 0.5, %v4899_v9  ;;  %4904 = vtanh.f32 %v3872_v59  ;;  %v3875_v46 = vmul.f32 0.5, %v3527_v5 }
 0x6aa   : > { %v4252_v10 = vadd.f32 0.5, %v4124_v48  ;;  %v4127_v3 = vmul.f32 0.5, %v4901_v58  ;;  %4906 = vtanh.f32 %v3874_v7 }
 0x6ab   : > { %4321 = vst [vmem:[%s6623_s22 + $0x138] sm:$0xff] %v4193_v62  ;;  %v4254_v53 = vadd.f32 0.5, %v4126_v26  ;;  %4908 = vtanh.f32 %v3875_v46  ;;  %v3707_v30 = vpop.f32.mrf.mxu3 }
 0x6ac   : > { %4380 = vst [vmem:[%s6623_s22 + $0x310] sm:$0xff] %v4252_v10  ;;  %v4255_v50 = vadd.f32 0.5, %v4127_v3  ;;  %v3639_v57 = vpop.f32.mrf.mxu2  ;;  %v3708_v12 = vadd.f32 %v3707_v30, %v6810_v60 }
 0x6ad   : > { %4382 = vst [vmem:[%s6623_s22 + $0x320] sm:$0xff] %v4254_v53  ;;  %v3640_v25 = vadd.f32 %v3639_v57, %v6606_v6  ;;  %v3416_v17 = vpop.f32.mrf.mxu0 }
 0x6ae   : > { %v4903_v61 = vpop.eup %4902  ;;  %4383 = vst [vmem:[%s6623_s22 + $0x328] sm:$0xff] %v4255_v50  ;;  %v3817_v13 = vmul.f32 0.5, %v3708_v12  ;;  %v3417_v35 = vadd.f32 %v3416_v17, %v6591_v0  ;;  %v3529_v29 = vpop.f32.mrf.mxu1 }
 0x6af   : > { %v4905_v63 = vpop.eup %4904  ;;  %v4069_v33 = vmul.f32 0.5, %v4903_v61  ;;  %v3876_v14 = vmul.f32 0.5, %v3640_v25  ;;  %v3530_v52 = vadd.f32 %v3529_v29, %v6594_v49 }
 0x6b0   : > { %v4907_v19 = vpop.eup %4906  ;;  %v4128_v32 = vmul.f32 0.5, %v4905_v63  ;;  %4910 = vtanh.f32 %v3817_v13  ;;  %v3878_v41 = vmul.f32 0.5, %v3417_v35  ;;  %3757 = vmatmul.f32.gmra.mxu3 %v6764_v8 }
 0x6b1   : > { %v4909_v24 = vpop.eup %4908  ;;  %v4197_v15 = vadd.f32 0.5, %v4069_v33  ;;  %v4130_v20 = vmul.f32 0.5, %v4907_v19  ;;  %4912 = vtanh.f32 %v3876_v14  ;;  %v3879_v43 = vmul.f32 0.5, %v3530_v52 }
 0x6b2   : > { %v4256_v31 = vadd.f32 0.5, %v4128_v32  ;;  %v4131_v54 = vmul.f32 0.5, %v4909_v24  ;;  %4914 = vtanh.f32 %v3878_v41 }
 0x6b3   : > { %4325 = vst [vmem:[%s6623_s22 + $0x158] sm:$0xff] %v4197_v15  ;;  %v4258_v42 = vadd.f32 0.5, %v4130_v20  ;;  %4916 = vtanh.f32 %v3879_v43  ;;  %v3710_v34 = vpop.f32.mrf.mxu3 }
 0x6b4   : > { %4384 = vst [vmem:[%s6623_s22 + $0x330] sm:$0xff] %v4256_v31  ;;  %v4259_v51 = vadd.f32 0.5, %v4131_v54  ;;  %v3642_v40 = vpop.f32.mrf.mxu2  ;;  %v3711_v21 = vadd.f32 %v3710_v34, %v6810_v60 }
 0x6b5   : > { %4386 = vst [vmem:[%s6623_s22 + $0x340] sm:$0xff] %v4258_v42  ;;  %v3643_v8 = vadd.f32 %v3642_v40, %v6606_v6  ;;  %v3419_v16 = vpop.f32.mrf.mxu0 }
 0x6b6   : > { %v4911_v11 = vpop.eup %4910  ;;  %4387 = vst [vmem:[%s6623_s22 + $0x348] sm:$0xff] %v4259_v51  ;;  %v3821_v37 = vmul.f32 0.5, %v3711_v21  ;;  %v3420_v44 = vadd.f32 %v3419_v16, %v6591_v0  ;;  %v3532_v28 = vpop.f32.mrf.mxu1 }
 0x6b7   : > { %v4913_v56 = vpop.eup %4912  ;;  %v4073_v1 = vmul.f32 0.5, %v4911_v11  ;;  %v3880_v36 = vmul.f32 0.5, %v3643_v8  ;;  %v3533_v22 = vadd.f32 %v3532_v28, %v6594_v49 }
 0x6b8   : > { %v4915_v18 = vpop.eup %4914  ;;  %v4132_v38 = vmul.f32 0.5, %v4913_v56  ;;  %4918 = vtanh.f32 %v3821_v37  ;;  %v3882_v2 = vmul.f32 0.5, %v3420_v44  ;;  %3760 = vmatmul.f32.gmra.mxu3 %v6777_v45 }
 0x6b9   : > { %v4917_v27 = vpop.eup %4916  ;;  %v4201_v55 = vadd.f32 0.5, %v4073_v1  ;;  %v4134_v47 = vmul.f32 0.5, %v4915_v18  ;;  %4920 = vtanh.f32 %v3880_v36  ;;  %v3883_v4 = vmul.f32 0.5, %v3533_v22 }
 0x6ba   : > { %v4260_v59 = vadd.f32 0.5, %v4132_v38  ;;  %v4135_v5 = vmul.f32 0.5, %v4917_v27  ;;  %4922 = vtanh.f32 %v3882_v2 }
 0x6bb   : > { %4329 = vst [vmem:[%s6623_s22 + $0x178] sm:$0xff] %v4201_v55  ;;  %v4262_v9 = vadd.f32 0.5, %v4134_v47  ;;  %4924 = vtanh.f32 %v3883_v4  ;;  %v3713_v48 = vpop.f32.mrf.mxu3 }
 0x6bc   : > { %4388 = vst [vmem:[%s6623_s22 + $0x350] sm:$0xff] %v4260_v59  ;;  %v4263_v7 = vadd.f32 0.5, %v4135_v5  ;;  %v3645_v58 = vpop.f32.mrf.mxu2  ;;  %v3714_v62 = vadd.f32 %v3713_v48, %v6810_v60 }
 0x6bd   : > { %4390 = vst [vmem:[%s6623_s22 + $0x360] sm:$0xff] %v4262_v9  ;;  %v3646_v45 = vadd.f32 %v3645_v58, %v6606_v6  ;;  %v3422_v26 = vpop.f32.mrf.mxu0 }
 0x6be   : > { %v4919_v46 = vpop.eup %4918  ;;  %4391 = vst [vmem:[%s6623_s22 + $0x368] sm:$0xff] %v4263_v7  ;;  %v3825_v10 = vmul.f32 0.5, %v3714_v62  ;;  %v3423_v3 = vadd.f32 %v3422_v26, %v6591_v0  ;;  %v3535_v53 = vpop.f32.mrf.mxu1 }
 0x6bf   : > { %v4921_v30 = vpop.eup %4920  ;;  %v4077_v50 = vmul.f32 0.5, %v4919_v46  ;;  %v3884_v57 = vmul.f32 0.5, %v3646_v45  ;;  %v3536_v12 = vadd.f32 %v3535_v53, %v6594_v49 }
 0x6c0   : > { %v4923_v25 = vpop.eup %4922  ;;  %v4136_v17 = vmul.f32 0.5, %v4921_v30  ;;  %4926 = vtanh.f32 %v3825_v10  ;;  %v3886_v61 = vmul.f32 0.5, %v3423_v3  ;;  %3763 = vmatmul.f32.gmra.mxu3 %v6790_v39 }
 0x6c1   : > { %v4925_v13 = vpop.eup %4924  ;;  %v4205_v35 = vadd.f32 0.5, %v4077_v50  ;;  %v4138_v29 = vmul.f32 0.5, %v4923_v25  ;;  %4928 = vtanh.f32 %v3884_v57  ;;  %v3887_v63 = vmul.f32 0.5, %v3536_v12 }
 0x6c2   : > { %v4264_v33 = vadd.f32 0.5, %v4136_v17  ;;  %v4139_v14 = vmul.f32 0.5, %v4925_v13  ;;  %4930 = vtanh.f32 %v3886_v61 }
 0x6c3   : > { %4333 = vst [vmem:[%s6623_s22 + $0x198] sm:$0xff] %v4205_v35  ;;  %v4266_v52 = vadd.f32 0.5, %v4138_v29  ;;  %4932 = vtanh.f32 %v3887_v63  ;;  %v3716_v19 = vpop.f32.mrf.mxu3 }
 0x6c4   : > { %4392 = vst [vmem:[%s6623_s22 + $0x370] sm:$0xff] %v4264_v33  ;;  %v4267_v32 = vadd.f32 0.5, %v4139_v14  ;;  %v3648_v41 = vpop.f32.mrf.mxu2  ;;  %v3717_v24 = vadd.f32 %v3716_v19, %v6810_v60 }
 0x6c5   : > { %4394 = vst [vmem:[%s6623_s22 + $0x380] sm:$0xff] %v4266_v52  ;;  %v3649_v39 = vadd.f32 %v3648_v41, %v6606_v6  ;;  %v3425_v15 = vpop.f32.mrf.mxu0 }
 0x6c6   : > { %v4927_v20 = vpop.eup %4926  ;;  %4395 = vst [vmem:[%s6623_s22 + $0x388] sm:$0xff] %v4267_v32  ;;  %v3829_v43 = vmul.f32 0.5, %v3717_v24  ;;  %v3426_v31 = vadd.f32 %v3425_v15, %v6591_v0  ;;  %v3538_v54 = vpop.f32.mrf.mxu1 }
 0x6c7   : > { %v4929_v42 = vpop.eup %4928  ;;  %v4081_v34 = vmul.f32 0.5, %v4927_v20  ;;  %v3888_v51 = vmul.f32 0.5, %v3649_v39  ;;  %v3539_v40 = vadd.f32 %v3538_v54, %v6594_v49 }
 0x6c8   : > { %v4931_v21 = vpop.eup %4930  ;;  %v4140_v8 = vmul.f32 0.5, %v4929_v42  ;;  %4934 = vtanh.f32 %v3829_v43  ;;  %v3890_v16 = vmul.f32 0.5, %v3426_v31  ;;  %3766 = vmatmul.f32.gmra.mxu3 %v6803_v23 }
 0x6c9   : > { %v4933_v11 = vpop.eup %4932  ;;  %v4209_v37 = vadd.f32 0.5, %v4081_v34  ;;  %v4142_v44 = vmul.f32 0.5, %v4931_v21  ;;  %4936 = vtanh.f32 %v3888_v51  ;;  %v3891_v28 = vmul.f32 0.5, %v3539_v40 }
 0x6ca   : > { %v4268_v56 = vadd.f32 0.5, %v4140_v8  ;;  %v4143_v1 = vmul.f32 0.5, %v4933_v11  ;;  %4938 = vtanh.f32 %v3890_v16 }
 0x6cb   : > { %4337 = vst [vmem:[%s6623_s22 + $0x1b8] sm:$0xff] %v4209_v37  ;;  %v4270_v36 = vadd.f32 0.5, %v4142_v44  ;;  %4940 = vtanh.f32 %v3891_v28  ;;  %v3719_v22 = vpop.f32.mrf.mxu3 }
 0x6cc   : > { %4396 = vst [vmem:[%s6623_s22 + $0x390] sm:$0xff] %v4268_v56  ;;  %v4271_v18 = vadd.f32 0.5, %v4143_v1  ;;  %v3651_v38 = vpop.f32.mrf.mxu2  ;;  %v3720_v2 = vadd.f32 %v3719_v22, %v6810_v60 }
 0x6cd   : > { %4398 = vst [vmem:[%s6623_s22 + $0x3a0] sm:$0xff] %v4270_v36  ;;  %v3652_v23 = vadd.f32 %v3651_v38, %v6606_v6  ;;  %v3428_v27 = vpop.f32.mrf.mxu0 }
 0x6ce   : > { %v4935_v55 = vpop.eup %4934  ;;  %4399 = vst [vmem:[%s6623_s22 + $0x3a8] sm:$0xff] %v4271_v18  ;;  %v3833_v47 = vmul.f32 0.5, %v3720_v2  ;;  %v3429_v4 = vadd.f32 %v3428_v27, %v6591_v0  ;;  %v3541_v59 = vpop.f32.mrf.mxu1 }
 0x6cf   : > { %v4937_v5 = vpop.eup %4936  ;;  %v4085_v9 = vmul.f32 0.5, %v4935_v55  ;;  %v3892_v48 = vmul.f32 0.5, %v3652_v23  ;;  %v3542_v7 = vadd.f32 %v3541_v59, %v6594_v49 }
 0x6d0   : > { %v4939_v58 = vpop.eup %4938  ;;  %v4144_v62 = vmul.f32 0.5, %v4937_v5  ;;  %4942 = vtanh.f32 %v3833_v47  ;;  %v3894_v45 = vmul.f32 0.5, %v3429_v4 }
 0x6d1   : > { %v4941_v26 = vpop.eup %4940  ;;  %v4213_v46 = vadd.f32 0.5, %v4085_v9  ;;  %v4146_v10 = vmul.f32 0.5, %v4939_v58  ;;  %4944 = vtanh.f32 %v3892_v48  ;;  %v3895_v3 = vmul.f32 0.5, %v3542_v7 }
 0x6d2   : > { %v4272_v0 = vadd.f32 0.5, %v4144_v62  ;;  %v4147_v53 = vmul.f32 0.5, %v4941_v26  ;;  %4946 = vtanh.f32 %v3894_v45 }
 0x6d3   : > { %4341 = vst [vmem:[%s6623_s22 + $0x1d8] sm:$0xff] %v4213_v46  ;;  %v4274_v30 = vadd.f32 0.5, %v4146_v10  ;;  %4948 = vtanh.f32 %v3895_v3  ;;  %v3722_v50 = vpop.f32.mrf.mxu3 }
 0x6d4   : > { %4400 = vst [vmem:[%s6623_s22 + $0x3b0] sm:$0xff] %v4272_v0  ;;  %v4275_v49 = vadd.f32 0.5, %v4147_v53  ;;  %v3654_v57 = vpop.f32.mrf.mxu2  ;;  %v3723_v12 = vadd.f32 %v3722_v50, %v6810_v60 }
 0x6d5   : > { %4402 = vst [vmem:[%s6623_s22 + $0x3c0] sm:$0xff] %v4274_v30  ;;  %v3655_v25 = vadd.f32 %v3654_v57, %v6606_v6 }
 0x6d6   : > { %v4943_v17 = vpop.eup %4942  ;;  %4403 = vst [vmem:[%s6623_s22 + $0x3c8] sm:$0xff] %v4275_v49  ;;  %v3837_v61 = vmul.f32 0.5, %v3723_v12 }
 0x6d7   : > { %v4945_v13 = vpop.eup %4944  ;;  %v4089_v35 = vmul.f32 0.5, %v4943_v17  ;;  %v3896_v29 = vmul.f32 0.5, %v3655_v25 }
 0x6d8   : > { %v4947_v63 = vpop.eup %4946  ;;  %v4148_v33 = vmul.f32 0.5, %v4945_v13  ;;  %4950 = vtanh.f32 %v3837_v61 }
 0x6d9   : > { %v4949_v14 = vpop.eup %4948  ;;  %v4217_v52 = vadd.f32 0.5, %v4089_v35  ;;  %v4150_v19 = vmul.f32 0.5, %v4947_v63  ;;  %4952 = vtanh.f32 %v3896_v29 }
 0x6da   : > { %v4276_v32 = vadd.f32 0.5, %v4148_v33  ;;  %v4151_v41 = vmul.f32 0.5, %v4949_v14 }
 0x6db   : > { %4345 = vst [vmem:[%s6623_s22 + $0x1f8] sm:$0xff] %v4217_v52  ;;  %v4278_v6 = vadd.f32 0.5, %v4150_v19  ;;  %v3725_v24 = vpop.f32.mrf.mxu3 }
 0x6dc   : > { %4404 = vst [vmem:[%s6623_s22 + $0x3d0] sm:$0xff] %v4276_v32  ;;  %v4279_v39 = vadd.f32 0.5, %v4151_v41  ;;  %v3726_v15 = vadd.f32 %v3725_v24, %v6810_v60 }
 0x6dd   : > { %4406 = vst [vmem:[%s6623_s22 + $0x3e0] sm:$0xff] %v4278_v6 }
 0x6de   : > { %v4951_v20 = vpop.eup %4950  ;;  %4407 = vst [vmem:[%s6623_s22 + $0x3e8] sm:$0xff] %v4279_v39  ;;  %v3841_v43 = vmul.f32 0.5, %v3726_v15 }
 0x6df   : > { %v4953_v31 = vpop.eup %4952  ;;  %v4093_v54 = vmul.f32 0.5, %v4951_v20 }
 0x6e0   : > { %v4152_v42 = vmul.f32 0.5, %v4953_v31  ;;  %4954 = vtanh.f32 %v3841_v43 }
 0x6e1   : > { %v4221_v34 = vadd.f32 0.5, %v4093_v54 }
 0x6e2   : > { %v4280_v51 = vadd.f32 0.5, %v4152_v42 }
 0x6e3   : > { %4349 = vst [vmem:[%s6623_s22 + $0x218] sm:$0xff] %v4221_v34  ;;  %v3728_v40 = vpop.f32.mrf.mxu3 }
 0x6e4   : > { %4408 = vst [vmem:[%s6623_s22 + $0x3f0] sm:$0xff] %v4280_v51  ;;  %v3729_v21 = vadd.f32 %v3728_v40, %v6810_v60 }
 0x6e6   : > { %v4955_v8 = vpop.eup %4954  ;;  %v3845_v16 = vmul.f32 0.5, %v3729_v21 }
 0x6e7   : > { %v4097_v11 = vmul.f32 0.5, %v4955_v8 }
 0x6e8   : > { %4956 = vtanh.f32 %v3845_v16 }
 0x6e9   : > { %v4225_v37 = vadd.f32 0.5, %v4097_v11 }
 0x6eb   : > { %4353 = vst [vmem:[%s6623_s22 + $0x238] sm:$0xff] %v4225_v37  ;;  %v3731_v44 = vpop.f32.mrf.mxu3 }
 0x6ec   : > { %v3732_v28 = vadd.f32 %v3731_v44, %v6810_v60 }
 0x6ee   : > { %v4957_v56 = vpop.eup %4956  ;;  %v3849_v1 = vmul.f32 0.5, %v3732_v28 }
 0x6ef   : > { %v4101_v36 = vmul.f32 0.5, %v4957_v56 }
 0x6f0   : > { %4958 = vtanh.f32 %v3849_v1 }
 0x6f1   : > { %v4229_v22 = vadd.f32 0.5, %v4101_v36 }
 0x6f3   : > { %4357 = vst [vmem:[%s6623_s22 + $0x258] sm:$0xff] %v4229_v22  ;;  %v3734_v18 = vpop.f32.mrf.mxu3 }
 0x6f4   : > { %v3735_v38 = vadd.f32 %v3734_v18, %v6810_v60 }
 0x6f6   : > { %v4959_v2 = vpop.eup %4958  ;;  %v3853_v23 = vmul.f32 0.5, %v3735_v38 }
 0x6f7   : > { %v4105_v27 = vmul.f32 0.5, %v4959_v2 }
 0x6f8   : > { %4960 = vtanh.f32 %v3853_v23 }
 0x6f9   : > { %v4233_v55 = vadd.f32 0.5, %v4105_v27 }
 0x6fb   : > { %4361 = vst [vmem:[%s6623_s22 + $0x278] sm:$0xff] %v4233_v55  ;;  %v3737_v47 = vpop.f32.mrf.mxu3 }
 0x6fc   : > { %v3738_v4 = vadd.f32 %v3737_v47, %v6810_v60 }
 0x6fe   : > { %v4961_v59 = vpop.eup %4960  ;;  %v3857_v5 = vmul.f32 0.5, %v3738_v4 }
 0x6ff   : > { %v4109_v9 = vmul.f32 0.5, %v4961_v59 }
 0x700   : > { %4962 = vtanh.f32 %v3857_v5 }
 0x701   : > { %v4237_v48 = vadd.f32 0.5, %v4109_v9 }
 0x703   : > { %4365 = vst [vmem:[%s6623_s22 + $0x298] sm:$0xff] %v4237_v48  ;;  %v3740_v7 = vpop.f32.mrf.mxu3 }
 0x704   : > { %v3741_v58 = vadd.f32 %v3740_v7, %v6810_v60 }
 0x706   : > { %v4963_v62 = vpop.eup %4962  ;;  %v3861_v45 = vmul.f32 0.5, %v3741_v58 }
 0x707   : > { %v4113_v26 = vmul.f32 0.5, %v4963_v62 }
 0x708   : > { %4964 = vtanh.f32 %v3861_v45 }
 0x709   : > { %v4241_v46 = vadd.f32 0.5, %v4113_v26 }
 0x70b   : > { %4369 = vst [vmem:[%s6623_s22 + $0x2b8] sm:$0xff] %v4241_v46  ;;  %v3743_v10 = vpop.f32.mrf.mxu3 }
 0x70c   : > { %v3744_v3 = vadd.f32 %v3743_v10, %v6810_v60 }
 0x70e   : > { %v4965_v0 = vpop.eup %4964  ;;  %v3865_v53 = vmul.f32 0.5, %v3744_v3 }
 0x70f   : > { %v4117_v30 = vmul.f32 0.5, %v4965_v0 }
 0x710   : > { %4966 = vtanh.f32 %v3865_v53 }
 0x711   : > { %v4245_v50 = vadd.f32 0.5, %v4117_v30 }
 0x713   : > { %4373 = vst [vmem:[%s6623_s22 + $0x2d8] sm:$0xff] %v4245_v50  ;;  %v3746_v49 = vpop.f32.mrf.mxu3 }
 0x714   : > { %v3747_v57 = vadd.f32 %v3746_v49, %v6810_v60 }
 0x716   : > { %v4967_v12 = vpop.eup %4966  ;;  %v3869_v25 = vmul.f32 0.5, %v3747_v57 }
 0x717   : > { %v4121_v17 = vmul.f32 0.5, %v4967_v12 }
 0x718   : > { %4968 = vtanh.f32 %v3869_v25 }
 0x719   : > { %v4249_v61 = vadd.f32 0.5, %v4121_v17 }
 0x71b   : > { %4377 = vst [vmem:[%s6623_s22 + $0x2f8] sm:$0xff] %v4249_v61  ;;  %v3749_v13 = vpop.f32.mrf.mxu3 }
 0x71c   : > { %v3750_v35 = vadd.f32 %v3749_v13, %v6810_v60 }
 0x71e   : > { %v4969_v29 = vpop.eup %4968  ;;  %v3873_v63 = vmul.f32 0.5, %v3750_v35 }
 0x71f   : > { %v4125_v33 = vmul.f32 0.5, %v4969_v29 }
 0x720   : > { %4970 = vtanh.f32 %v3873_v63 }
 0x721   : > { %v4253_v14 = vadd.f32 0.5, %v4125_v33 }
 0x723   : > { %4381 = vst [vmem:[%s6623_s22 + $0x318] sm:$0xff] %v4253_v14  ;;  %v3752_v52 = vpop.f32.mrf.mxu3 }
 0x724   : > { %v3753_v19 = vadd.f32 %v3752_v52, %v6810_v60 }
 0x726   : > { %v4971_v32 = vpop.eup %4970  ;;  %v3877_v41 = vmul.f32 0.5, %v3753_v19 }
 0x727   : > { %v4129_v6 = vmul.f32 0.5, %v4971_v32 }
 0x728   : > { %4972 = vtanh.f32 %v3877_v41 }
 0x729   : > { %v4257_v24 = vadd.f32 0.5, %v4129_v6 }
 0x72b   : > { %4385 = vst [vmem:[%s6623_s22 + $0x338] sm:$0xff] %v4257_v24  ;;  %v3755_v39 = vpop.f32.mrf.mxu3 }
 0x72c   : > { %v3756_v15 = vadd.f32 %v3755_v39, %v6810_v60 }
 0x72e   : > { %v4973_v20 = vpop.eup %4972  ;;  %v3881_v43 = vmul.f32 0.5, %v3756_v15 }
 0x72f   : > { %v4133_v31 = vmul.f32 0.5, %v4973_v20 }
 0x730   : > { %4974 = vtanh.f32 %v3881_v43 }
 0x731   : > { %v4261_v54 = vadd.f32 0.5, %v4133_v31 }
 0x733   : > { %4389 = vst [vmem:[%s6623_s22 + $0x358] sm:$0xff] %v4261_v54  ;;  %v3758_v42 = vpop.f32.mrf.mxu3 }
 0x734   : > { %v3759_v34 = vadd.f32 %v3758_v42, %v6810_v60 }
 0x736   : > { %v4975_v51 = vpop.eup %4974  ;;  %v3885_v40 = vmul.f32 0.5, %v3759_v34 }
 0x737   : > { %v4137_v21 = vmul.f32 0.5, %v4975_v51 }
 0x738   : > { %4976 = vtanh.f32 %v3885_v40 }
 0x739   : > { %v4265_v8 = vadd.f32 0.5, %v4137_v21 }
 0x73b   : > { %4393 = vst [vmem:[%s6623_s22 + $0x378] sm:$0xff] %v4265_v8  ;;  %v3761_v16 = vpop.f32.mrf.mxu3 }
 0x73c   : > { %v3762_v11 = vadd.f32 %v3761_v16, %v6810_v60 }
 0x73e   : > { %v4977_v37 = vpop.eup %4976  ;;  %v3889_v44 = vmul.f32 0.5, %v3762_v11 }
 0x73f   : > { %v4141_v28 = vmul.f32 0.5, %v4977_v37 }
 0x740   : > { %4978 = vtanh.f32 %v3889_v44 }
 0x741   : > { %v4269_v56 = vadd.f32 0.5, %v4141_v28 }
 0x743   : > { %4397 = vst [vmem:[%s6623_s22 + $0x398] sm:$0xff] %v4269_v56  ;;  %v3764_v1 = vpop.f32.mrf.mxu3 }
 0x744   : > { %v3765_v36 = vadd.f32 %v3764_v1, %v6810_v60 }
 0x746   : > { %v4979_v22 = vpop.eup %4978  ;;  %v3893_v18 = vmul.f32 0.5, %v3765_v36 }
 0x747   : > { %v4145_v38 = vmul.f32 0.5, %v4979_v22 }
 0x748   : > { %4980 = vtanh.f32 %v3893_v18 }
 0x749   : > { %v4273_v2 = vadd.f32 0.5, %v4145_v38 }
 0x74b   : > { %4401 = vst [vmem:[%s6623_s22 + $0x3b8] sm:$0xff] %v4273_v2  ;;  %v3767_v23 = vpop.f32.mrf.mxu3 }
 0x74c   : > { %v3768_v27 = vadd.f32 %v3767_v23, %v6810_v60 }
 0x74e   : > { %v4981_v55 = vpop.eup %4980  ;;  %v3897_v47 = vmul.f32 0.5, %v3768_v27 }
 0x74f   : > { %v4149_v4 = vmul.f32 0.5, %v4981_v55 }
 0x750   : > { %4982 = vtanh.f32 %v3897_v47 }
 0x751   : > { %v4277_v59 = vadd.f32 0.5, %v4149_v4 }
 0x753   : > { %4405 = vst [vmem:[%s6623_s22 + $0x3d8] sm:$0xff] %v4277_v59 }
 0x756   : > { %v4983_v5 = vpop.eup %4982 }
 0x757   : > { %v4153_v9 = vmul.f32 0.5, %v4983_v5 }
 0x759   : > { %v4281_v48 = vadd.f32 0.5, %v4153_v9 }
 0x75b   : > { %4409 = vst [vmem:[%s6623_s22 + $0x3f8] sm:$0xff] %v4281_v48 }
 0x75c PF: > { %s31_s2 = sadd.s32 1, %s4991_s2  }
 0x75d   : > { %p28_p4 = scmp.ge.s32.totalorder %s31_s2, 4  }
 0x75f   :  { %30 = sbr.rel (!%p28_p4) target bundleno = 7 (0x7), region = 134 }

</bundles_post_ra>
